<compile_context>
chip_gen: v5e
topology: v5e:2x2
jax: 0.10.0
libtpu: 0.0.40
codegen_flags: <defaults>
</compile_context>

<pallas_src>
import jax
import jax.numpy as jnp
from jax.experimental import pallas as pl
from jax.experimental.pallas import tpu as pltpu

EPS = 1e-5
TILE_M = 256     # rows per grid step (256-512 keeps v5e's smaller scoped VMEM happy)
LANES = 128      # pad channel dim to the 128-lane vreg width


def _round_up(x, m):
    return (x + m - 1) // m * m


# ----------------------------------------------------------------------------
# Pallas kernels
# ----------------------------------------------------------------------------
def _conv_stats_kernel(xcol_ref, w_ref, y_ref, stats_ref):
    """3x3 conv as one tap-folded matmul + BN sum/sumsq accumulation.

    xcol_ref : (TILE_M, 9*C)  bf16 im2col tile
    w_ref    : (9*C, Cp)      bf16 flattened HWIO weights (resident)
    y_ref    : (TILE_M, Cp)   f32 raw conv output tile
    stats_ref: (2, Cp)        f32 [sum; sum of squares], accumulated over grid
    """
    acc = jnp.dot(xcol_ref[...], w_ref[...], preferred_element_type=jnp.float32)
    y_ref[...] = acc

    @pl.when(pl.program_id(0) == 0)
    def _():
        stats_ref[...] = jnp.zeros_like(stats_ref)

    stats_ref[...] += jnp.concatenate(
        [jnp.sum(acc, axis=0, keepdims=True),
         jnp.sum(acc * acc, axis=0, keepdims=True)], axis=0)


def _bn_relu_kernel(y_ref, scale_ref, shift_ref, a_ref):
    """Folded BatchNorm affine + ReLU, cast to bf16."""
    a_ref[...] = jnp.maximum(
        y_ref[...] * scale_ref[...] + shift_ref[...], 0.0).astype(a_ref.dtype)


def _make_final_kernel(use_downsample: bool):
    if use_downsample:
        def kernel(y_ref, scale_ref, shift_ref, xid_ref, wd_ref, bd_ref, out_ref):
            y = y_ref[...] * scale_ref[...] + shift_ref[...]
            ident = jnp.dot(xid_ref[...], wd_ref[...],
                            preferred_element_type=jnp.float32) + bd_ref[...]
            out_ref[...] = jnp.maximum(y + ident, 0.0)
    else:
        def kernel(y_ref, scale_ref, shift_ref, xid_ref, out_ref):
            y = y_ref[...] * scale_ref[...] + shift_ref[...]
            out_ref[...] = jnp.maximum(y + xid_ref[...], 0.0)
    return kernel


# ----------------------------------------------------------------------------
# pallas_call wrappers
# ----------------------------------------------------------------------------
def _conv_stats(xcol, w_mat, tile_m):
    m_pad, k = xcol.shape
    cp = w_mat.shape[1]
    return pl.pallas_call(
        _conv_stats_kernel,
        grid=(m_pad // tile_m,),
        in_specs=[pl.BlockSpec((tile_m, k), lambda i: (i, 0)),
                  pl.BlockSpec((k, cp), lambda i: (0, 0))],
        out_specs=(pl.BlockSpec((tile_m, cp), lambda i: (i, 0)),
                   pl.BlockSpec((2, cp), lambda i: (0, 0))),
        out_shape=(jax.ShapeDtypeStruct((m_pad, cp), jnp.float32),
                   jax.ShapeDtypeStruct((2, cp), jnp.float32)),
        compiler_params=pltpu.CompilerParams(
            dimension_semantics=("arbitrary",)),
    )(xcol, w_mat)


def _bn_relu(y, scale, shift, tile_m):
    m_pad, cp = y.shape
    return pl.pallas_call(
        _bn_relu_kernel,
        grid=(m_pad // tile_m,),
        in_specs=[pl.BlockSpec((tile_m, cp), lambda i: (i, 0)),
                  pl.BlockSpec((1, cp), lambda i: (0, 0)),
                  pl.BlockSpec((1, cp), lambda i: (0, 0))],
        out_specs=pl.BlockSpec((tile_m, cp), lambda i: (i, 0)),
        out_shape=jax.ShapeDtypeStruct((m_pad, cp), jnp.bfloat16),
        compiler_params=pltpu.CompilerParams(
            dimension_semantics=("parallel",)),
    )(y, scale, shift)


def _final(y2, scale, shift, xid, wd, bd, tile_m, use_downsample):
    m_pad, cp = y2.shape
    if use_downsample:
        cin = xid.shape[1]
        in_specs = [pl.BlockSpec((tile_m, cp), lambda i: (i, 0)),
                    pl.BlockSpec((1, cp), lambda i: (0, 0)),
                    pl.BlockSpec((1, cp), lambda i: (0, 0)),
                    pl.BlockSpec((tile_m, cin), lambda i: (i, 0)),
                    pl.BlockSpec((cin, cp), lambda i: (0, 0)),
                    pl.BlockSpec((1, cp), lambda i: (0, 0))]
        args = (y2, scale, shift, xid, wd, bd)
    else:
        in_specs = [pl.BlockSpec((tile_m, cp), lambda i: (i, 0)),
                    pl.BlockSpec((1, cp), lambda i: (0, 0)),
                    pl.BlockSpec((1, cp), lambda i: (0, 0)),
                    pl.BlockSpec((tile_m, cp), lambda i: (i, 0))]
        args = (y2, scale, shift, xid)
    return pl.pallas_call(
        _make_final_kernel(use_downsample),
        grid=(m_pad // tile_m,),
        in_specs=in_specs,
        out_specs=pl.BlockSpec((tile_m, cp), lambda i: (i, 0)),
        out_shape=jax.ShapeDtypeStruct((m_pad, cp), jnp.float32),
        compiler_params=pltpu.CompilerParams(
            dimension_semantics=("parallel",)),
    )(*args)


# ----------------------------------------------------------------------------
# Glue (plain JAX): layout conversion, im2col (taps folded into K), padding
# ----------------------------------------------------------------------------
def _im2col_3x3(x_nhwc):
    """(N,H,W,C) -> (N*H*W, 9*C): 3x3 taps folded into the contraction dim."""
    n, h, w, c = x_nhwc.shape
    xp = jnp.pad(x_nhwc, ((0, 0), (1, 1), (1, 1), (0, 0)))
    cols = [xp[:, dy:dy + h, dx:dx + w, :] for dy in range(3) for dx in range(3)]
    return jnp.concatenate(cols, axis=-1).reshape(n * h * w, 9 * c)


def _pad_rows(x, m_pad):
    return jnp.pad(x, ((0, m_pad - x.shape[0]), (0, 0)))


def _pad_cols(x, c_pad):
    return jnp.pad(x, ((0, 0), (0, c_pad - x.shape[1])))


def resblock_forward(x_nchw, params, tile_m=TILE_M):
    """Pallas implementation of ResBlock.forward. x_nchw: (N, Cin, H, W) f32."""
    n, cin, h, w = x_nchw.shape
    cout = params["w1"].shape[0]
    use_downsample = cin != cout

    m_real = n * h * w
    m_pad = _round_up(m_real, tile_m)
    cp = _round_up(cout, LANES)          # lane-dense (128-padded) channel dim

    x_nhwc = jnp.transpose(x_nchw, (0, 2, 3, 1)).astype(jnp.float32)

    # ---- weights: HWIO-flattened, channel-padded, bf16 ----
    w1_mat = jnp.transpose(params["w1"], (2, 3, 1, 0)).reshape(9 * cin, cout)
    w1_mat = _pad_cols(w1_mat, cp).astype(jnp.bfloat16)              # (9*Cin, Cp)
    w2_hwio = jnp.transpose(params["w2"], (2, 3, 1, 0))              # (3,3,Cout,Cout)
    w2_hwio = jnp.pad(w2_hwio, ((0, 0), (0, 0),
                                (0, cp - cout), (0, cp - cout)))
    w2_mat = w2_hwio.reshape(9 * cp, cp).astype(jnp.bfloat16)        # (9*Cp, Cp)

    g1 = jnp.pad(params["g1"], (0, cp - cout))
    be1 = jnp.pad(params["be1"], (0, cp - cout))
    g2 = jnp.pad(params["g2"], (0, cp - cout))
    be2 = jnp.pad(params["be2"], (0, cp - cout))
    # Note: conv biases b1/b2 are intentionally NOT added — they are cancelled
    # exactly by the BatchNorm mean subtraction, so the output is unchanged.

    def scale_shift(stats, g, be):
        mean = stats[0] / m_real
        var = jnp.maximum(stats[1] / m_real - mean * mean, 0.0)
        scale = g * jax.lax.rsqrt(var + EPS)
        shift = be - mean * scale
        return (scale.reshape(1, cp).astype(jnp.float32),
                shift.reshape(1, cp).astype(jnp.float32))

    # ---- stage 1: conv1 (+ BN1 stats) ----
    xcol1 = _pad_rows(_im2col_3x3(x_nhwc).astype(jnp.bfloat16), m_pad)
    y1, stats1 = _conv_stats(xcol1, w1_mat, tile_m)
    s1, t1 = scale_shift(stats1, g1, be1)

    # ---- BN1 + ReLU (elementwise pass, bf16 output) ----
    a1 = _bn_relu(y1, s1, t1, tile_m)

    # ---- stage 2: conv2 (+ BN2 stats) ----
    a1_nhwc = a1[:m_real].reshape(n, h, w, cp)
    xcol2 = _pad_rows(_im2col_3x3(a1_nhwc), m_pad)                   # bf16
    y2, stats2 = _conv_stats(xcol2, w2_mat, tile_m)
    s2, t2 = scale_shift(stats2, g2, be2)

    # ---- final: BN2 + identity / 1x1 downsample + residual add + ReLU ----
    if use_downsample:
        xid = _pad_rows(x_nhwc.reshape(m_real, cin), m_pad).astype(jnp.bfloat16)
        wd = _pad_cols(params["wd"].reshape(cout, cin).T, cp).astype(jnp.bfloat16)
        bd = jnp.pad(params["bd"], (0, cp - cout)).reshape(1, cp).astype(jnp.float32)
        out = _final(y2, s2, t2, xid, wd, bd, tile_m, True)
    else:
        xid = _pad_rows(_pad_cols(x_nhwc.reshape(m_real, cin), cp), m_pad)
        out = _final(y2, s2, t2, xid, None, None, tile_m, False)

    out = out[:m_real, :cout].reshape(n, h, w, cout)
    return jnp.transpose(out, (0, 3, 1, 2))  # back to NCHW
    # TODO(synk): BatchNorm running-stat (momentum) buffer updates are a
    # training-time side effect and are not modeled; they do not affect the
    # forward output in training mode.


# ----------------------------------------------------------------------------
# Pure-JAX reference (for verification)
# ----------------------------------------------------------------------------
def resblock_reference(x, params):
    def conv(x, w, b, pad):
        y = jax.lax.conv_general_dilated(
            x, w, window_strides=(1, 1), padding=[(pad, pad), (pad, pad)],
            dimension_numbers=("NCHW", "OIHW", "NCHW"))
        return y + b[None, :, None, None]

    def bn(x, g, be):
        mean = x.mean(axis=(0, 2, 3), keepdims=True)
        var = ((x - mean) ** 2).mean(axis=(0, 2, 3), keepdims=True)
        xhat = (x - mean) * jax.lax.rsqrt(var + EPS)
        return xhat * g[None, :, None, None] + be[None, :, None, None]

    cin = x.shape[1]
    cout = params["w1"].shape[0]
    h = jax.nn.relu(bn(conv(x, params["w1"], params["b1"], 1),
                       params["g1"], params["be1"]))
    h = bn(conv(h, params["w2"], params["b2"], 1), params["g2"], params["be2"])
    if cin != cout:
        ident = conv(x, params["wd"], params["bd"], 0)
    else:
        ident = x
    return jax.nn.relu(h + ident)


# ----------------------------------------------------------------------------
# Deterministic parameter construction + test
# ----------------------------------------------------------------------------
def make_params(key, cin, cout):
    ks = jax.random.split(key, 8)
    return {
        "w1": 0.1 * jax.random.normal(ks[0], (cout, cin, 3, 3), jnp.float32),
        "b1": 0.1 * jax.random.normal(ks[1], (cout,), jnp.float32),
        "g1": jnp.ones((cout,), jnp.float32) + 0.1 * jax.random.normal(ks[2], (cout,)),
        "be1": 0.1 * jax.random.normal(ks[3], (cout,), jnp.float32),
        "w2": 0.1 * jax.random.normal(ks[4], (cout, cout, 3, 3), jnp.float32),
        "b2": 0.1 * jax.random.normal(ks[5], (cout,), jnp.float32),
        "g2": jnp.ones((cout,), jnp.float32) + 0.1 * jax.random.normal(ks[6], (cout,)),
        "be2": 0.1 * jax.random.normal(ks[7], (cout,), jnp.float32),
        "wd": 0.1 * jax.random.normal(jax.random.fold_in(key, 99),
                                      (cout, cin, 1, 1), jnp.float32),
        "bd": 0.1 * jax.random.normal(jax.random.fold_in(key, 100),
                                      (cout,), jnp.float32),
    }


if __name__ == "__main__":
    N, CIN, COUT, H, W = 2, 4, 8, 16, 16
    key = jax.random.PRNGKey(0)
    kx, kp = jax.random.split(key)
    x = jax.random.normal(kx, (N, CIN, H, W), jnp.float32)
    params = make_params(kp, CIN, COUT)

    fwd = jax.jit(resblock_forward)
    out = jax.block_until_ready(fwd(x, params))
    ref = jax.block_until_ready(resblock_reference(x, params))

    assert out.shape == (N, COUT, H, W), out.shape
    assert jnp.allclose(out, ref, rtol=2e-2, atol=2e-2), (
        float(jnp.max(jnp.abs(out - ref))))
    print("KERNEL_OK")
</pallas_src>

<mosaic_0001>
module attributes {stable_mosaic.version = 11 : i64} {
  func.func @_conv_stats_kernel(%arg0: i32, %arg1: memref<256x36xbf16, #tpu.memory_space<vmem>>, %arg2: memref<36x128xbf16, #tpu.memory_space<vmem>>, %arg3: memref<256x128xf32, #tpu.memory_space<vmem>>, %arg4: memref<2x128xf32, #tpu.memory_space<vmem>>) attributes {dimension_semantics = [#tpu.dimension_semantics<arbitrary>], iteration_bounds = array<i64: 2>, scalar_prefetch = 0 : i64, scratch_operands = 0 : i64, tpu.core_type = #tpu.core_type<tc>, window_params = [{transform_indices = @transform_0, window_bounds = array<i64: 256, 36>}, {pipeline_mode = #tpu.pipeline_mode<synchronous>, transform_indices = @transform_1, window_bounds = array<i64: 36, 128>}, {transform_indices = @transform_2, window_bounds = array<i64: 256, 128>}, {pipeline_mode = #tpu.pipeline_mode<synchronous>, transform_indices = @transform_3, window_bounds = array<i64: 2, 128>}]} {
    %c0 = arith.constant 0 : index
    %c0_0 = arith.constant 0 : index
    %0 = vector.load %arg1[%c0, %c0_0] : memref<256x36xbf16, #tpu.memory_space<vmem>>, vector<256x36xbf16>
    %c0_1 = arith.constant 0 : index
    %c0_2 = arith.constant 0 : index
    %1 = vector.load %arg2[%c0_1, %c0_2] : memref<36x128xbf16, #tpu.memory_space<vmem>>, vector<36x128xbf16>
    %cst = arith.constant dense<0.000000e+00> : vector<256x128xf32>
    %2 = tpu.matmul %0, %1, %cst {dimension_numbers = #tpu.dot_dimension_numbers<[1], [0], [0], [1], [0, 0, 1, 1], [], []>} : vector<256x36xbf16>, vector<36x128xbf16>, vector<256x128xf32> -> vector<256x128xf32>
    %c0_3 = arith.constant 0 : index
    %c0_4 = arith.constant 0 : index
    %3 = vector.load %arg3[%c0_3, %c0_4] : memref<256x128xf32, #tpu.memory_space<vmem>>, vector<256x128xf32>
    tpu.vector_store %arg3[%c0_3, %c0_4], %2 {strides = array<i32>} : memref<256x128xf32, #tpu.memory_space<vmem>>, vector<256x128xf32>,
    %c0_i32 = arith.constant 0 : i32
    %4 = arith.cmpi eq, %arg0, %c0_i32 : i32
    %5 = arith.extui %4 : i1 to i32
    %c0_i32_5 = arith.constant 0 : i32
    %6 = arith.cmpi ne, %5, %c0_i32_5 : i32
    scf.if %6 {
      %cst_12 = arith.constant 0.000000e+00 : f32
      %16 = vector.broadcast %cst_12 : f32 to vector<2x128xf32>
      %c0_13 = arith.constant 0 : index
      %c0_14 = arith.constant 0 : index
      %17 = vector.load %arg4[%c0_13, %c0_14] : memref<2x128xf32, #tpu.memory_space<vmem>>, vector<2x128xf32>
      tpu.vector_store %arg4[%c0_13, %c0_14], %16 {strides = array<i32>} : memref<2x128xf32, #tpu.memory_space<vmem>>, vector<2x128xf32>,
    } else {
    }
    %c0_6 = arith.constant 0 : index
    %c0_7 = arith.constant 0 : index
    %7 = vector.load %arg4[%c0_6, %c0_7] : memref<2x128xf32, #tpu.memory_space<vmem>>, vector<2x128xf32>
    %cst_8 = arith.constant dense<0.000000e+00> : vector<128xf32>
    %8 = vector.multi_reduction <add>, %2, %cst_8 [0] : vector<256x128xf32> to vector<128xf32>
    %9 = vector.shape_cast %8 : vector<128xf32> to vector<1x128xf32>
    %10 = arith.mulf %2, %2 : vector<256x128xf32>
    %cst_9 = arith.constant dense<0.000000e+00> : vector<128xf32>
    %11 = vector.multi_reduction <add>, %10, %cst_9 [0] : vector<256x128xf32> to vector<128xf32>
    %12 = vector.shape_cast %11 : vector<128xf32> to vector<1x128xf32>
    %13 = tpu.concatenate %9, %12 in 0 : vector<1x128xf32>, vector<1x128xf32> -> vector<2x128xf32>
    %14 = arith.addf %7, %13 : vector<2x128xf32>
    %c0_10 = arith.constant 0 : index
    %c0_11 = arith.constant 0 : index
    %15 = vector.load %arg4[%c0_10, %c0_11] : memref<2x128xf32, #tpu.memory_space<vmem>>, vector<2x128xf32>
    tpu.vector_store %arg4[%c0_10, %c0_11], %14 {strides = array<i32>} : memref<2x128xf32, #tpu.memory_space<vmem>>, vector<2x128xf32>,
    return
  }
  func.func @transform_0(%arg0: i32) -> (i32, i32) {
    %c0_i32 = arith.constant 0 : i32
    %c0_i32_0 = arith.constant 0 : i32
    return %arg0, %c0_i32 : i32, i32
  }
  func.func @transform_1(%arg0: i32) -> (i32, i32) {
    %c0_i32 = arith.constant 0 : i32
    %c0_i32_0 = arith.constant 0 : i32
    %c0_i32_1 = arith.constant 0 : i32
    return %c0_i32, %c0_i32_0 : i32, i32
  }
  func.func @transform_2(%arg0: i32) -> (i32, i32) {
    %c0_i32 = arith.constant 0 : i32
    %c0_i32_0 = arith.constant 0 : i32
    return %arg0, %c0_i32 : i32, i32
  }
  func.func @transform_3(%arg0: i32) -> (i32, i32) {
    %c0_i32 = arith.constant 0 : i32
    %c0_i32_0 = arith.constant 0 : i32
    %c0_i32_1 = arith.constant 0 : i32
    return %c0_i32, %c0_i32_0 : i32, i32
  }
}

module attributes {stable_mosaic.version = 11 : i64} {
  func.func @_bn_relu_kernel(%arg0: i32, %arg1: memref<256x128xf32, #tpu.memory_space<vmem>>, %arg2: memref<1x128xf32, #tpu.memory_space<vmem>>, %arg3: memref<1x128xf32, #tpu.memory_space<vmem>>, %arg4: memref<256x128xbf16, #tpu.memory_space<vmem>>) attributes {dimension_semantics = [#tpu.dimension_semantics<parallel>], iteration_bounds = array<i64: 2>, scalar_prefetch = 0 : i64, scratch_operands = 0 : i64, tpu.core_type = #tpu.core_type<tc>, window_params = [{transform_indices = @transform_0, window_bounds = array<i64: 256, 128>}, {pipeline_mode = #tpu.pipeline_mode<synchronous>, transform_indices = @transform_1, window_bounds = array<i64: 1, 128>}, {pipeline_mode = #tpu.pipeline_mode<synchronous>, transform_indices = @transform_2, window_bounds = array<i64: 1, 128>}, {transform_indices = @transform_3, window_bounds = array<i64: 256, 128>}]} {
    %c0 = arith.constant 0 : index
    %c0_0 = arith.constant 0 : index
    %0 = vector.load %arg1[%c0, %c0_0] : memref<256x128xf32, #tpu.memory_space<vmem>>, vector<256x128xf32>
    %c0_1 = arith.constant 0 : index
    %c0_2 = arith.constant 0 : index
    %1 = vector.load %arg2[%c0_1, %c0_2] : memref<1x128xf32, #tpu.memory_space<vmem>>, vector<1x128xf32>
    %2 = vector.broadcast %1 : vector<1x128xf32> to vector<256x128xf32>
    %3 = arith.mulf %0, %2 : vector<256x128xf32>
    %c0_3 = arith.constant 0 : index
    %c0_4 = arith.constant 0 : index
    %4 = vector.load %arg3[%c0_3, %c0_4] : memref<1x128xf32, #tpu.memory_space<vmem>>, vector<1x128xf32>
    %5 = vector.broadcast %4 : vector<1x128xf32> to vector<256x128xf32>
    %6 = arith.addf %3, %5 : vector<256x128xf32>
    %cst = arith.constant 0.000000e+00 : f32
    %7 = vector.broadcast %cst : f32 to vector<256x128xf32>
    %8 = arith.maximumf %6, %7 : vector<256x128xf32>
    %9 = arith.truncf %8 : vector<256x128xf32> to vector<256x128xbf16>
    %c0_5 = arith.constant 0 : index
    %c0_6 = arith.constant 0 : index
    %10 = vector.load %arg4[%c0_5, %c0_6] : memref<256x128xbf16, #tpu.memory_space<vmem>>, vector<256x128xbf16>
    tpu.vector_store %arg4[%c0_5, %c0_6], %9 {strides = array<i32>} : memref<256x128xbf16, #tpu.memory_space<vmem>>, vector<256x128xbf16>,
    return
  }
  func.func @transform_0(%arg0: i32) -> (i32, i32) {
    %c0_i32 = arith.constant 0 : i32
    %c0_i32_0 = arith.constant 0 : i32
    return %arg0, %c0_i32 : i32, i32
  }
  func.func @transform_1(%arg0: i32) -> (i32, i32) {
    %c0_i32 = arith.constant 0 : i32
    %c0_i32_0 = arith.constant 0 : i32
    %c0_i32_1 = arith.constant 0 : i32
    return %c0_i32, %c0_i32_0 : i32, i32
  }
  func.func @transform_2(%arg0: i32) -> (i32, i32) {
    %c0_i32 = arith.constant 0 : i32
    %c0_i32_0 = arith.constant 0 : i32
    %c0_i32_1 = arith.constant 0 : i32
    return %c0_i32, %c0_i32_0 : i32, i32
  }
  func.func @transform_3(%arg0: i32) -> (i32, i32) {
    %c0_i32 = arith.constant 0 : i32
    %c0_i32_0 = arith.constant 0 : i32
    return %arg0, %c0_i32 : i32, i32
  }
}

module attributes {stable_mosaic.version = 11 : i64} {
  func.func @_conv_stats_kernel(%arg0: i32, %arg1: memref<256x1152xbf16, #tpu.memory_space<vmem>>, %arg2: memref<1152x128xbf16, #tpu.memory_space<vmem>>, %arg3: memref<256x128xf32, #tpu.memory_space<vmem>>, %arg4: memref<2x128xf32, #tpu.memory_space<vmem>>) attributes {dimension_semantics = [#tpu.dimension_semantics<arbitrary>], iteration_bounds = array<i64: 2>, scalar_prefetch = 0 : i64, scratch_operands = 0 : i64, tpu.core_type = #tpu.core_type<tc>, window_params = [{transform_indices = @transform_0, window_bounds = array<i64: 256, 1152>}, {pipeline_mode = #tpu.pipeline_mode<synchronous>, transform_indices = @transform_1, window_bounds = array<i64: 1152, 128>}, {transform_indices = @transform_2, window_bounds = array<i64: 256, 128>}, {pipeline_mode = #tpu.pipeline_mode<synchronous>, transform_indices = @transform_3, window_bounds = array<i64: 2, 128>}]} {
    %c0 = arith.constant 0 : index
    %c0_0 = arith.constant 0 : index
    %0 = vector.load %arg1[%c0, %c0_0] : memref<256x1152xbf16, #tpu.memory_space<vmem>>, vector<256x1152xbf16>
    %c0_1 = arith.constant 0 : index
    %c0_2 = arith.constant 0 : index
    %1 = vector.load %arg2[%c0_1, %c0_2] : memref<1152x128xbf16, #tpu.memory_space<vmem>>, vector<1152x128xbf16>
    %cst = arith.constant dense<0.000000e+00> : vector<256x128xf32>
    %2 = tpu.matmul %0, %1, %cst {dimension_numbers = #tpu.dot_dimension_numbers<[1], [0], [0], [1], [0, 0, 1, 1], [], []>} : vector<256x1152xbf16>, vector<1152x128xbf16>, vector<256x128xf32> -> vector<256x128xf32>
    %c0_3 = arith.constant 0 : index
    %c0_4 = arith.constant 0 : index
    %3 = vector.load %arg3[%c0_3, %c0_4] : memref<256x128xf32, #tpu.memory_space<vmem>>, vector<256x128xf32>
    tpu.vector_store %arg3[%c0_3, %c0_4], %2 {strides = array<i32>} : memref<256x128xf32, #tpu.memory_space<vmem>>, vector<256x128xf32>,
    %c0_i32 = arith.constant 0 : i32
    %4 = arith.cmpi eq, %arg0, %c0_i32 : i32
    %5 = arith.extui %4 : i1 to i32
    %c0_i32_5 = arith.constant 0 : i32
    %6 = arith.cmpi ne, %5, %c0_i32_5 : i32
    scf.if %6 {
      %cst_12 = arith.constant 0.000000e+00 : f32
      %16 = vector.broadcast %cst_12 : f32 to vector<2x128xf32>
      %c0_13 = arith.constant 0 : index
      %c0_14 = arith.constant 0 : index
      %17 = vector.load %arg4[%c0_13, %c0_14] : memref<2x128xf32, #tpu.memory_space<vmem>>, vector<2x128xf32>
      tpu.vector_store %arg4[%c0_13, %c0_14], %16 {strides = array<i32>} : memref<2x128xf32, #tpu.memory_space<vmem>>, vector<2x128xf32>,
    } else {
    }
    %c0_6 = arith.constant 0 : index
    %c0_7 = arith.constant 0 : index
    %7 = vector.load %arg4[%c0_6, %c0_7] : memref<2x128xf32, #tpu.memory_space<vmem>>, vector<2x128xf32>
    %cst_8 = arith.constant dense<0.000000e+00> : vector<128xf32>
    %8 = vector.multi_reduction <add>, %2, %cst_8 [0] : vector<256x128xf32> to vector<128xf32>
    %9 = vector.shape_cast %8 : vector<128xf32> to vector<1x128xf32>
    %10 = arith.mulf %2, %2 : vector<256x128xf32>
    %cst_9 = arith.constant dense<0.000000e+00> : vector<128xf32>
    %11 = vector.multi_reduction <add>, %10, %cst_9 [0] : vector<256x128xf32> to vector<128xf32>
    %12 = vector.shape_cast %11 : vector<128xf32> to vector<1x128xf32>
    %13 = tpu.concatenate %9, %12 in 0 : vector<1x128xf32>, vector<1x128xf32> -> vector<2x128xf32>
    %14 = arith.addf %7, %13 : vector<2x128xf32>
    %c0_10 = arith.constant 0 : index
    %c0_11 = arith.constant 0 : index
    %15 = vector.load %arg4[%c0_10, %c0_11] : memref<2x128xf32, #tpu.memory_space<vmem>>, vector<2x128xf32>
    tpu.vector_store %arg4[%c0_10, %c0_11], %14 {strides = array<i32>} : memref<2x128xf32, #tpu.memory_space<vmem>>, vector<2x128xf32>,
    return
  }
  func.func @transform_0(%arg0: i32) -> (i32, i32) {
    %c0_i32 = arith.constant 0 : i32
    %c0_i32_0 = arith.constant 0 : i32
    return %arg0, %c0_i32 : i32, i32
  }
  func.func @transform_1(%arg0: i32) -> (i32, i32) {
    %c0_i32 = arith.constant 0 : i32
    %c0_i32_0 = arith.constant 0 : i32
    %c0_i32_1 = arith.constant 0 : i32
    return %c0_i32, %c0_i32_0 : i32, i32
  }
  func.func @transform_2(%arg0: i32) -> (i32, i32) {
    %c0_i32 = arith.constant 0 : i32
    %c0_i32_0 = arith.constant 0 : i32
    return %arg0, %c0_i32 : i32, i32
  }
  func.func @transform_3(%arg0: i32) -> (i32, i32) {
    %c0_i32 = arith.constant 0 : i32
    %c0_i32_0 = arith.constant 0 : i32
    %c0_i32_1 = arith.constant 0 : i32
    return %c0_i32, %c0_i32_0 : i32, i32
  }
}

module attributes {stable_mosaic.version = 11 : i64} {
  func.func @kernel(%arg0: i32, %arg1: memref<256x128xf32, #tpu.memory_space<vmem>>, %arg2: memref<1x128xf32, #tpu.memory_space<vmem>>, %arg3: memref<1x128xf32, #tpu.memory_space<vmem>>, %arg4: memref<256x4xbf16, #tpu.memory_space<vmem>>, %arg5: memref<4x128xbf16, #tpu.memory_space<vmem>>, %arg6: memref<1x128xf32, #tpu.memory_space<vmem>>, %arg7: memref<256x128xf32, #tpu.memory_space<vmem>>) attributes {dimension_semantics = [#tpu.dimension_semantics<parallel>], iteration_bounds = array<i64: 2>, scalar_prefetch = 0 : i64, scratch_operands = 0 : i64, tpu.core_type = #tpu.core_type<tc>, window_params = [{transform_indices = @transform_0, window_bounds = array<i64: 256, 128>}, {pipeline_mode = #tpu.pipeline_mode<synchronous>, transform_indices = @transform_1, window_bounds = array<i64: 1, 128>}, {pipeline_mode = #tpu.pipeline_mode<synchronous>, transform_indices = @transform_2, window_bounds = array<i64: 1, 128>}, {transform_indices = @transform_3, window_bounds = array<i64: 256, 4>}, {pipeline_mode = #tpu.pipeline_mode<synchronous>, transform_indices = @transform_4, window_bounds = array<i64: 4, 128>}, {pipeline_mode = #tpu.pipeline_mode<synchronous>, transform_indices = @transform_5, window_bounds = array<i64: 1, 128>}, {transform_indices = @transform_6, window_bounds = array<i64: 256, 128>}]} {
    %c0 = arith.constant 0 : index
    %c0_0 = arith.constant 0 : index
    %0 = vector.load %arg1[%c0, %c0_0] : memref<256x128xf32, #tpu.memory_space<vmem>>, vector<256x128xf32>
    %c0_1 = arith.constant 0 : index
    %c0_2 = arith.constant 0 : index
    %1 = vector.load %arg2[%c0_1, %c0_2] : memref<1x128xf32, #tpu.memory_space<vmem>>, vector<1x128xf32>
    %2 = vector.broadcast %1 : vector<1x128xf32> to vector<256x128xf32>
    %3 = arith.mulf %0, %2 : vector<256x128xf32>
    %c0_3 = arith.constant 0 : index
    %c0_4 = arith.constant 0 : index
    %4 = vector.load %arg3[%c0_3, %c0_4] : memref<1x128xf32, #tpu.memory_space<vmem>>, vector<1x128xf32>
    %5 = vector.broadcast %4 : vector<1x128xf32> to vector<256x128xf32>
    %6 = arith.addf %3, %5 : vector<256x128xf32>
    %c0_5 = arith.constant 0 : index
    %c0_6 = arith.constant 0 : index
    %7 = vector.load %arg4[%c0_5, %c0_6] : memref<256x4xbf16, #tpu.memory_space<vmem>>, vector<256x4xbf16>
    %c0_7 = arith.constant 0 : index
    %c0_8 = arith.constant 0 : index
    %8 = vector.load %arg5[%c0_7, %c0_8] : memref<4x128xbf16, #tpu.memory_space<vmem>>, vector<4x128xbf16>
    %cst = arith.constant dense<0.000000e+00> : vector<256x128xf32>
    %9 = tpu.matmul %7, %8, %cst {dimension_numbers = #tpu.dot_dimension_numbers<[1], [0], [0], [1], [0, 0, 1, 1], [], []>} : vector<256x4xbf16>, vector<4x128xbf16>, vector<256x128xf32> -> vector<256x128xf32>
    %c0_9 = arith.constant 0 : index
    %c0_10 = arith.constant 0 : index
    %10 = vector.load %arg6[%c0_9, %c0_10] : memref<1x128xf32, #tpu.memory_space<vmem>>, vector<1x128xf32>
    %11 = vector.broadcast %10 : vector<1x128xf32> to vector<256x128xf32>
    %12 = arith.addf %9, %11 : vector<256x128xf32>
    %13 = arith.addf %6, %12 : vector<256x128xf32>
    %cst_11 = arith.constant 0.000000e+00 : f32
    %14 = vector.broadcast %cst_11 : f32 to vector<256x128xf32>
    %15 = arith.maximumf %13, %14 : vector<256x128xf32>
    %c0_12 = arith.constant 0 : index
    %c0_13 = arith.constant 0 : index
    %16 = vector.load %arg7[%c0_12, %c0_13] : memref<256x128xf32, #tpu.memory_space<vmem>>, vector<256x128xf32>
    tpu.vector_store %arg7[%c0_12, %c0_13], %15 {strides = array<i32>} : memref<256x128xf32, #tpu.memory_space<vmem>>, vector<256x128xf32>,
    return
  }
  func.func @transform_0(%arg0: i32) -> (i32, i32) {
    %c0_i32 = arith.constant 0 : i32
    %c0_i32_0 = arith.constant 0 : i32
    return %arg0, %c0_i32 : i32, i32
  }
  func.func @transform_1(%arg0: i32) -> (i32, i32) {
    %c0_i32 = arith.constant 0 : i32
    %c0_i32_0 = arith.constant 0 : i32
    %c0_i32_1 = arith.constant 0 : i32
    return %c0_i32, %c0_i32_0 : i32, i32
  }
  func.func @transform_2(%arg0: i32) -> (i32, i32) {
    %c0_i32 = arith.constant 0 : i32
    %c0_i32_0 = arith.constant 0 : i32
    %c0_i32_1 = arith.constant 0 : i32
    return %c0_i32, %c0_i32_0 : i32, i32
  }
  func.func @transform_3(%arg0: i32) -> (i32, i32) {
    %c0_i32 = arith.constant 0 : i32
    %c0_i32_0 = arith.constant 0 : i32
    return %arg0, %c0_i32 : i32, i32
  }
  func.func @transform_4(%arg0: i32) -> (i32, i32) {
    %c0_i32 = arith.constant 0 : i32
    %c0_i32_0 = arith.constant 0 : i32
    %c0_i32_1 = arith.constant 0 : i32
    return %c0_i32, %c0_i32_0 : i32, i32
  }
  func.func @transform_5(%arg0: i32) -> (i32, i32) {
    %c0_i32 = arith.constant 0 : i32
    %c0_i32_0 = arith.constant 0 : i32
    %c0_i32_1 = arith.constant 0 : i32
    return %c0_i32, %c0_i32_0 : i32, i32
  }
  func.func @transform_6(%arg0: i32) -> (i32, i32) {
    %c0_i32 = arith.constant 0 : i32
    %c0_i32_0 = arith.constant 0 : i32
    return %arg0, %c0_i32 : i32, i32
  }
}

</mosaic_0001>

<bundles_post_ra>
// kernel: resblock_forward.5
= control target key start
LH: loop header
LB: loop body
LE: loop exit
PB: predicated region body
PF: predicated region fallthrough
CT: control target
= control target key end

     0   :  { %s574_s12 = smov 0   ;;  %s721_s0 = inlined_call_operand.vmem [shape: f32[512,128], index: 0, kind: input, shape index: {}]   ;;  %s722_s1 = inlined_call_operand.vmem [shape: f32[1,128], index: 1, kind: input, shape index: {}]   ;;  %s723_s2 = inlined_call_operand.vmem [shape: f32[1,128], index: 2, kind: input, shape index: {}]   ;;  %s724_s3 = inlined_call_operand.vmem [shape: bf16[512,128], index: 3, kind: output, shape index: {}]  }
   0x1 LB: > { %s430_s13 = sadd.s32 4294967295, %s552_s12   ;;  %p434_p0 = scmp.ge.s32.totalorder %s552_s12, 1  ;;  %s552_s12 = sphi %s574_s12, %s13_s12  }
   0x2   : > { %p138_p1 = scmp.lt.s32.totalorder %s552_s12, 3 }
   0x4   : > { %p139_p2 = pnand %p434_p0, %p138_p1 }
   0x5   : > { %s435_s14 = sshll.u32 (!%p139_p2), %s430_s13, 5 }
   0x6   : > { %142 = sbr.rel (%p139_p2) target bundleno = 49 (0x31), region = 32  ;;  %p163_p3 = scmp.lt.s32.totalorder (!%p139_p2), %s435_s14, 63 }
   0xb   : > { %s726_s14 = smov (!%p163_p3, %s435_s14), 63  ;;  %v587_v0 = vld [vmem:[%s722_s1] ss:$0 sm:$0xff] }
   0xc   : > { %s436_s17 = sshll.u32 %s726_s14, 3  ;;  %v598_v1 = vld [vmem:[%s723_s2] ss:$0 sm:$0xff]  ;;  %s438_s23 = sshll.u32 %s726_s14, 2 }
   0xd   : > { %s593_s20 = scalar_lea.vmem %s721_s0, %s436_s17  ;;  %s630_s26 = scalar_lea.vmem %s724_s3, %s438_s23 }
   0xe   : > { %v174_v2 = vld [vmem:[%s593_s20] sm:$0xff]  ;;  %v175_v3 = vld [vmem:[%s593_s20 + $0x8] sm:$0xff]  ;;  %v176_v4 = vld [vmem:[%s593_s20 + $0x10] sm:$0xff] }
   0xf   : > { %v210_v5 = vmul.f32 %v587_v0, %v174_v2  ;;  %v211_v6 = vmul.f32 %v587_v0, %v175_v3  ;;  %v177_v7 = vld [vmem:[%s593_s20 + $0x18] sm:$0xff]  ;;  %v212_v8 = vmul.f32 %v587_v0, %v176_v4  ;;  %v178_v9 = vld [vmem:[%s593_s20 + $0x20] sm:$0xff]  ;;  %v179_v10 = vld [vmem:[%s593_s20 + $0x28] sm:$0xff] }
  0x10   : > { %v213_v11 = vmul.f32 %v587_v0, %v177_v7  ;;  %v214_v12 = vmul.f32 %v587_v0, %v178_v9  ;;  %v215_v13 = vmul.f32 %v587_v0, %v179_v10  ;;  %v180_v14 = vld [vmem:[%s593_s20 + $0x30] sm:$0xff]  ;;  %v181_v15 = vld [vmem:[%s593_s20 + $0x38] sm:$0xff]  ;;  %v182_v24 = vld [vmem:[%s593_s20 + $0x40] sm:$0xff] }
  0x11   : > { %v246_v16 = vadd.f32 %v598_v1, %v210_v5  ;;  %v247_v17 = vadd.f32 %v598_v1, %v211_v6  ;;  %v248_v18 = vadd.f32 %v598_v1, %v212_v8  ;;  %v216_v19 = vmul.f32 %v587_v0, %v180_v14  ;;  %v183_v25 = vld [vmem:[%s593_s20 + $0x48] sm:$0xff]  ;;  %v184_v30 = vld [vmem:[%s593_s20 + $0x50] sm:$0xff]  ;;  %v185_v35 = vld [vmem:[%s593_s20 + $0x58] sm:$0xff] }
  0x12   : > { %v249_v20 = vadd.f32 %v598_v1, %v213_v11  ;;  %v250_v21 = vadd.f32 %v598_v1, %v214_v12  ;;  %v251_v22 = vadd.f32 %v598_v1, %v215_v13  ;;  %v217_v23 = vmul.f32 %v587_v0, %v181_v15  ;;  %v186_v36 = vld [vmem:[%s593_s20 + $0x60] sm:$0xff]  ;;  %v187_v41 = vld [vmem:[%s593_s20 + $0x68] sm:$0xff]  ;;  %v188_v42 = vld [vmem:[%s593_s20 + $0x70] sm:$0xff] }
  0x13   : > { %v278_v26 = vmax.f32 %v246_v16, 0.0  ;;  %v279_v27 = vmax.f32 %v247_v17, 0.0  ;;  %v280_v28 = vmax.f32 %v248_v18, 0.0  ;;  %v252_v29 = vadd.f32 %v598_v1, %v216_v19  ;;  %v189_v51 = vld [vmem:[%s593_s20 + $0x78] sm:$0xff]  ;;  %v190_v56 = vld [vmem:[%s593_s20 + $0x80] sm:$0xff]  ;;  %v191_v61 = vld [vmem:[%s593_s20 + $0x88] sm:$0xff] }
  0x14   : > { %v281_v31 = vmax.f32 %v249_v20, 0.0  ;;  %v282_v32 = vmax.f32 %v250_v21, 0.0  ;;  %v283_v33 = vmax.f32 %v251_v22, 0.0  ;;  %v253_v34 = vadd.f32 %v598_v1, %v217_v23  ;;  %v192_v4 = vld [vmem:[%s593_s20 + $0x90] sm:$0xff]  ;;  %v193_v5 = vld [vmem:[%s593_s20 + $0x98] sm:$0xff]  ;;  %v194_v10 = vld [vmem:[%s593_s20 + $0xa0] sm:$0xff] }
  0x15   : > { %v444_v37 = vpack.c.bf16 %v279_v27, %v278_v26  ;;  %v284_v38 = vmax.f32 %v252_v29, 0.0  ;;  %v218_v39 = vmul.f32 %v587_v0, %v182_v24  ;;  %v219_v40 = vmul.f32 %v587_v0, %v183_v25  ;;  %v195_v15 = vld [vmem:[%s593_s20 + $0xa8] sm:$0xff]  ;;  %v196_v20 = vld [vmem:[%s593_s20 + $0xb0] sm:$0xff]  ;;  %v197_v25 = vld [vmem:[%s593_s20 + $0xb8] sm:$0xff] }
  0x16   : > { %v449_v43 = vpack.c.bf16 %v281_v31, %v280_v28  ;;  %v454_v44 = vpack.c.bf16 %v283_v33, %v282_v32  ;;  %v285_v45 = vmax.f32 %v253_v34, 0.0  ;;  %v220_v46 = vmul.f32 %v587_v0, %v184_v30  ;;  %v198_v30 = vld [vmem:[%s593_s20 + $0xc0] sm:$0xff] }
  0x17   : > { %445 = vst [vmem:[%s630_s26] sm:$0xff] %v444_v37   ;;  %v254_v47 = vadd.f32 %v598_v1, %v218_v39  ;;  %v255_v48 = vadd.f32 %v598_v1, %v219_v40  ;;  %v221_v49 = vmul.f32 %v587_v0, %v185_v35  ;;  %v222_v50 = vmul.f32 %v587_v0, %v186_v36  ;;  %v199_v35 = vld [vmem:[%s593_s20 + $0xc8] sm:$0xff]  ;;  %v200_v40 = vld [vmem:[%s593_s20 + $0xd0] sm:$0xff] }
  0x18   : > { %521 = vst [vmem:[%s630_s26 + $0x8] sm:$0xff] %v449_v43   ;;  %v459_v52 = vpack.c.bf16 %v285_v45, %v284_v38  ;;  %v256_v53 = vadd.f32 %v598_v1, %v220_v46  ;;  %v223_v54 = vmul.f32 %v587_v0, %v187_v41  ;;  %v224_v55 = vmul.f32 %v587_v0, %v188_v42  ;;  %v201_v41 = vld [vmem:[%s593_s20 + $0xd8] sm:$0xff]  ;;  %v202_v46 = vld [vmem:[%s593_s20 + $0xe0] sm:$0xff] }
  0x19   : > { %522 = vst [vmem:[%s630_s26 + $0x10] sm:$0xff] %v454_v44   ;;  %v286_v57 = vmax.f32 %v254_v47, 0.0  ;;  %v287_v58 = vmax.f32 %v255_v48, 0.0  ;;  %v257_v59 = vadd.f32 %v598_v1, %v221_v49  ;;  %v258_v60 = vadd.f32 %v598_v1, %v222_v50 }
  0x1a   : > { %523 = vst [vmem:[%s630_s26 + $0x18] sm:$0xff] %v459_v52   ;;  %v288_v62 = vmax.f32 %v256_v53, 0.0  ;;  %v259_v63 = vadd.f32 %v598_v1, %v223_v54  ;;  %v225_v2 = vmul.f32 %v587_v0, %v189_v51  ;;  %v260_v3 = vadd.f32 %v598_v1, %v224_v55  ;;  %v203_v51 = vld [vmem:[%s593_s20 + $0xe8] sm:$0xff] }
  0x1b   : > { %v464_v6 = vpack.c.bf16 %v287_v58, %v286_v57  ;;  %v289_v7 = vmax.f32 %v257_v59, 0.0  ;;  %v290_v8 = vmax.f32 %v258_v60, 0.0  ;;  %v226_v9 = vmul.f32 %v587_v0, %v190_v56  ;;  %v204_v56 = vld [vmem:[%s593_s20 + $0xf0] sm:$0xff] }
  0x1c   : > { %v291_v11 = vmax.f32 %v259_v63, 0.0  ;;  %v261_v12 = vadd.f32 %v598_v1, %v225_v2  ;;  %v292_v13 = vmax.f32 %v260_v3, 0.0  ;;  %v227_v14 = vmul.f32 %v587_v0, %v191_v61  ;;  %v205_v61 = vld [vmem:[%s593_s20 + $0xf8] sm:$0xff] }
  0x1d   : > { %524 = vst [vmem:[%s630_s26 + $0x20] sm:$0xff] %v464_v6   ;;  %v469_v16 = vpack.c.bf16 %v289_v7, %v288_v62  ;;  %v262_v17 = vadd.f32 %v598_v1, %v226_v9  ;;  %v228_v18 = vmul.f32 %v587_v0, %v192_v4  ;;  %v229_v19 = vmul.f32 %v587_v0, %v193_v5 }
  0x1e   : > { %v474_v21 = vpack.c.bf16 %v291_v11, %v290_v8  ;;  %v293_v22 = vmax.f32 %v261_v12, 0.0  ;;  %v263_v23 = vadd.f32 %v598_v1, %v227_v14  ;;  %v230_v24 = vmul.f32 %v587_v0, %v194_v10 }
  0x1f   : > { %525 = vst [vmem:[%s630_s26 + $0x28] sm:$0xff] %v469_v16   ;;  %v294_v26 = vmax.f32 %v262_v17, 0.0  ;;  %v264_v27 = vadd.f32 %v598_v1, %v228_v18  ;;  %v265_v28 = vadd.f32 %v598_v1, %v229_v19  ;;  %v231_v29 = vmul.f32 %v587_v0, %v195_v15 }
  0x20   : > { %526 = vst [vmem:[%s630_s26 + $0x30] sm:$0xff] %v474_v21   ;;  %v479_v31 = vpack.c.bf16 %v293_v22, %v292_v13  ;;  %v295_v32 = vmax.f32 %v263_v23, 0.0  ;;  %v266_v33 = vadd.f32 %v598_v1, %v230_v24  ;;  %v232_v34 = vmul.f32 %v587_v0, %v196_v20 }
  0x21   : > { %v296_v36 = vmax.f32 %v264_v27, 0.0  ;;  %v297_v37 = vmax.f32 %v265_v28, 0.0  ;;  %v267_v38 = vadd.f32 %v598_v1, %v231_v29  ;;  %v233_v39 = vmul.f32 %v587_v0, %v197_v25 }
  0x22   : > { %527 = vst [vmem:[%s630_s26 + $0x38] sm:$0xff] %v479_v31   ;;  %v484_v42 = vpack.c.bf16 %v295_v32, %v294_v26  ;;  %v298_v43 = vmax.f32 %v266_v33, 0.0  ;;  %v268_v44 = vadd.f32 %v598_v1, %v232_v34  ;;  %v234_v45 = vmul.f32 %v587_v0, %v198_v30 }
  0x23   : > { %v489_v47 = vpack.c.bf16 %v297_v37, %v296_v36  ;;  %v299_v48 = vmax.f32 %v267_v38, 0.0  ;;  %v269_v49 = vadd.f32 %v598_v1, %v233_v39  ;;  %v235_v50 = vmul.f32 %v587_v0, %v199_v35 }
  0x24   : > { %528 = vst [vmem:[%s630_s26 + $0x40] sm:$0xff] %v484_v42   ;;  %v300_v52 = vmax.f32 %v268_v44, 0.0  ;;  %v270_v53 = vadd.f32 %v598_v1, %v234_v45  ;;  %v236_v54 = vmul.f32 %v587_v0, %v200_v40  ;;  %v237_v55 = vmul.f32 %v587_v0, %v201_v41 }
  0x25   : > { %529 = vst [vmem:[%s630_s26 + $0x48] sm:$0xff] %v489_v47   ;;  %v494_v57 = vpack.c.bf16 %v299_v48, %v298_v43  ;;  %v301_v58 = vmax.f32 %v269_v49, 0.0  ;;  %v271_v59 = vadd.f32 %v598_v1, %v235_v50  ;;  %v238_v60 = vmul.f32 %v587_v0, %v202_v46 }
  0x26   : > { %v302_v62 = vmax.f32 %v270_v53, 0.0  ;;  %v272_v63 = vadd.f32 %v598_v1, %v236_v54  ;;  %v273_v2 = vadd.f32 %v598_v1, %v237_v55  ;;  %v239_v3 = vmul.f32 %v587_v0, %v203_v51 }
  0x27   : > { %530 = vst [vmem:[%s630_s26 + $0x50] sm:$0xff] %v494_v57   ;;  %v499_v4 = vpack.c.bf16 %v301_v58, %v300_v52  ;;  %v303_v5 = vmax.f32 %v271_v59, 0.0  ;;  %v274_v6 = vadd.f32 %v598_v1, %v238_v60  ;;  %v240_v7 = vmul.f32 %v587_v0, %v204_v56 }
  0x28   : > { %v304_v8 = vmax.f32 %v272_v63, 0.0  ;;  %v305_v9 = vmax.f32 %v273_v2, 0.0  ;;  %v275_v10 = vadd.f32 %v598_v1, %v239_v3  ;;  %v241_v11 = vmul.f32 %v587_v0, %v205_v61 }
  0x29   : > { %531 = vst [vmem:[%s630_s26 + $0x58] sm:$0xff] %v499_v4   ;;  %v504_v12 = vpack.c.bf16 %v303_v5, %v302_v62  ;;  %v306_v13 = vmax.f32 %v274_v6, 0.0  ;;  %v276_v14 = vadd.f32 %v598_v1, %v240_v7 }
  0x2a   : > { %v509_v15 = vpack.c.bf16 %v305_v9, %v304_v8  ;;  %v307_v16 = vmax.f32 %v275_v10, 0.0  ;;  %v277_v17 = vadd.f32 %v598_v1, %v241_v11 }
  0x2b   : > { %532 = vst [vmem:[%s630_s26 + $0x60] sm:$0xff] %v504_v12   ;;  %v308_v18 = vmax.f32 %v276_v14, 0.0 }
  0x2c   : > { %533 = vst [vmem:[%s630_s26 + $0x68] sm:$0xff] %v509_v15   ;;  %v514_v19 = vpack.c.bf16 %v307_v16, %v306_v13  ;;  %v309_v20 = vmax.f32 %v277_v17, 0.0 }
  0x2e   : > { %534 = vst [vmem:[%s630_s26 + $0x70] sm:$0xff] %v514_v19   ;;  %v519_v21 = vpack.c.bf16 %v309_v20, %v308_v18 }
  0x30   : > { %535 = vst [vmem:[%s630_s26 + $0x78] sm:$0xff] %v519_v21  }
  0x31 PF: > { %s13_s12 = sadd.s32 1, %s552_s12  }
  0x32   : > { %p10_p4 = scmp.ge.s32.totalorder %s13_s12, 4  }
  0x34   :  { %12 = sbr.rel (!%p10_p4) target bundleno = 1 (0x1), region = 62 }

// kernel: resblock_forward.4
= control target key start
LH: loop header
LB: loop body
LE: loop exit
PB: predicated region body
PF: predicated region fallthrough
CT: control target
= control target key end

     0   :  { %s822_s12 = smov 0   ;;  %s1077_s0 = inlined_call_operand.vmem [shape: bf16[512,36], index: 0, kind: input, shape index: {}]   ;;  %s1078_s1 = inlined_call_operand.vmem [shape: bf16[36,128], index: 1, kind: input, shape index: {}]   ;;  %s1079_s2 = inlined_call_operand.vmem [shape: f32[512,128], index: 2, kind: output, shape index: {0}]   ;;  %s1080_s3 = inlined_call_operand.vmem [shape: f32[2,128], index: 3, kind: output, shape index: {1}]  }
   0x1 LB: > { %s657_s13 = sadd.s32 4294967295, %s799_s12   ;;  %p661_p0 = scmp.ge.s32.totalorder %s799_s12, 1  ;;  %s799_s12 = sphi %s822_s12, %s14_s12  }
   0x2   : > { %p136_p1 = scmp.lt.s32.totalorder %s799_s12, 3 }
   0x4   : > { %p137_p2 = pnand %p661_p0, %p136_p1 }
   0x5   : > { %s662_s16 = sshll.u32 (!%p137_p2), %s657_s13, 5  ;;  %p754_p4 = scmp.ne.s32.totalorder (!%p137_p2), %s657_s13, 0 }
   0x6   : > { %140 = sbr.rel (%p137_p2) target bundleno = 301 (0x12d), region = 28  ;;  %p161_p3 = scmp.lt.s32.totalorder (!%p137_p2), %s662_s16, 63 }
   0xb   : > { %v209_v0 = vld [vmem:[%s1078_s1 + $0x10] sm:$0x3]  ;;  %vm354_vm0 = vcmask 1041408   ;;  %s1082_s16 = smov (!%p161_p3, %s662_s16), 63  ;;  %v774_v4 = vld [vmem:[%s1078_s1 + $0x8] sm:$0xff]  ;;  %v773_v5 = vld [vmem:[%s1078_s1] sm:$0xff] }
   0xc   : > { %v299_v1 = vunpack.c.l.b16 %v209_v0  ;;  %s663_s19 = sshll.u32 %s1082_s16, 2  ;;  %vm305_vm1 = vcmask 293888   ;;  %s665_s25 = sshll.u32 %s1082_s16, 3 }
   0xd   : > { %s847_s24 = scalar_lea.vmem %s1077_s0, %s663_s19  ;;  %s885_s28 = scalar_lea.vmem %s1079_s2, %s665_s25 }
   0xe   : > { %v302_v2 = vpack.c.b16 %v299_v1, %v299_v1  ;;  %v757_v6 = vld [vmem:[%s847_s24] sm:$0xff]  ;;  %v758_v10 = vld [vmem:[%s847_s24 + $0x8] sm:$0xff]  ;;  %v759_v14 = vld [vmem:[%s847_s24 + $0x10] sm:$0xff] }
   0xf   : > { %v761_v7 = vld [vmem:[%s847_s24 + $0x20] sm:$0xff]  ;;  %v762_v11 = vld [vmem:[%s847_s24 + $0x28] sm:$0xff]  ;;  %v763_v15 = vld [vmem:[%s847_s24 + $0x30] sm:$0xff] }
  0x10   : > { %v356_v3 = vsel %vm354_vm0, %v302_v2, 0  ;;  %v765_v8 = vld [vmem:[%s847_s24 + $0x40] sm:$0xff]  ;;  %v766_v12 = vld [vmem:[%s847_s24 + $0x48] sm:$0xff]  ;;  %v767_v16 = vld [vmem:[%s847_s24 + $0x50] sm:$0xff] }
  0x11   : > { %363 = vmatpush.bf16.msra.mxu0 %v356_v3  ;;  %775 = vmatpush.bf16.msra.mxu1 %v356_v3  ;;  %v769_v9 = vld [vmem:[%s847_s24 + $0x60] sm:$0xff]  ;;  %v770_v13 = vld [vmem:[%s847_s24 + $0x68] sm:$0xff]  ;;  %v771_v17 = vld [vmem:[%s847_s24 + $0x70] sm:$0xff] }
  0x12   : > { %776 = vmatpush.bf16.msra.mxu2 %v356_v3  ;;  %777 = vmatpush.bf16.msra.mxu3 %v356_v3  ;;  %v760_v18 = vld [vmem:[%s847_s24 + $0x18] sm:$0xff] }
  0x13   : > { %v764_v19 = vld [vmem:[%s847_s24 + $0x38] sm:$0xff] }
  0x14   : > { %v768_v20 = vld [vmem:[%s847_s24 + $0x58] sm:$0xff] }
  0x15   : > { %364 = vmatpush.bf16.msra.mxu0 %v774_v4  ;;  %778 = vmatpush.bf16.msra.mxu1 %v774_v4  ;;  %v772_v21 = vld [vmem:[%s847_s24 + $0x78] sm:$0xff] }
  0x16   : > { %779 = vmatpush.bf16.msra.mxu2 %v774_v4  ;;  %780 = vmatpush.bf16.msra.mxu3 %v774_v4 }
  0x19   : > { %365 = vmatpush.bf16.msra.mxu0 %v773_v5  ;;  %781 = vmatpush.bf16.msra.mxu1 %v773_v5 }
  0x1a   : > { %782 = vmatpush.bf16.msra.mxu2 %v773_v5  ;;  %783 = vmatpush.bf16.msra.mxu3 %v773_v5 }
  0x1c   : > { %738 = vmatmul.msk.bf16.vlgmr.msra.gmra.mxu0 %vm305_vm1, %v757_v6  ;;  %742 = vmatmul.msk.bf16.vlgmr.msra.gmra.mxu1 %vm305_vm1, %v761_v7 }
  0x1d   : > { %746 = vmatmul.msk.bf16.vlgmr.msra.gmra.mxu2 %vm305_vm1, %v765_v8  ;;  %750 = vmatmul.msk.bf16.vlgmr.msra.gmra.mxu3 %vm305_vm1, %v769_v9 }
  0x2c   : > { %739 = vmatmul.msk.bf16.gmra.mxu0 %vm305_vm1, %v758_v10  ;;  %743 = vmatmul.msk.bf16.gmra.mxu1 %vm305_vm1, %v762_v11 }
  0x2d   : > { %747 = vmatmul.msk.bf16.gmra.mxu2 %vm305_vm1, %v766_v12  ;;  %751 = vmatmul.msk.bf16.gmra.mxu3 %vm305_vm1, %v770_v13 }
  0x3c   : > { %740 = vmatmul.msk.bf16.gmra.mxu0 %vm305_vm1, %v759_v14  ;;  %744 = vmatmul.msk.bf16.gmra.mxu1 %vm305_vm1, %v763_v15 }
  0x3d   : > { %748 = vmatmul.msk.bf16.gmra.mxu2 %vm305_vm1, %v767_v16  ;;  %752 = vmatmul.msk.bf16.gmra.mxu3 %vm305_vm1, %v771_v17 }
  0x4c   : > { %741 = vmatmul.msk.bf16.gmra.mxu0 %vm305_vm1, %v760_v18  ;;  %745 = vmatmul.msk.bf16.gmra.mxu1 %vm305_vm1, %v764_v19 }
  0x4d   : > { %749 = vmatmul.msk.bf16.gmra.mxu2 %vm305_vm1, %v768_v20  ;;  %753 = vmatmul.msk.bf16.gmra.mxu3 %vm305_vm1, %v772_v21 }
  0x99   : > { %v887_v22 = vpop.f32.mrf.mxu0  ;;  %v889_v23 = vpop.f32.mrf.mxu1 }
  0x9a   : > { %447 = vst [vmem:[%s885_s28] sm:$0xff] %v887_v22 }
  0x9b   : > { %455 = vst [vmem:[%s885_s28 + $0x40] sm:$0xff] %v889_v23 }
  0xa0   : > { %v895_v24 = vpop.f32.mrf.mxu2  ;;  %v897_v25 = vpop.f32.mrf.mxu3 }
  0xa1   : > { %463 = vst [vmem:[%s885_s28 + $0x80] sm:$0xff] %v895_v24  ;;  %v901_v26 = vpop.f32.mrf.mxu0  ;;  %v903_v27 = vpop.f32.mrf.mxu1 }
  0xa2   : > { %471 = vst [vmem:[%s885_s28 + $0xc0] sm:$0xff] %v897_v25 }
  0xa3   : > { %448 = vst [vmem:[%s885_s28 + $0x8] sm:$0xff] %v901_v26 }
  0xa4   : > { %456 = vst [vmem:[%s885_s28 + $0x48] sm:$0xff] %v903_v27 }
  0xa8   : > { %v911_v28 = vpop.f32.mrf.mxu2  ;;  %v913_v29 = vpop.f32.mrf.mxu3 }
  0xa9   : > { %464 = vst [vmem:[%s885_s28 + $0x88] sm:$0xff] %v911_v28  ;;  %v372_v30 = vpop.f32.mrf.mxu0  ;;  %v917_v31 = vpop.f32.mrf.mxu1 }
  0xaa   : > { %472 = vst [vmem:[%s885_s28 + $0xc8] sm:$0xff] %v913_v29 }
  0xab   : > { %449 = vst [vmem:[%s885_s28 + $0x10] sm:$0xff] %v372_v30 }
  0xac   : > { %457 = vst [vmem:[%s885_s28 + $0x50] sm:$0xff] %v917_v31 }
  0xb0   : > { %v924_v32 = vpop.f32.mrf.mxu2  ;;  %v926_v33 = vpop.f32.mrf.mxu3 }
  0xb1   : > { %465 = vst [vmem:[%s885_s28 + $0x90] sm:$0xff] %v924_v32  ;;  %v374_v34 = vpop.f32.mrf.mxu0  ;;  %v930_v35 = vpop.f32.mrf.mxu1 }
  0xb2   : > { %473 = vst [vmem:[%s885_s28 + $0xd0] sm:$0xff] %v926_v33 }
  0xb3   : > { %450 = vst [vmem:[%s885_s28 + $0x18] sm:$0xff] %v374_v34 }
  0xb4   : > { %458 = vst [vmem:[%s885_s28 + $0x58] sm:$0xff] %v930_v35 }
  0xb8   : > { %v937_v36 = vpop.f32.mrf.mxu2  ;;  %v939_v37 = vpop.f32.mrf.mxu3 }
  0xb9   : > { %466 = vst [vmem:[%s885_s28 + $0x98] sm:$0xff] %v937_v36  ;;  %v377_v38 = vpop.f32.mrf.mxu0  ;;  %v943_v39 = vpop.f32.mrf.mxu1 }
  0xba   : > { %474 = vst [vmem:[%s885_s28 + $0xd8] sm:$0xff] %v939_v37 }
  0xbb   : > { %451 = vst [vmem:[%s885_s28 + $0x20] sm:$0xff] %v377_v38 }
  0xbc   : > { %459 = vst [vmem:[%s885_s28 + $0x60] sm:$0xff] %v943_v39 }
  0xc0   : > { %v950_v40 = vpop.f32.mrf.mxu2  ;;  %v952_v41 = vpop.f32.mrf.mxu3 }
  0xc1   : > { %467 = vst [vmem:[%s885_s28 + $0xa0] sm:$0xff] %v950_v40  ;;  %v379_v42 = vpop.f32.mrf.mxu0  ;;  %v956_v43 = vpop.f32.mrf.mxu1 }
  0xc2   : > { %475 = vst [vmem:[%s885_s28 + $0xe0] sm:$0xff] %v952_v41 }
  0xc3   : > { %452 = vst [vmem:[%s885_s28 + $0x28] sm:$0xff] %v379_v42 }
  0xc4   : > { %460 = vst [vmem:[%s885_s28 + $0x68] sm:$0xff] %v956_v43 }
  0xc8   : > { %v963_v44 = vpop.f32.mrf.mxu2  ;;  %v965_v45 = vpop.f32.mrf.mxu3 }
  0xc9   : > { %468 = vst [vmem:[%s885_s28 + $0xa8] sm:$0xff] %v963_v44  ;;  %v382_v46 = vpop.f32.mrf.mxu0  ;;  %v402_v47 = vpop.f32.mrf.mxu1 }
  0xca   : > { %476 = vst [vmem:[%s885_s28 + $0xe8] sm:$0xff] %v965_v45 }
  0xcb   : > { %453 = vst [vmem:[%s885_s28 + $0x30] sm:$0xff] %v382_v46 }
  0xcc   : > { %461 = vst [vmem:[%s885_s28 + $0x70] sm:$0xff] %v402_v47 }
  0xd0   : > { %v973_v48 = vpop.f32.mrf.mxu2  ;;  %v975_v49 = vpop.f32.mrf.mxu3 }
  0xd1   : > { %469 = vst [vmem:[%s885_s28 + $0xb0] sm:$0xff] %v973_v48  ;;  %v384_v50 = vpop.f32.mrf.mxu0  ;;  %v404_v51 = vpop.f32.mrf.mxu1 }
  0xd2   : > { %477 = vst [vmem:[%s885_s28 + $0xf0] sm:$0xff] %v975_v49 }
  0xd3   : > { %454 = vst [vmem:[%s885_s28 + $0x38] sm:$0xff] %v384_v50 }
  0xd4   : > { %462 = vst [vmem:[%s885_s28 + $0x78] sm:$0xff] %v404_v51 }
  0xd6   : > { %482 = sbr.rel (%p754_p4) target bundleno = 221 (0xdd), region = 32 }
  0xd8   : > { %v983_v52 = vpop.f32.mrf.mxu2  ;;  %v985_v53 = vpop.f32.mrf.mxu3 }
  0xd9   : > { %470 = vst [vmem:[%s885_s28 + $0xb8] sm:$0xff] %v983_v52 }
  0xda   : > { %478 = vst [vmem:[%s885_s28 + $0xf8] sm:$0xff] %v985_v53 }
  0xdb   : > { %v801_v54 = vmov 0.0  }
  0xdc   : > { %483 = vst [vmem:[%s1080_s3] sm:$0x3] %v801_v54 }
  0xdd PF: > { %v485_v55 = vadd.f32 %v901_v26, %v887_v22  ;;  %v522_v56 = vmul.f32 %v887_v22, %v887_v22  ;;  %v523_v57 = vmul.f32 %v901_v26, %v901_v26  ;;  %v524_v59 = vmul.f32 %v372_v30, %v372_v30 }
  0xde   : > { %v525_v61 = vmul.f32 %v374_v34, %v374_v34  ;;  %v526_v0 = vmul.f32 %v377_v38, %v377_v38  ;;  %v527_v3 = vmul.f32 %v379_v42, %v379_v42  ;;  %v528_v6 = vmul.f32 %v382_v46, %v382_v46 }
  0xdf   : > { %v486_v58 = vadd.f32 %v485_v55, %v372_v30  ;;  %v554_v62 = vadd.f32 %v523_v57, %v522_v56  ;;  %v529_v9 = vmul.f32 %v384_v50, %v384_v50  ;;  %v530_v12 = vmul.f32 %v889_v23, %v889_v23 }
  0xe0   : > { %v531_v15 = vmul.f32 %v903_v27, %v903_v27  ;;  %v532_v18 = vmul.f32 %v917_v31, %v917_v31  ;;  %v533_v21 = vmul.f32 %v930_v35, %v930_v35  ;;  %v534_v26 = vmul.f32 %v943_v39, %v943_v39 }
  0xe1   : > { %v487_v60 = vadd.f32 %v486_v58, %v374_v34  ;;  %v555_v1 = vadd.f32 %v554_v62, %v524_v59  ;;  %v535_v34 = vmul.f32 %v956_v43, %v956_v43  ;;  %v537_v54 = vmul.f32 %v404_v51, %v404_v51 }
  0xe2   : > { %v538_v56 = vmul.f32 %v895_v24, %v895_v24  ;;  %v539_v58 = vmul.f32 %v911_v28, %v911_v28  ;;  %vm591_vm2 = vcmask 1040384  }
  0xe3   : > { %v488_v63 = vadd.f32 %v487_v60, %v377_v38  ;;  %v556_v4 = vadd.f32 %v555_v1, %v525_v61  ;;  %v541_v61 = vmul.f32 %v937_v36, %v937_v36  ;;  %v543_v1 = vmul.f32 %v963_v44, %v963_v44 }
  0xe5   : > { %v489_v2 = vadd.f32 %v488_v63, %v379_v42  ;;  %v557_v7 = vadd.f32 %v556_v4, %v526_v0  ;;  %v536_v42 = vmul.f32 %v402_v47, %v402_v47  ;;  %v542_v63 = vmul.f32 %v950_v40, %v950_v40 }
  0xe7   : > { %v490_v5 = vadd.f32 %v489_v2, %v382_v46  ;;  %v558_v10 = vadd.f32 %v557_v7, %v527_v3  ;;  %v544_v3 = vmul.f32 %v973_v48, %v973_v48  ;;  %v546_v7 = vmul.f32 %v897_v25, %v897_v25 }
  0xe9   : > { %v491_v8 = vadd.f32 %v490_v5, %v384_v50  ;;  %v559_v13 = vadd.f32 %v558_v10, %v528_v6  ;;  %v545_v5 = vmul.f32 %v983_v52, %v983_v52 }
  0xeb   : > { %v492_v11 = vadd.f32 %v491_v8, %v889_v23  ;;  %v560_v16 = vadd.f32 %v559_v13, %v529_v9  ;;  %v547_v9 = vmul.f32 %v913_v29, %v913_v29  ;;  %v549_v13 = vmul.f32 %v939_v37, %v939_v37 }
  0xed   : > { %v493_v14 = vadd.f32 %v492_v11, %v903_v27  ;;  %v561_v19 = vadd.f32 %v560_v16, %v530_v12  ;;  %v548_v11 = vmul.f32 %v926_v33, %v926_v33 }
  0xef   : > { %v494_v17 = vadd.f32 %v493_v14, %v917_v31  ;;  %v562_v22 = vadd.f32 %v561_v19, %v531_v15  ;;  %v550_v15 = vmul.f32 %v952_v41, %v952_v41  ;;  %v552_v19 = vmul.f32 %v975_v49, %v975_v49 }
  0xf1   : > { %v495_v20 = vadd.f32 %v494_v17, %v930_v35  ;;  %v563_v30 = vadd.f32 %v562_v22, %v532_v18  ;;  %v551_v17 = vmul.f32 %v965_v45, %v965_v45 }
  0xf3   : > { %v496_v23 = vadd.f32 %v495_v20, %v943_v39  ;;  %v564_v38 = vadd.f32 %v563_v30, %v533_v21  ;;  %v553_v21 = vmul.f32 %v985_v53, %v985_v53 }
  0xf5   : > { %v497_v27 = vadd.f32 %v496_v23, %v956_v43  ;;  %v565_v46 = vadd.f32 %v564_v38, %v534_v26 }
  0xf7   : > { %v498_v31 = vadd.f32 %v497_v27, %v402_v47  ;;  %v566_v55 = vadd.f32 %v565_v46, %v535_v34  ;;  %v540_v47 = vmul.f32 %v924_v32, %v924_v32 }
  0xf9   : > { %v499_v50 = vadd.f32 %v498_v31, %v404_v51  ;;  %v567_v57 = vadd.f32 %v566_v55, %v536_v42 }
  0xfb   : > { %v500_v35 = vadd.f32 %v499_v50, %v895_v24  ;;  %v568_v59 = vadd.f32 %v567_v57, %v537_v54  ;;  %v484_v54 = vld [vmem:[%s1080_s3] sm:$0x3] }
  0xfd   : > { %v501_v39 = vadd.f32 %v500_v35, %v911_v28  ;;  %v569_v60 = vadd.f32 %v568_v59, %v538_v56 }
  0xff   : > { %v502_v43 = vadd.f32 %v501_v39, %v924_v32  ;;  %v570_v62 = vadd.f32 %v569_v60, %v539_v58 }
 0x101   : > { %v503_v51 = vadd.f32 %v502_v43, %v937_v36  ;;  %v571_v0 = vadd.f32 %v570_v62, %v540_v47 }
 0x103   : > { %v504_v24 = vadd.f32 %v503_v51, %v950_v40  ;;  %v572_v2 = vadd.f32 %v571_v0, %v541_v61 }
 0x105   : > { %v505_v28 = vadd.f32 %v504_v24, %v963_v44  ;;  %v573_v4 = vadd.f32 %v572_v2, %v542_v63 }
 0x107   : > { %v506_v32 = vadd.f32 %v505_v28, %v973_v48  ;;  %v574_v6 = vadd.f32 %v573_v4, %v543_v1 }
 0x109   : > { %v507_v36 = vadd.f32 %v506_v32, %v983_v52  ;;  %v575_v8 = vadd.f32 %v574_v6, %v544_v3 }
 0x10b   : > { %v508_v40 = vadd.f32 %v507_v36, %v897_v25  ;;  %v576_v10 = vadd.f32 %v575_v8, %v545_v5 }
 0x10d   : > { %v509_v44 = vadd.f32 %v508_v40, %v913_v29  ;;  %v577_v12 = vadd.f32 %v576_v10, %v546_v7 }
 0x10f   : > { %v510_v48 = vadd.f32 %v509_v44, %v926_v33  ;;  %v578_v14 = vadd.f32 %v577_v12, %v547_v9 }
 0x111   : > { %v511_v52 = vadd.f32 %v510_v48, %v939_v37  ;;  %v579_v16 = vadd.f32 %v578_v14, %v548_v11 }
 0x113   : > { %v512_v25 = vadd.f32 %v511_v52, %v952_v41  ;;  %v580_v18 = vadd.f32 %v579_v16, %v549_v13 }
 0x115   : > { %v513_v29 = vadd.f32 %v512_v25, %v965_v45  ;;  %v581_v20 = vadd.f32 %v580_v18, %v550_v15 }
 0x117   : > { %v514_v33 = vadd.f32 %v513_v29, %v975_v49  ;;  %v582_v22 = vadd.f32 %v581_v20, %v551_v17 }
 0x119   : > { %v515_v37 = vadd.f32 %v514_v33, %v985_v53  ;;  %v583_v23 = vadd.f32 %v582_v22, %v552_v19 }
 0x11b   : > { %v516_v41 = vrot.slane %v515_v37, 4  ;;  %v584_v30 = vadd.f32 %v583_v23, %v553_v21 }
 0x11d   : > { %v517_v26 = vadd.f32 %v516_v41, %v515_v37  ;;  %v585_v34 = vrot.slane %v584_v30, 4 }
 0x11f   : > { %v518_v27 = vrot.slane %v517_v26, 2  ;;  %v586_v38 = vadd.f32 %v585_v34, %v584_v30 }
 0x121   : > { %v519_v45 = vadd.f32 %v518_v27, %v517_v26  ;;  %v587_v42 = vrot.slane %v586_v38, 2 }
 0x123   : > { %v520_v31 = vrot.slane %v519_v45, 1  ;;  %v588_v46 = vadd.f32 %v587_v42, %v586_v38 }
 0x125   : > { %v521_v50 = vadd.f32 %v520_v31, %v519_v45  ;;  %v589_v49 = vrot.slane %v588_v46, 1 }
 0x127   : > { %v590_v53 = vadd.f32 %v589_v49, %v588_v46 }
 0x129   : > { %v592_v55 = vsel %vm591_vm2, %v521_v50, %v590_v53 }
 0x12a   : > { %v593_v35 = vadd.f32 %v592_v55, %v484_v54 }
 0x12c   : > { %594 = vst [vmem:[%s1080_s3] sm:$0x3] %v593_v35 }
 0x12d PF: > { %s14_s12 = sadd.s32 1, %s799_s12  }
 0x12e   : > { %p11_p5 = scmp.ge.s32.totalorder %s14_s12, 4  }
 0x130   :  { %13 = sbr.rel (!%p11_p5) target bundleno = 1 (0x1), region = 70 }

// kernel: resblock_forward.7
= control target key start
LH: loop header
LB: loop body
LE: loop exit
PB: predicated region body
PF: predicated region fallthrough
CT: control target
= control target key end

     0   :  { %s971_s21 = smov 0   ;;  %s1199_s0 = inlined_call_operand.vmem [shape: f32[512,128], index: 0, kind: input, shape index: {}]   ;;  %s1200_s1 = inlined_call_operand.vmem [shape: f32[1,128], index: 1, kind: input, shape index: {}]   ;;  %s1201_s2 = inlined_call_operand.vmem [shape: f32[1,128], index: 2, kind: input, shape index: {}]   ;;  %s1202_s3 = inlined_call_operand.vmem [shape: bf16[512,4], index: 3, kind: input, shape index: {}]   ;;  %s1203_s4 = inlined_call_operand.vmem [shape: bf16[4,128], index: 4, kind: input, shape index: {}]   ;;  %s1204_s5 = inlined_call_operand.vmem [shape: f32[1,128], index: 5, kind: input, shape index: {}]   ;;  %s1205_s6 = inlined_call_operand.vmem [shape: f32[512,128], index: 6, kind: output, shape index: {}]  }
   0x1 LB: > { %s805_s22 = sadd.s32 4294967295, %s934_s21   ;;  %p809_p0 = scmp.ge.s32.totalorder %s934_s21, 1  ;;  %s934_s21 = sphi %s971_s21, %s16_s21  }
   0x2   : > { %p224_p1 = scmp.lt.s32.totalorder %s934_s21, 3 }
   0x4   : > { %p225_p2 = pnand %p809_p0, %p224_p1 }
   0x5   : > { %s810_s25 = sshll.u32 (!%p225_p2), %s805_s22, 5 }
   0x6   : > { %228 = sbr.rel (%p225_p2) target bundleno = 213 (0xd5), region = 44  ;;  %p260_p3 = scmp.lt.s32.totalorder (!%p225_p2), %s810_s25, 63 }
   0xb   : > { %v414_v0 = vld [vmem:[%s1203_s4] sm:$0x3]  ;;  %vm548_vm0 = vcmask 1041408   ;;  %s1207_s25 = smov (!%p260_p3, %s810_s25), 63  ;;  %vm499_vm1 = vcmask 31744  }
   0xc   : > { %v550_v1 = vsel %vm548_vm0, %v414_v0, 0  ;;  %s813_s26 = sshll.u32 %s1207_s25, 2  ;;  %s811_s30 = sshll.u32 %s1207_s25, 3  ;;  %v1013_v18 = vld [vmem:[%s1200_s1] ss:$0 sm:$0xff] }
   0xd   : > { %559 = vmatpush.bf16.msra.mxu0 %v550_v1  ;;  %914 = vmatpush.bf16.msra.mxu1 %v550_v1  ;;  %s269_s29 = scalar_lea.vmem %s1202_s3, %s813_s26  ;;  %s1008_s9 = scalar_lea.vmem %s1199_s0, %s811_s30  ;;  %v1021_v22 = vld [vmem:[%s1201_s2] ss:$0 sm:$0xff] }
   0xe   : > { %915 = vmatpush.bf16.msra.mxu2 %v550_v1  ;;  %916 = vmatpush.bf16.msra.mxu3 %v550_v1  ;;  %v898_v2 = vld [vmem:[%s269_s29] sm:$0xff]  ;;  %v899_v6 = vld [vmem:[%s269_s29 + $0x8] sm:$0xff]  ;;  %v900_v10 = vld [vmem:[%s269_s29 + $0x10] sm:$0xff]  ;;  %s1044_s18 = scalar_lea.vmem %s1205_s6, %s811_s30 }
   0xf   : > { %v902_v3 = vld [vmem:[%s269_s29 + $0x20] sm:$0xff]  ;;  %v903_v7 = vld [vmem:[%s269_s29 + $0x28] sm:$0xff]  ;;  %v904_v11 = vld [vmem:[%s269_s29 + $0x30] sm:$0xff] }
  0x10   : > { %v906_v4 = vld [vmem:[%s269_s29 + $0x40] sm:$0xff]  ;;  %880 = vmatmul.msk.bf16.vlgmr.msra.gmra.mxu0 %vm499_vm1, %v898_v2  ;;  %884 = vmatmul.msk.bf16.vlgmr.msra.gmra.mxu1 %vm499_vm1, %v902_v3  ;;  %v907_v8 = vld [vmem:[%s269_s29 + $0x48] sm:$0xff]  ;;  %v908_v12 = vld [vmem:[%s269_s29 + $0x50] sm:$0xff] }
  0x11   : > { %v910_v5 = vld [vmem:[%s269_s29 + $0x60] sm:$0xff]  ;;  %888 = vmatmul.msk.bf16.vlgmr.msra.gmra.mxu2 %vm499_vm1, %v906_v4  ;;  %v911_v9 = vld [vmem:[%s269_s29 + $0x68] sm:$0xff]  ;;  %v912_v13 = vld [vmem:[%s269_s29 + $0x70] sm:$0xff] }
  0x12   : > { %892 = vmatmul.msk.bf16.vlgmr.msra.gmra.mxu3 %vm499_vm1, %v910_v5  ;;  %v901_v14 = vld [vmem:[%s269_s29 + $0x18] sm:$0xff]  ;;  %v278_v19 = vld [vmem:[%s1008_s9] sm:$0xff]  ;;  %v279_v31 = vld [vmem:[%s1008_s9 + $0x8] sm:$0xff] }
  0x13   : > { %v905_v15 = vld [vmem:[%s269_s29 + $0x38] sm:$0xff]  ;;  %v286_v20 = vld [vmem:[%s1008_s9 + $0x40] sm:$0xff]  ;;  %v314_v21 = vmul.f32 %v1013_v18, %v278_v19  ;;  %v287_v32 = vld [vmem:[%s1008_s9 + $0x48] sm:$0xff]  ;;  %v315_v39 = vmul.f32 %v1013_v18, %v279_v31 }
  0x14   : > { %v909_v16 = vld [vmem:[%s269_s29 + $0x58] sm:$0xff]  ;;  %v322_v23 = vmul.f32 %v1013_v18, %v286_v20  ;;  %v1027_v24 = vld [vmem:[%s1204_s5] ss:$0 sm:$0xff]  ;;  %v323_v40 = vmul.f32 %v1013_v18, %v287_v32  ;;  %v295_v49 = vld [vmem:[%s1008_s9 + $0x88] sm:$0xff] }
  0x15   : > { %v913_v17 = vld [vmem:[%s269_s29 + $0x78] sm:$0xff]  ;;  %v350_v25 = vadd.f32 %v1021_v22, %v314_v21  ;;  %v294_v27 = vld [vmem:[%s1008_s9 + $0x80] sm:$0xff]  ;;  %v351_v47 = vadd.f32 %v1021_v22, %v315_v39  ;;  %v303_v50 = vld [vmem:[%s1008_s9 + $0xc8] sm:$0xff]  ;;  %v331_v61 = vmul.f32 %v1013_v18, %v295_v49 }
  0x16   : > { %v358_v26 = vadd.f32 %v1021_v22, %v322_v23  ;;  %v302_v28 = vld [vmem:[%s1008_s9 + $0xc0] sm:$0xff]  ;;  %v330_v35 = vmul.f32 %v1013_v18, %v294_v27  ;;  %v359_v48 = vadd.f32 %v1021_v22, %v323_v40  ;;  %v280_v55 = vld [vmem:[%s1008_s9 + $0x10] sm:$0xff]  ;;  %v339_v62 = vmul.f32 %v1013_v18, %v303_v50  ;;  %v281_v20 = vld [vmem:[%s1008_s9 + $0x18] sm:$0xff] }
  0x17   : > { %v338_v36 = vmul.f32 %v1013_v18, %v302_v28  ;;  %v288_v56 = vld [vmem:[%s1008_s9 + $0x50] sm:$0xff]  ;;  %v316_v1 = vmul.f32 %v1013_v18, %v280_v55  ;;  %v289_v21 = vld [vmem:[%s1008_s9 + $0x58] sm:$0xff]  ;;  %v317_v32 = vmul.f32 %v1013_v18, %v281_v20  ;;  %v282_v50 = vld [vmem:[%s1008_s9 + $0x20] sm:$0xff] }
  0x18   : > { %v366_v43 = vadd.f32 %v1021_v22, %v330_v35  ;;  %v324_v2 = vmul.f32 %v1013_v18, %v288_v56  ;;  %v291_v20 = vld [vmem:[%s1008_s9 + $0x68] sm:$0xff] }
  0x19   : > { %v374_v44 = vadd.f32 %v1021_v22, %v338_v36 }
  0x20   : > { %881 = vmatmul.msk.bf16.gmra.mxu0 %vm499_vm1, %v899_v6  ;;  %885 = vmatmul.msk.bf16.gmra.mxu1 %vm499_vm1, %v903_v7  ;;  %v367_v7 = vadd.f32 %v1021_v22, %v331_v61 }
  0x21   : > { %889 = vmatmul.msk.bf16.gmra.mxu2 %vm499_vm1, %v907_v8  ;;  %v375_v8 = vadd.f32 %v1021_v22, %v339_v62 }
  0x22   : > { %893 = vmatmul.msk.bf16.gmra.mxu3 %vm499_vm1, %v911_v9 }
  0x30   : > { %882 = vmatmul.msk.bf16.gmra.mxu0 %vm499_vm1, %v900_v10  ;;  %886 = vmatmul.msk.bf16.gmra.mxu1 %vm499_vm1, %v904_v11  ;;  %v352_v11 = vadd.f32 %v1021_v22, %v316_v1 }
  0x31   : > { %890 = vmatmul.msk.bf16.gmra.mxu2 %vm499_vm1, %v908_v12  ;;  %v360_v12 = vadd.f32 %v1021_v22, %v324_v2 }
  0x32   : > { %894 = vmatmul.msk.bf16.gmra.mxu3 %vm499_vm1, %v912_v13  ;;  %v296_v13 = vld [vmem:[%s1008_s9 + $0x90] sm:$0xff] }
  0x33   : > { %v332_v28 = vmul.f32 %v1013_v18, %v296_v13 }
  0x40   : > { %883 = vmatmul.msk.bf16.gmra.mxu0 %vm499_vm1, %v901_v14  ;;  %887 = vmatmul.msk.bf16.gmra.mxu1 %vm499_vm1, %v905_v15  ;;  %v304_v14 = vld [vmem:[%s1008_s9 + $0xd0] sm:$0xff] }
  0x41   : > { %891 = vmatmul.msk.bf16.gmra.mxu2 %vm499_vm1, %v909_v16 }
  0x42   : > { %895 = vmatmul.msk.bf16.gmra.mxu3 %vm499_vm1, %v913_v17 }
  0x8d   : > { %v561_v29 = vpop.f32.mrf.mxu0  ;;  %v581_v30 = vpop.f32.mrf.mxu1 }
  0x8e   : > { %v562_v33 = vadd.f32 %v1027_v24, %v561_v29  ;;  %v582_v34 = vadd.f32 %v1027_v24, %v581_v30  ;;  %v340_v29 = vmul.f32 %v1013_v18, %v304_v14 }
  0x90   : > { %v641_v37 = vadd.f32 %v562_v33, %v350_v25  ;;  %v649_v38 = vadd.f32 %v582_v34, %v358_v26  ;;  %v325_v33 = vmul.f32 %v1013_v18, %v289_v21  ;;  %v376_v39 = vadd.f32 %v1021_v22, %v340_v29 }
  0x92   : > { %v673_v41 = vmax.f32 %v641_v37, 0.0  ;;  %v681_v42 = vmax.f32 %v649_v38, 0.0  ;;  %v368_v38 = vadd.f32 %v1021_v22, %v332_v28 }
  0x94   : > { %705 = vst [vmem:[%s1044_s18] sm:$0xff] %v673_v41  ;;  %v601_v45 = vpop.f32.mrf.mxu2 }
  0x95   : > { %v621_v46 = vpop.f32.mrf.mxu3  ;;  %713 = vst [vmem:[%s1044_s18 + $0x40] sm:$0xff] %v681_v42  ;;  %v602_v51 = vadd.f32 %v1027_v24, %v601_v45  ;;  %v563_v53 = vpop.f32.mrf.mxu0  ;;  %v353_v42 = vadd.f32 %v1021_v22, %v317_v32  ;;  %v305_v45 = vld [vmem:[%s1008_s9 + $0xd8] sm:$0xff] }
  0x96   : > { %v622_v52 = vadd.f32 %v1027_v24, %v621_v46  ;;  %v583_v54 = vpop.f32.mrf.mxu1  ;;  %v564_v57 = vadd.f32 %v1027_v24, %v563_v53 }
  0x97   : > { %v584_v58 = vadd.f32 %v1027_v24, %v583_v54  ;;  %v657_v59 = vadd.f32 %v602_v51, %v366_v43  ;;  %v361_v43 = vadd.f32 %v1021_v22, %v325_v33  ;;  %v290_v51 = vld [vmem:[%s1008_s9 + $0x60] sm:$0xff] }
  0x98   : > { %v665_v60 = vadd.f32 %v622_v52, %v374_v44  ;;  %v642_v63 = vadd.f32 %v564_v57, %v351_v47  ;;  %v297_v44 = vld [vmem:[%s1008_s9 + $0x98] sm:$0xff]  ;;  %v341_v57 = vmul.f32 %v1013_v18, %v305_v45  ;;  %v326_v61 = vmul.f32 %v1013_v18, %v290_v51  ;;  %v299_v45 = vld [vmem:[%s1008_s9 + $0xa8] sm:$0xff]  ;;  %v284_v51 = vld [vmem:[%s1008_s9 + $0x30] sm:$0xff] }
  0x99   : > { %v650_v0 = vadd.f32 %v584_v58, %v359_v48  ;;  %v689_v3 = vmax.f32 %v657_v59, 0.0  ;;  %v333_v56 = vmul.f32 %v1013_v18, %v297_v44 }
  0x9a   : > { %v697_v4 = vmax.f32 %v665_v60, 0.0  ;;  %v674_v5 = vmax.f32 %v642_v63, 0.0  ;;  %v318_v60 = vmul.f32 %v1013_v18, %v282_v50 }
  0x9b   : > { %v682_v6 = vmax.f32 %v650_v0, 0.0  ;;  %721 = vst [vmem:[%s1044_s18 + $0x80] sm:$0xff] %v689_v3  ;;  %v369_v2 = vadd.f32 %v1021_v22, %v333_v56  ;;  %v377_v3 = vadd.f32 %v1021_v22, %v341_v57  ;;  %v335_v57 = vmul.f32 %v1013_v18, %v299_v45 }
  0x9c   : > { %729 = vst [vmem:[%s1044_s18 + $0xc0] sm:$0xff] %v697_v4  ;;  %v603_v9 = vpop.f32.mrf.mxu2  ;;  %v301_v4 = vld [vmem:[%s1008_s9 + $0xb8] sm:$0xff] }
  0x9d   : > { %v623_v10 = vpop.f32.mrf.mxu3  ;;  %706 = vst [vmem:[%s1044_s18 + $0x8] sm:$0xff] %v674_v5  ;;  %v604_v15 = vadd.f32 %v1027_v24, %v603_v9  ;;  %v566_v17 = vpop.f32.mrf.mxu0  ;;  %v309_v5 = vld [vmem:[%s1008_s9 + $0xf8] sm:$0xff]  ;;  %v362_v9 = vadd.f32 %v1021_v22, %v326_v61  ;;  %v320_v61 = vmul.f32 %v1013_v18, %v284_v51 }
  0x9e   : > { %v624_v16 = vadd.f32 %v1027_v24, %v623_v10  ;;  %v586_v19 = vpop.f32.mrf.mxu1  ;;  %714 = vst [vmem:[%s1044_s18 + $0x48] sm:$0xff] %v682_v6  ;;  %v567_v23 = vadd.f32 %v1027_v24, %v566_v17  ;;  %v298_v10 = vld [vmem:[%s1008_s9 + $0xa0] sm:$0xff]  ;;  %v345_v13 = vmul.f32 %v1013_v18, %v309_v5 }
  0x9f   : > { %v587_v25 = vadd.f32 %v1027_v24, %v586_v19  ;;  %v658_v26 = vadd.f32 %v604_v15, %v367_v7  ;;  %v283_v19 = vld [vmem:[%s1008_s9 + $0x28] sm:$0xff]  ;;  %v334_v29 = vmul.f32 %v1013_v18, %v298_v10  ;;  %v308_v10 = vld [vmem:[%s1008_s9 + $0xf0] sm:$0xff] }
  0xa0   : > { %v666_v27 = vadd.f32 %v624_v16, %v375_v8  ;;  %v643_v30 = vadd.f32 %v567_v23, %v352_v11  ;;  %v354_v8 = vadd.f32 %v1021_v22, %v318_v60  ;;  %v306_v11 = vld [vmem:[%s1008_s9 + $0xe0] sm:$0xff]  ;;  %v319_v33 = vmul.f32 %v1013_v18, %v283_v19 }
  0xa1   : > { %v651_v31 = vadd.f32 %v587_v25, %v360_v12  ;;  %v690_v34 = vmax.f32 %v658_v26, 0.0  ;;  %v337_v12 = vmul.f32 %v1013_v18, %v301_v4  ;;  %v1128_v26 = vadd.f32 %v1021_v22, %v345_v13 }
  0xa2   : > { %v698_v35 = vmax.f32 %v666_v27, 0.0  ;;  %v675_v36 = vmax.f32 %v643_v30, 0.0  ;;  %v342_v30 = vmul.f32 %v1013_v18, %v306_v11 }
  0xa3   : > { %v683_v37 = vmax.f32 %v651_v31, 0.0  ;;  %722 = vst [vmem:[%s1044_s18 + $0x88] sm:$0xff] %v690_v34  ;;  %v1125_v25 = vadd.f32 %v1021_v22, %v337_v12  ;;  %v327_v34 = vmul.f32 %v1013_v18, %v291_v20 }
  0xa4   : > { %730 = vst [vmem:[%s1044_s18 + $0xc8] sm:$0xff] %v698_v35  ;;  %v606_v40 = vpop.f32.mrf.mxu2 }
  0xa5   : > { %v626_v41 = vpop.f32.mrf.mxu3  ;;  %707 = vst [vmem:[%s1044_s18 + $0x10] sm:$0xff] %v675_v36  ;;  %v607_v46 = vadd.f32 %v1027_v24, %v606_v40  ;;  %v568_v48 = vpop.f32.mrf.mxu0  ;;  %v378_v40 = vadd.f32 %v1021_v22, %v342_v30  ;;  %v363_v44 = vadd.f32 %v1021_v22, %v327_v34 }
  0xa6   : > { %v627_v47 = vadd.f32 %v1027_v24, %v626_v41  ;;  %v588_v49 = vpop.f32.mrf.mxu1  ;;  %715 = vst [vmem:[%s1044_s18 + $0x50] sm:$0xff] %v683_v37  ;;  %v569_v52 = vadd.f32 %v1027_v24, %v568_v48 }
  0xa7   : > { %v589_v53 = vadd.f32 %v1027_v24, %v588_v49  ;;  %v659_v54 = vadd.f32 %v607_v46, %v368_v38  ;;  %v307_v46 = vld [vmem:[%s1008_s9 + $0xe8] sm:$0xff] }
  0xa8   : > { %v667_v55 = vadd.f32 %v627_v47, %v376_v39  ;;  %v644_v58 = vadd.f32 %v569_v52, %v353_v42  ;;  %v370_v39 = vadd.f32 %v1021_v22, %v334_v29  ;;  %v292_v52 = vld [vmem:[%s1008_s9 + $0x70] sm:$0xff] }
  0xa9   : > { %v652_v59 = vadd.f32 %v589_v53, %v361_v43  ;;  %v691_v62 = vmax.f32 %v659_v54, 0.0  ;;  %v355_v43 = vadd.f32 %v1021_v22, %v319_v33 }
  0xaa   : > { %v699_v63 = vmax.f32 %v667_v55, 0.0  ;;  %v676_v0 = vmax.f32 %v644_v58, 0.0  ;;  %v343_v58 = vmul.f32 %v1013_v18, %v307_v46 }
  0xab   : > { %v684_v1 = vmax.f32 %v652_v59, 0.0  ;;  %723 = vst [vmem:[%s1044_s18 + $0x90] sm:$0xff] %v691_v62  ;;  %v328_v62 = vmul.f32 %v1013_v18, %v292_v52 }
  0xac   : > { %731 = vst [vmem:[%s1044_s18 + $0xd0] sm:$0xff] %v699_v63  ;;  %v608_v6 = vpop.f32.mrf.mxu2  ;;  %v379_v4 = vadd.f32 %v1021_v22, %v343_v58 }
  0xad   : > { %v628_v7 = vpop.f32.mrf.mxu3  ;;  %708 = vst [vmem:[%s1044_s18 + $0x18] sm:$0xff] %v676_v0  ;;  %v609_v14 = vadd.f32 %v1027_v24, %v608_v6  ;;  %v571_v16 = vpop.f32.mrf.mxu0 }
  0xae   : > { %v629_v15 = vadd.f32 %v1027_v24, %v628_v7  ;;  %v591_v17 = vpop.f32.mrf.mxu1  ;;  %716 = vst [vmem:[%s1044_s18 + $0x58] sm:$0xff] %v684_v1  ;;  %v572_v21 = vadd.f32 %v1027_v24, %v571_v16  ;;  %v356_v7 = vadd.f32 %v1021_v22, %v320_v61  ;;  %v293_v16 = vld [vmem:[%s1008_s9 + $0x78] sm:$0xff] }
  0xaf   : > { %v592_v23 = vadd.f32 %v1027_v24, %v591_v17  ;;  %v660_v27 = vadd.f32 %v609_v14, %v369_v2 }
  0xb0   : > { %v668_v28 = vadd.f32 %v629_v15, %v377_v3  ;;  %v645_v31 = vadd.f32 %v572_v21, %v354_v8  ;;  %v371_v3 = vadd.f32 %v1021_v22, %v335_v57  ;;  %v364_v8 = vadd.f32 %v1021_v22, %v328_v62  ;;  %v285_v15 = vld [vmem:[%s1008_s9 + $0x38] sm:$0xff] }
  0xb1   : > { %v653_v32 = vadd.f32 %v592_v23, %v362_v9  ;;  %v692_v35 = vmax.f32 %v660_v27, 0.0  ;;  %v300_v9 = vld [vmem:[%s1008_s9 + $0xb0] sm:$0xff]  ;;  %v344_v27 = vmul.f32 %v1013_v18, %v308_v10  ;;  %v321_v30 = vmul.f32 %v1013_v18, %v285_v15 }
  0xb2   : > { %v700_v36 = vmax.f32 %v668_v28, 0.0  ;;  %v677_v37 = vmax.f32 %v645_v31, 0.0  ;;  %v336_v23 = vmul.f32 %v1013_v18, %v300_v9  ;;  %v329_v31 = vmul.f32 %v1013_v18, %v293_v16 }
  0xb3   : > { %v685_v38 = vmax.f32 %v653_v32, 0.0  ;;  %724 = vst [vmem:[%s1044_s18 + $0x98] sm:$0xff] %v692_v35 }
  0xb4   : > { %732 = vst [vmem:[%s1044_s18 + $0xd8] sm:$0xff] %v700_v36  ;;  %v611_v41 = vpop.f32.mrf.mxu2  ;;  %v372_v36 = vadd.f32 %v1021_v22, %v336_v23 }
  0xb5   : > { %v631_v42 = vpop.f32.mrf.mxu3  ;;  %709 = vst [vmem:[%s1044_s18 + $0x20] sm:$0xff] %v677_v37  ;;  %v612_v47 = vadd.f32 %v1027_v24, %v611_v41  ;;  %v573_v49 = vpop.f32.mrf.mxu0  ;;  %v380_v37 = vadd.f32 %v1021_v22, %v344_v27  ;;  %v365_v41 = vadd.f32 %v1021_v22, %v329_v31 }
  0xb6   : > { %v632_v48 = vadd.f32 %v1027_v24, %v631_v42  ;;  %v593_v50 = vpop.f32.mrf.mxu1  ;;  %717 = vst [vmem:[%s1044_s18 + $0x60] sm:$0xff] %v685_v38  ;;  %v574_v53 = vadd.f32 %v1027_v24, %v573_v49 }
  0xb7   : > { %v594_v54 = vadd.f32 %v1027_v24, %v593_v50  ;;  %v661_v55 = vadd.f32 %v612_v47, %v370_v39 }
  0xb8   : > { %v669_v56 = vadd.f32 %v632_v48, %v378_v40  ;;  %v646_v59 = vadd.f32 %v574_v53, %v355_v43  ;;  %v357_v40 = vadd.f32 %v1021_v22, %v321_v30 }
  0xb9   : > { %v654_v60 = vadd.f32 %v594_v54, %v363_v44  ;;  %v693_v63 = vmax.f32 %v661_v55, 0.0 }
  0xba   : > { %v701_v0 = vmax.f32 %v669_v56, 0.0  ;;  %v678_v1 = vmax.f32 %v646_v59, 0.0 }
  0xbb   : > { %v686_v2 = vmax.f32 %v654_v60, 0.0  ;;  %725 = vst [vmem:[%s1044_s18 + $0xa0] sm:$0xff] %v693_v63 }
  0xbc   : > { %733 = vst [vmem:[%s1044_s18 + $0xe0] sm:$0xff] %v701_v0  ;;  %v613_v5 = vpop.f32.mrf.mxu2 }
  0xbd   : > { %v633_v6 = vpop.f32.mrf.mxu3  ;;  %710 = vst [vmem:[%s1044_s18 + $0x28] sm:$0xff] %v678_v1  ;;  %v614_v11 = vadd.f32 %v1027_v24, %v613_v5  ;;  %v576_v13 = vpop.f32.mrf.mxu0 }
  0xbe   : > { %v634_v12 = vadd.f32 %v1027_v24, %v633_v6  ;;  %v596_v14 = vpop.f32.mrf.mxu1  ;;  %718 = vst [vmem:[%s1044_s18 + $0x68] sm:$0xff] %v686_v2  ;;  %v577_v17 = vadd.f32 %v1027_v24, %v576_v13 }
  0xbf   : > { %v597_v19 = vadd.f32 %v1027_v24, %v596_v14  ;;  %v662_v20 = vadd.f32 %v614_v11, %v371_v3 }
  0xc0   : > { %v670_v21 = vadd.f32 %v634_v12, %v379_v4  ;;  %v647_v28 = vadd.f32 %v577_v17, %v356_v7 }
  0xc1   : > { %v655_v29 = vadd.f32 %v597_v19, %v364_v8  ;;  %v694_v32 = vmax.f32 %v662_v20, 0.0 }
  0xc2   : > { %v702_v33 = vmax.f32 %v670_v21, 0.0  ;;  %v679_v34 = vmax.f32 %v647_v28, 0.0 }
  0xc3   : > { %v687_v35 = vmax.f32 %v655_v29, 0.0  ;;  %726 = vst [vmem:[%s1044_s18 + $0xa8] sm:$0xff] %v694_v32 }
  0xc4   : > { %734 = vst [vmem:[%s1044_s18 + $0xe8] sm:$0xff] %v702_v33  ;;  %v616_v38 = vpop.f32.mrf.mxu2 }
  0xc5   : > { %v636_v39 = vpop.f32.mrf.mxu3  ;;  %711 = vst [vmem:[%s1044_s18 + $0x30] sm:$0xff] %v679_v34  ;;  %v617_v18 = vadd.f32 %v1027_v24, %v616_v38  ;;  %v578_v43 = vpop.f32.mrf.mxu0 }
  0xc6   : > { %v637_v42 = vadd.f32 %v1027_v24, %v636_v39  ;;  %v598_v44 = vpop.f32.mrf.mxu1  ;;  %719 = vst [vmem:[%s1044_s18 + $0x70] sm:$0xff] %v687_v35  ;;  %v579_v45 = vadd.f32 %v1027_v24, %v578_v43 }
  0xc7   : > { %v599_v46 = vadd.f32 %v1027_v24, %v598_v44  ;;  %v663_v47 = vadd.f32 %v617_v18, %v372_v36 }
  0xc8   : > { %v671_v48 = vadd.f32 %v637_v42, %v380_v37  ;;  %v648_v49 = vadd.f32 %v579_v45, %v357_v40 }
  0xc9   : > { %v656_v22 = vadd.f32 %v599_v46, %v365_v41  ;;  %v695_v50 = vmax.f32 %v663_v47, 0.0 }
  0xca   : > { %v703_v51 = vmax.f32 %v671_v48, 0.0  ;;  %v680_v52 = vmax.f32 %v648_v49, 0.0 }
  0xcb   : > { %v688_v53 = vmax.f32 %v656_v22, 0.0  ;;  %727 = vst [vmem:[%s1044_s18 + $0xb0] sm:$0xff] %v695_v50 }
  0xcc   : > { %735 = vst [vmem:[%s1044_s18 + $0xf0] sm:$0xff] %v703_v51  ;;  %v618_v54 = vpop.f32.mrf.mxu2 }
  0xcd   : > { %v638_v55 = vpop.f32.mrf.mxu3  ;;  %712 = vst [vmem:[%s1044_s18 + $0x38] sm:$0xff] %v680_v52  ;;  %v619_v56 = vadd.f32 %v1027_v24, %v618_v54 }
  0xce   : > { %v639_v57 = vadd.f32 %v1027_v24, %v638_v55  ;;  %720 = vst [vmem:[%s1044_s18 + $0x78] sm:$0xff] %v688_v53 }
  0xcf   : > { %v664_v58 = vadd.f32 %v619_v56, %v1125_v25 }
  0xd0   : > { %v672_v59 = vadd.f32 %v639_v57, %v1128_v26 }
  0xd1   : > { %v696_v60 = vmax.f32 %v664_v58, 0.0 }
  0xd2   : > { %v704_v61 = vmax.f32 %v672_v59, 0.0 }
  0xd3   : > { %728 = vst [vmem:[%s1044_s18 + $0xb8] sm:$0xff] %v696_v60 }
  0xd4   : > { %736 = vst [vmem:[%s1044_s18 + $0xf8] sm:$0xff] %v704_v61 }
  0xd5 PF: > { %s16_s21 = sadd.s32 1, %s934_s21  }
  0xd6   : > { %p13_p4 = scmp.ge.s32.totalorder %s16_s21, 4  }
  0xd8   :  { %15 = sbr.rel (!%p13_p4) target bundleno = 1 (0x1), region = 77 }

// kernel: resblock_forward.6
= control target key start
LH: loop header
LB: loop body
LE: loop exit
PB: predicated region body
PF: predicated region fallthrough
CT: control target
= control target key end

     0   :  { %s3813_s12 = smov 0   ;;  %s4771_s0 = inlined_call_operand.vmem [shape: bf16[512,1152], index: 0, kind: input, shape index: {}]   ;;  %s4772_s1 = inlined_call_operand.vmem [shape: bf16[1152,128], index: 1, kind: input, shape index: {}]   ;;  %s4773_s2 = inlined_call_operand.vmem [shape: f32[512,128], index: 2, kind: output, shape index: {0}]   ;;  %s4774_s3 = inlined_call_operand.vmem [shape: f32[2,128], index: 3, kind: output, shape index: {1}]  }
   0x1 LB: > { %s2658_s13 = sadd.s32 4294967295, %s3790_s12   ;;  %p2662_p0 = scmp.ge.s32.totalorder %s3790_s12, 1  ;;  %s3790_s12 = sphi %s3813_s12, %s14_s12  }
   0x2   : > { %p137_p1 = scmp.lt.s32.totalorder %s3790_s12, 3 }
   0x4   : > { %p138_p2 = pnand %p2662_p0, %p137_p1 }
   0x5   : > { %s2663_s20 = sshll.u32 (!%p138_p2), %s2658_s13, 5  ;;  %p3531_p4 = scmp.ne.s32.totalorder (!%p138_p2), %s2658_s13, 0 }
   0x6   : > { %141 = sbr.rel (%p138_p2) target bundleno = 832 (0x340), region = 28  ;;  %p163_p3 = scmp.lt.s32.totalorder (!%p138_p2), %s2663_s20, 63 }
   0xb   : > { %v3685_v0 = vld [vmem:[%s4772_s1 + $0x38] sm:$0xff]  ;;  %v3684_v1 = vld [vmem:[%s4772_s1 + $0x30] sm:$0xff]  ;;  %v3683_v2 = vld [vmem:[%s4772_s1 + $0x28] sm:$0xff]  ;;  %s4776_s20 = smov (!%p163_p3, %s2663_s20), 63 }
   0xc   : > { %3750 = vmatpush.bf16.msra.mxu1 %v3685_v0  ;;  %3751 = vmatpush.bf16.msra.mxu2 %v3685_v0  ;;  %v3682_v3 = vld [vmem:[%s4772_s1 + $0x20] sm:$0xff]  ;;  %v3681_v4 = vld [vmem:[%s4772_s1 + $0x18] sm:$0xff]  ;;  %v3680_v5 = vld [vmem:[%s4772_s1 + $0x10] sm:$0xff]  ;;  %s3774_s27 = smul.u32 36, %s4776_s20  ;;  %s2666_s24 = sshll.u32 %s4776_s20, 3 }
   0xd   : > { %3752 = vmatpush.bf16.msra.mxu3 %v3685_v0  ;;  %1647 = vmatpush.bf16.msra.mxu0 %v3685_v0  ;;  %v3679_v6 = vld [vmem:[%s4772_s1 + $0x8] sm:$0xff]  ;;  %v3678_v7 = vld [vmem:[%s4772_s1] sm:$0xff]  ;;  %v3701_v16 = vld [vmem:[%s4772_s1 + $0xb8] sm:$0xff] }
   0xe   : > { %s3850_s5 = scalar_lea.vmem %s4771_s0, %s3774_s27  ;;  %v3709_v17 = vld [vmem:[%s4772_s1 + $0xf8] sm:$0xff]  ;;  %v3700_v24 = vld [vmem:[%s4772_s1 + $0xb0] sm:$0xff]  ;;  %v3699_v28 = vld [vmem:[%s4772_s1 + $0xa8] sm:$0xff]  ;;  %s4444_s27 = scalar_lea.vmem %s4773_s2, %s2666_s24 }
   0xf   : > { %v2813_v8 = vld [vmem:[%s3850_s5 + $0x120] sm:$0xf]  ;;  %v3574_v9 = vld [vmem:[%s3850_s5 + $0x140] sm:$0xf0]  ;;  %v3693_v22 = vld [vmem:[%s4772_s1 + $0x78] sm:$0xff] }
  0x10   : > { %3753 = vmatpush.bf16.msra.mxu1 %v3684_v1  ;;  %3754 = vmatpush.bf16.msra.mxu2 %v3684_v1  ;;  %v2957_v10 = vld [vmem:[%s3850_s5 + $0x240] sm:$0xf]  ;;  %v3610_v11 = vld [vmem:[%s3850_s5 + $0x260] sm:$0xf0]  ;;  %v2814_v18 = vor.u32 %v3574_v9, %v2813_v8  ;;  %v3717_v23 = vld [vmem:[%s4772_s1 + $0x138] sm:$0xff] }
  0x11   : > { %3755 = vmatpush.bf16.msra.mxu3 %v3684_v1  ;;  %1648 = vmatpush.bf16.msra.mxu0 %v3684_v1  ;;  %v3101_v12 = vld [vmem:[%s3850_s5 + $0x360] sm:$0xf]  ;;  %v3646_v13 = vld [vmem:[%s3850_s5 + $0x380] sm:$0xf0]  ;;  %v2958_v19 = vor.u32 %v3610_v11, %v2957_v10  ;;  %v3708_v25 = vld [vmem:[%s4772_s1 + $0xf0] sm:$0xff] }
  0x12   : > { %v2669_v14 = vld [vmem:[%s3850_s5] sm:$0xf]  ;;  %v3538_v15 = vld [vmem:[%s3850_s5 + $0x20] sm:$0xf0]  ;;  %v3102_v20 = vor.u32 %v3646_v13, %v3101_v12  ;;  %v3692_v26 = vld [vmem:[%s4772_s1 + $0x70] sm:$0xff] }
  0x13   : > { %v2670_v21 = vor.u32 %v3538_v15, %v2669_v14  ;;  %v3716_v27 = vld [vmem:[%s4772_s1 + $0x130] sm:$0xff]  ;;  %v3707_v29 = vld [vmem:[%s4772_s1 + $0xe8] sm:$0xff]  ;;  %v3698_v33 = vld [vmem:[%s4772_s1 + $0xa0] sm:$0xff] }
  0x14   : > { %3756 = vmatpush.bf16.msra.mxu1 %v3683_v2  ;;  %3757 = vmatpush.bf16.msra.mxu2 %v3683_v2  ;;  %v3691_v30 = vld [vmem:[%s4772_s1 + $0x68] sm:$0xff]  ;;  %v3706_v34 = vld [vmem:[%s4772_s1 + $0xe0] sm:$0xff]  ;;  %v3697_v44 = vld [vmem:[%s4772_s1 + $0x98] sm:$0xff] }
  0x15   : > { %3758 = vmatpush.bf16.msra.mxu3 %v3683_v2  ;;  %1649 = vmatpush.bf16.msra.mxu0 %v3683_v2  ;;  %v3715_v31 = vld [vmem:[%s4772_s1 + $0x128] sm:$0xff]  ;;  %v3690_v42 = vld [vmem:[%s4772_s1 + $0x60] sm:$0xff]  ;;  %v3705_v45 = vld [vmem:[%s4772_s1 + $0xd8] sm:$0xff] }
  0x16   : > { %v2849_v32 = vld [vmem:[%s3850_s5 + $0x168] sm:$0xf]  ;;  %v3583_v35 = vld [vmem:[%s3850_s5 + $0x188] sm:$0xf0]  ;;  %v3714_v43 = vld [vmem:[%s4772_s1 + $0x120] sm:$0xff] }
  0x17   : > { %v2993_v36 = vld [vmem:[%s3850_s5 + $0x288] sm:$0xf]  ;;  %v3619_v37 = vld [vmem:[%s3850_s5 + $0x2a8] sm:$0xf0]  ;;  %v2850_v46 = vor.u32 %v3583_v35, %v2849_v32  ;;  %v3689_v50 = vld [vmem:[%s4772_s1 + $0x58] sm:$0xff] }
  0x18   : > { %3759 = vmatpush.bf16.msra.mxu1 %v3682_v3  ;;  %3760 = vmatpush.bf16.msra.mxu2 %v3682_v3  ;;  %v3137_v38 = vld [vmem:[%s3850_s5 + $0x3a8] sm:$0xf]  ;;  %v3655_v39 = vld [vmem:[%s3850_s5 + $0x3c8] sm:$0xf0]  ;;  %v2994_v47 = vor.u32 %v3619_v37, %v2993_v36  ;;  %v3713_v51 = vld [vmem:[%s4772_s1 + $0x118] sm:$0xff] }
  0x19   : > { %3761 = vmatpush.bf16.msra.mxu3 %v3682_v3  ;;  %1650 = vmatpush.bf16.msra.mxu0 %v3682_v3  ;;  %v2705_v40 = vld [vmem:[%s3850_s5 + $0x48] sm:$0xf]  ;;  %v3547_v41 = vld [vmem:[%s3850_s5 + $0x68] sm:$0xf0]  ;;  %v3138_v48 = vor.u32 %v3655_v39, %v3137_v38  ;;  %v3696_v52 = vld [vmem:[%s4772_s1 + $0x90] sm:$0xff] }
  0x1a   : > { %v2706_v49 = vor.u32 %v3547_v41, %v2705_v40  ;;  %v3704_v53 = vld [vmem:[%s4772_s1 + $0xd0] sm:$0xff]  ;;  %v3695_v56 = vld [vmem:[%s4772_s1 + $0x88] sm:$0xff]  ;;  %v3694_v61 = vld [vmem:[%s4772_s1 + $0x80] sm:$0xff] }
  0x1b   : > { %v3688_v54 = vld [vmem:[%s4772_s1 + $0x50] sm:$0xff]  ;;  %v3703_v57 = vld [vmem:[%s4772_s1 + $0xc8] sm:$0xff]  ;;  %v3702_v62 = vld [vmem:[%s4772_s1 + $0xc0] sm:$0xff] }
  0x1c   : > { %3762 = vmatpush.bf16.msra.mxu1 %v3681_v4  ;;  %3763 = vmatpush.bf16.msra.mxu2 %v3681_v4  ;;  %v3712_v55 = vld [vmem:[%s4772_s1 + $0x110] sm:$0xff]  ;;  %v3687_v58 = vld [vmem:[%s4772_s1 + $0x48] sm:$0xff]  ;;  %v3733_v12 = vld [vmem:[%s4772_s1 + $0x1b8] sm:$0xff] }
  0x1d   : > { %3764 = vmatpush.bf16.msra.mxu3 %v3681_v4  ;;  %1651 = vmatpush.bf16.msra.mxu0 %v3681_v4  ;;  %v3711_v59 = vld [vmem:[%s4772_s1 + $0x108] sm:$0xff]  ;;  %v2885_v60 = vld [vmem:[%s3850_s5 + $0x1b0] sm:$0xf]  ;;  %v3592_v63 = vld [vmem:[%s3850_s5 + $0x1d0] sm:$0xf0] }
  0x1e   : > { %v3029_v0 = vld [vmem:[%s3850_s5 + $0x2d0] sm:$0xf]  ;;  %v3628_v1 = vld [vmem:[%s3850_s5 + $0x2f0] sm:$0xf0]  ;;  %v2886_v8 = vor.u32 %v3592_v63, %v2885_v60  ;;  %v3741_v13 = vld [vmem:[%s4772_s1 + $0x1f8] sm:$0xff] }
  0x1f   : > { %v3173_v2 = vld [vmem:[%s3850_s5 + $0x3f0] sm:$0xf]  ;;  %v3664_v3 = vld [vmem:[%s3850_s5 + $0x410] sm:$0xf0]  ;;  %v3030_v9 = vor.u32 %v3628_v1, %v3029_v0  ;;  %v3725_v14 = vld [vmem:[%s4772_s1 + $0x178] sm:$0xff] }
  0x20   : > { %3765 = vmatpush.bf16.msra.mxu1 %v3680_v5  ;;  %3766 = vmatpush.bf16.msra.mxu2 %v3680_v5  ;;  %v2741_v4 = vld [vmem:[%s3850_s5 + $0x90] sm:$0xf]  ;;  %v3174_v10 = vor.u32 %v3664_v3, %v3173_v2  ;;  %v3749_v15 = vld [vmem:[%s4772_s1 + $0x238] sm:$0xff]  ;;  %v3535_v32 = vld [vmem:[%s3850_s5 + $0xc] sm:$0xf] }
  0x21   : > { %3767 = vmatpush.bf16.msra.mxu3 %v3680_v5  ;;  %1652 = vmatpush.bf16.msra.mxu0 %v3680_v5  ;;  %v3556_v5 = vld [vmem:[%s3850_s5 + $0xb0] sm:$0xf0]  ;;  %v3553_v60 = vld [vmem:[%s3850_s5 + $0x9c] sm:$0xf]  ;;  %v3558_v63 = vld [vmem:[%s3850_s5 + $0xc0] sm:$0xf0] }
  0x22   : > { %v2742_v11 = vor.u32 %v3556_v5, %v2741_v4  ;;  %v3540_v35 = vld [vmem:[%s3850_s5 + $0x30] sm:$0xf0]  ;;  %v3731_v4 = vld [vmem:[%s4772_s1 + $0x1a8] sm:$0xff] }
  0x23   : > { %v3732_v40 = vld [vmem:[%s4772_s1 + $0x1b0] sm:$0xff]  ;;  %v3739_v5 = vld [vmem:[%s4772_s1 + $0x1e8] sm:$0xff] }
  0x24   : > { %3768 = vmatpush.bf16.msra.mxu1 %v3679_v6  ;;  %3769 = vmatpush.bf16.msra.mxu2 %v3679_v6  ;;  %v3740_v41 = vld [vmem:[%s4772_s1 + $0x1f0] sm:$0xff] }
  0x25   : > { %3770 = vmatpush.bf16.msra.mxu3 %v3679_v6  ;;  %1653 = vmatpush.bf16.msra.mxu0 %v3679_v6  ;;  %v3686_v6 = vld [vmem:[%s4772_s1 + $0x40] sm:$0xff] }
  0x28   : > { %3771 = vmatpush.bf16.msra.mxu1 %v3678_v7  ;;  %3772 = vmatpush.bf16.msra.mxu2 %v3678_v7 }
  0x29   : > { %3773 = vmatpush.bf16.msra.mxu3 %v3678_v7  ;;  %1654 = vmatpush.bf16.msra.mxu0 %v3678_v7  ;;  %v3710_v7 = vld [vmem:[%s4772_s1 + $0x100] sm:$0xff] }
  0x2b   : > { %1675 = vmatmul.bf16.vlgmr.msra.gmra.mxu1 %v2814_v18  ;;  %1695 = vmatmul.bf16.vlgmr.msra.gmra.mxu2 %v2958_v19  ;;  %v3065_v18 = vld [vmem:[%s3850_s5 + $0x318] sm:$0xf]  ;;  %v3637_v19 = vld [vmem:[%s3850_s5 + $0x338] sm:$0xf0] }
  0x2c   : > { %1825 = vmatpush.bf16.msrb.mxu2 %v3701_v16  ;;  %1715 = vmatmul.bf16.vlgmr.msra.gmra.mxu3 %v3102_v20  ;;  %v2921_v16 = vld [vmem:[%s3850_s5 + $0x1f8] sm:$0xf] }
  0x2d   : > { %1914 = vmatpush.bf16.msrb.mxu3 %v3709_v17  ;;  %1655 = vmatmul.bf16.vlgmr.msra.gmra.mxu0 %v2670_v21  ;;  %v3601_v17 = vld [vmem:[%s3850_s5 + $0x218] sm:$0xf0]  ;;  %v3209_v20 = vld [vmem:[%s3850_s5 + $0x438] sm:$0xf] }
  0x2e   : > { %1736 = vmatpush.bf16.msrb.mxu1 %v3693_v22  ;;  %2003 = vmatpush.bf16.msrb.mxu0 %v3717_v23  ;;  %v3673_v21 = vld [vmem:[%s3850_s5 + $0x458] sm:$0xf0]  ;;  %v2777_v22 = vld [vmem:[%s3850_s5 + $0xd8] sm:$0xf] }
  0x2f   : > { %v3565_v23 = vld [vmem:[%s3850_s5 + $0xf8] sm:$0xf0] }
  0x30   : > { %1826 = vmatpush.bf16.msrb.mxu2 %v3700_v24  ;;  %v2922_v24 = vor.u32 %v3601_v17, %v2921_v16 }
  0x31   : > { %1915 = vmatpush.bf16.msrb.mxu3 %v3708_v25  ;;  %v3066_v25 = vor.u32 %v3637_v19, %v3065_v18 }
  0x32   : > { %1737 = vmatpush.bf16.msrb.mxu1 %v3692_v26  ;;  %2004 = vmatpush.bf16.msrb.mxu0 %v3716_v27  ;;  %v3210_v26 = vor.u32 %v3673_v21, %v3209_v20  ;;  %v2778_v27 = vor.u32 %v3565_v23, %v2777_v22  ;;  %v3570_v20 = vld [vmem:[%s3850_s5 + $0x124] sm:$0xf]  ;;  %v2815_v21 = vld [vmem:[%s3850_s5 + $0x144] sm:$0xf0]  ;;  %v3575_v23 = vld [vmem:[%s3850_s5 + $0x148] sm:$0xf0] }
  0x33   : > { %v2821_v22 = vld [vmem:[%s3850_s5 + $0x128] sm:$0xf] }
  0x34   : > { %1827 = vmatpush.bf16.msrb.mxu2 %v3699_v28  ;;  %v3534_v28 = vld [vmem:[%s3850_s5 + $0x4] sm:$0xf] }
  0x35   : > { %1916 = vmatpush.bf16.msrb.mxu3 %v3707_v29  ;;  %v2671_v29 = vld [vmem:[%s3850_s5 + $0x24] sm:$0xf0] }
  0x36   : > { %1738 = vmatpush.bf16.msrb.mxu1 %v3691_v30  ;;  %2005 = vmatpush.bf16.msrb.mxu0 %v3715_v31  ;;  %v2677_v30 = vld [vmem:[%s3850_s5 + $0x8] sm:$0xf]  ;;  %v3539_v31 = vld [vmem:[%s3850_s5 + $0x28] sm:$0xf0]  ;;  %v2674_v36 = vor.u32 %v3534_v28, %v2671_v29  ;;  %v2818_v28 = vor.u32 %v3570_v20, %v2815_v21  ;;  %v2822_v29 = vor.u32 %v3575_v23, %v2821_v22  ;;  %v3721_v20 = vld [vmem:[%s4772_s1 + $0x158] sm:$0xff] }
  0x37   : > { %v2678_v37 = vor.u32 %v3539_v31, %v2677_v30  ;;  %v3745_v21 = vld [vmem:[%s4772_s1 + $0x218] sm:$0xff]  ;;  %v2923_v23 = vld [vmem:[%s3850_s5 + $0x21c] sm:$0xf0] }
  0x38   : > { %1828 = vmatpush.bf16.msrb.mxu2 %v3698_v33  ;;  %v2679_v33 = vld [vmem:[%s3850_s5 + $0x2c] sm:$0xf0]  ;;  %v3597_v22 = vld [vmem:[%s3850_s5 + $0x1fc] sm:$0xf] }
  0x39   : > { %1917 = vmatpush.bf16.msrb.mxu3 %v3706_v34  ;;  %v2685_v34 = vld [vmem:[%s3850_s5 + $0x10] sm:$0xf]  ;;  %v2682_v38 = vor.u32 %v3535_v32, %v2679_v33 }
  0x3a   : > { %1739 = vmatpush.bf16.msrb.mxu1 %v3690_v42  ;;  %2006 = vmatpush.bf16.msrb.mxu0 %v3714_v43  ;;  %v2686_v39 = vor.u32 %v3540_v35, %v2685_v34  ;;  %v3724_v42 = vld [vmem:[%s4772_s1 + $0x170] sm:$0xff]  ;;  %v3730_v34 = vld [vmem:[%s4772_s1 + $0x1a0] sm:$0xff] }
  0x3b   : > { %1680 = vmatmul.bf16.gmra.mxu1 %v2850_v46  ;;  %1700 = vmatmul.bf16.gmra.mxu2 %v2994_v47  ;;  %v3748_v43 = vld [vmem:[%s4772_s1 + $0x230] sm:$0xff]  ;;  %v3738_v35 = vld [vmem:[%s4772_s1 + $0x1e0] sm:$0xff] }
  0x3c   : > { %1829 = vmatpush.bf16.msrb.mxu2 %v3697_v44  ;;  %1720 = vmatmul.bf16.gmra.mxu3 %v3138_v48  ;;  %v3543_v44 = vld [vmem:[%s3850_s5 + $0x4c] sm:$0xf]  ;;  %v2713_v46 = vld [vmem:[%s3850_s5 + $0x50] sm:$0xf]  ;;  %v3548_v47 = vld [vmem:[%s3850_s5 + $0x70] sm:$0xf0] }
  0x3d   : > { %1918 = vmatpush.bf16.msrb.mxu3 %v3705_v45  ;;  %1660 = vmatmul.bf16.gmra.mxu0 %v2706_v49  ;;  %v2707_v45 = vld [vmem:[%s3850_s5 + $0x6c] sm:$0xf0]  ;;  %v3544_v48 = vld [vmem:[%s3850_s5 + $0x54] sm:$0xf]  ;;  %v2715_v49 = vld [vmem:[%s3850_s5 + $0x74] sm:$0xf0] }
  0x3e   : > { %1740 = vmatpush.bf16.msrb.mxu1 %v3689_v50  ;;  %2007 = vmatpush.bf16.msrb.mxu0 %v3713_v51  ;;  %v2721_v50 = vld [vmem:[%s3850_s5 + $0x58] sm:$0xf]  ;;  %v3549_v51 = vld [vmem:[%s3850_s5 + $0x78] sm:$0xf0] }
  0x40   : > { %1830 = vmatpush.bf16.msrb.mxu2 %v3696_v52  ;;  %v2710_v52 = vor.u32 %v3543_v44, %v2707_v45  ;;  %v2857_v44 = vld [vmem:[%s3850_s5 + $0x170] sm:$0xf]  ;;  %v3584_v45 = vld [vmem:[%s3850_s5 + $0x190] sm:$0xf0] }
  0x41   : > { %1919 = vmatpush.bf16.msrb.mxu3 %v3704_v53  ;;  %v2714_v53 = vor.u32 %v3548_v47, %v2713_v46  ;;  %v3580_v46 = vld [vmem:[%s3850_s5 + $0x174] sm:$0xf]  ;;  %v2859_v47 = vld [vmem:[%s3850_s5 + $0x194] sm:$0xf0] }
  0x42   : > { %1741 = vmatpush.bf16.msrb.mxu1 %v3688_v54  ;;  %2008 = vmatpush.bf16.msrb.mxu0 %v3712_v55  ;;  %v2718_v54 = vor.u32 %v3544_v48, %v2715_v49  ;;  %v2722_v55 = vor.u32 %v3549_v51, %v2721_v50  ;;  %v2865_v48 = vld [vmem:[%s3850_s5 + $0x178] sm:$0xf]  ;;  %v3585_v49 = vld [vmem:[%s3850_s5 + $0x198] sm:$0xf0] }
  0x44   : > { %1831 = vmatpush.bf16.msrb.mxu2 %v3695_v56  ;;  %v3552_v56 = vld [vmem:[%s3850_s5 + $0x94] sm:$0xf] }
  0x45   : > { %1920 = vmatpush.bf16.msrb.mxu3 %v3703_v57  ;;  %v2743_v57 = vld [vmem:[%s3850_s5 + $0xb4] sm:$0xf0] }
  0x46   : > { %1742 = vmatpush.bf16.msrb.mxu1 %v3687_v58  ;;  %2009 = vmatpush.bf16.msrb.mxu0 %v3711_v59  ;;  %v2749_v58 = vld [vmem:[%s3850_s5 + $0x98] sm:$0xf]  ;;  %v3557_v59 = vld [vmem:[%s3850_s5 + $0xb8] sm:$0xf0]  ;;  %v2746_v0 = vor.u32 %v3552_v56, %v2743_v57  ;;  %v2866_v56 = vor.u32 %v3585_v49, %v2865_v48  ;;  %v3606_v48 = vld [vmem:[%s3850_s5 + $0x244] sm:$0xf] }
  0x47   : > { %v2750_v1 = vor.u32 %v3557_v59, %v2749_v58  ;;  %v2959_v49 = vld [vmem:[%s3850_s5 + $0x264] sm:$0xf0] }
  0x48   : > { %1832 = vmatpush.bf16.msrb.mxu2 %v3694_v61  ;;  %v2751_v61 = vld [vmem:[%s3850_s5 + $0xbc] sm:$0xf0] }
  0x49   : > { %1921 = vmatpush.bf16.msrb.mxu3 %v3702_v62  ;;  %v2757_v62 = vld [vmem:[%s3850_s5 + $0xa0] sm:$0xf]  ;;  %v2754_v2 = vor.u32 %v3553_v60, %v2751_v61 }
  0x4a   : > { %1743 = vmatpush.bf16.msrb.mxu1 %v3686_v6  ;;  %2010 = vmatpush.bf16.msrb.mxu0 %v3710_v7  ;;  %v2758_v3 = vor.u32 %v3558_v63, %v2757_v62  ;;  %v3723_v6 = vld [vmem:[%s4772_s1 + $0x168] sm:$0xff]  ;;  %v3588_v62 = vld [vmem:[%s3850_s5 + $0x1b4] sm:$0xf]  ;;  %v2887_v63 = vld [vmem:[%s3850_s5 + $0x1d4] sm:$0xf0] }
  0x4b   : > { %1685 = vmatmul.bf16.gmra.mxu1 %v2886_v8  ;;  %1705 = vmatmul.bf16.gmra.mxu2 %v3030_v9  ;;  %v3747_v7 = vld [vmem:[%s4772_s1 + $0x228] sm:$0xff]  ;;  %v3561_v8 = vld [vmem:[%s3850_s5 + $0xdc] sm:$0xf]  ;;  %v2779_v9 = vld [vmem:[%s3850_s5 + $0xfc] sm:$0xf0] }
  0x4c   : > { %1725 = vmatmul.bf16.gmra.mxu3 %v3174_v10  ;;  %2181 = vmatpush.bf16.msra.mxu2 %v3733_v12  ;;  %v2785_v10 = vld [vmem:[%s3850_s5 + $0xe0] sm:$0xf]  ;;  %v3562_v12 = vld [vmem:[%s3850_s5 + $0xe4] sm:$0xf]  ;;  %v2782_v16 = vor.u32 %v3561_v8, %v2779_v9  ;;  %v2890_v8 = vor.u32 %v3588_v62, %v2887_v63  ;;  %v2973_v62 = vld [vmem:[%s3850_s5 + $0x250] sm:$0xf] }
  0x4d   : > { %1665 = vmatmul.bf16.gmra.mxu0 %v2742_v11  ;;  %2270 = vmatpush.bf16.msra.mxu3 %v3741_v13  ;;  %v3566_v11 = vld [vmem:[%s3850_s5 + $0x100] sm:$0xf0]  ;;  %v2787_v13 = vld [vmem:[%s3850_s5 + $0x104] sm:$0xf0]  ;;  %v3612_v63 = vld [vmem:[%s3850_s5 + $0x270] sm:$0xf0] }
  0x4e   : > { %2092 = vmatpush.bf16.msra.mxu1 %v3725_v14  ;;  %2359 = vmatpush.bf16.msra.mxu0 %v3749_v15  ;;  %v2793_v14 = vld [vmem:[%s3850_s5 + $0xe8] sm:$0xf]  ;;  %v3567_v15 = vld [vmem:[%s3850_s5 + $0x108] sm:$0xf0]  ;;  %v2786_v17 = vor.u32 %v3566_v11, %v2785_v10  ;;  %v2790_v18 = vor.u32 %v3562_v12, %v2787_v13 }
  0x4f   : > { %v2794_v19 = vor.u32 %v3567_v15, %v2793_v14  ;;  %v3729_v14 = vld [vmem:[%s4772_s1 + $0x198] sm:$0xff] }
  0x50   : > { %2182 = vmatpush.bf16.msra.mxu2 %v3732_v40  ;;  %v3737_v15 = vld [vmem:[%s4772_s1 + $0x1d8] sm:$0xff] }
  0x51   : > { %2271 = vmatpush.bf16.msra.mxu3 %v3740_v41  ;;  %v3746_v41 = vld [vmem:[%s4772_s1 + $0x220] sm:$0xff] }
  0x52   : > { %2093 = vmatpush.bf16.msra.mxu1 %v3724_v42  ;;  %2360 = vmatpush.bf16.msra.mxu0 %v3748_v43  ;;  %v3579_v42 = vld [vmem:[%s3850_s5 + $0x16c] sm:$0xf]  ;;  %v2851_v43 = vld [vmem:[%s3850_s5 + $0x18c] sm:$0xf0] }
  0x54   : > { %2183 = vmatpush.bf16.msra.mxu2 %v3731_v4  ;;  %v2901_v4 = vld [vmem:[%s3850_s5 + $0x1c0] sm:$0xf] }
  0x55   : > { %2272 = vmatpush.bf16.msra.mxu3 %v3739_v5  ;;  %v3594_v5 = vld [vmem:[%s3850_s5 + $0x1e0] sm:$0xf0] }
  0x56   : > { %2094 = vmatpush.bf16.msra.mxu1 %v3723_v6  ;;  %2361 = vmatpush.bf16.msra.mxu0 %v3747_v7  ;;  %v2902_v12 = vor.u32 %v3594_v5, %v2901_v4 }
  0x58   : > { %2184 = vmatpush.bf16.msra.mxu2 %v3730_v34  ;;  %v2926_v34 = vor.u32 %v3597_v22, %v2923_v23 }
  0x59   : > { %2273 = vmatpush.bf16.msra.mxu3 %v3738_v35 }
  0x5a   : > { %2362 = vmatpush.bf16.msra.mxu0 %v3746_v41 }
  0x5b   : > { %1690 = vmatmul.bf16.gmra.mxu1 %v2922_v24  ;;  %1710 = vmatmul.bf16.gmra.mxu2 %v3066_v25  ;;  %v3571_v24 = vld [vmem:[%s3850_s5 + $0x12c] sm:$0xf]  ;;  %v2823_v25 = vld [vmem:[%s3850_s5 + $0x14c] sm:$0xf0] }
  0x5c   : > { %1730 = vmatmul.bf16.gmra.mxu3 %v3210_v26  ;;  %v2829_v26 = vld [vmem:[%s3850_s5 + $0x130] sm:$0xf]  ;;  %v2826_v31 = vor.u32 %v3571_v24, %v2823_v25  ;;  %2185 = vmatpush.bf16.msra.mxu2 %v3729_v14  ;;  %v2929_v24 = vld [vmem:[%s3850_s5 + $0x200] sm:$0xf]  ;;  %v3602_v25 = vld [vmem:[%s3850_s5 + $0x220] sm:$0xf0] }
  0x5d   : > { %1670 = vmatmul.bf16.gmra.mxu0 %v2778_v27  ;;  %v3576_v27 = vld [vmem:[%s3850_s5 + $0x150] sm:$0xf0]  ;;  %2274 = vmatpush.bf16.msra.mxu3 %v3737_v15  ;;  %v2930_v35 = vor.u32 %v3602_v25, %v2929_v24 }
  0x5e   : > { %v2830_v32 = vor.u32 %v3576_v27, %v2829_v26  ;;  %2363 = vmatpush.bf16.msra.mxu0 %v3745_v21  ;;  %v3598_v26 = vld [vmem:[%s3850_s5 + $0x204] sm:$0xf]  ;;  %v2931_v27 = vld [vmem:[%s3850_s5 + $0x224] sm:$0xf0]  ;;  %v3736_v14 = vld [vmem:[%s4772_s1 + $0x1d0] sm:$0xff] }
  0x5f   : > { %v2934_v41 = vor.u32 %v3598_v26, %v2931_v27  ;;  %v3720_v25 = vld [vmem:[%s4772_s1 + $0x150] sm:$0xff]  ;;  %v3615_v27 = vld [vmem:[%s3850_s5 + $0x28c] sm:$0xf] }
  0x60   : > { %v3744_v26 = vld [vmem:[%s4772_s1 + $0x210] sm:$0xff] }
  0x61   : > { %2275 = vmatpush.bf16.msra.mxu3 %v3736_v14 }
  0x62   : > { %2364 = vmatpush.bf16.msra.mxu0 %v3744_v26  ;;  %v3039_v26 = vld [vmem:[%s3850_s5 + $0x2fc] sm:$0xf0] }
  0x6b   : > { %1744 = vmatmul.bf16.vlgmr.msrb.gmra.mxu1 %v2674_v36  ;;  %1833 = vmatmul.bf16.vlgmr.msrb.gmra.mxu2 %v2678_v37 }
  0x6c   : > { %1922 = vmatmul.bf16.vlgmr.msrb.gmra.mxu3 %v2682_v38  ;;  %v3722_v38 = vld [vmem:[%s4772_s1 + $0x160] sm:$0xff] }
  0x6d   : > { %2011 = vmatmul.bf16.vlgmr.msrb.gmra.mxu0 %v2686_v39  ;;  %2095 = vmatpush.bf16.msra.mxu1 %v3722_v38 }
  0x71   : > { %2096 = vmatpush.bf16.msra.mxu1 %v3721_v20 }
  0x75   : > { %2097 = vmatpush.bf16.msra.mxu1 %v3720_v25  ;;  %v3625_v25 = vld [vmem:[%s3850_s5 + $0x2dc] sm:$0xf] }
  0x7b   : > { %1749 = vmatmul.bf16.gmra.mxu1 %v2710_v52  ;;  %1838 = vmatmul.bf16.gmra.mxu2 %v2714_v53  ;;  %v2854_v52 = vor.u32 %v3579_v42, %v2851_v43  ;;  %v2858_v53 = vor.u32 %v3584_v45, %v2857_v44 }
  0x7c   : > { %1927 = vmatmul.bf16.gmra.mxu3 %v2718_v54 }
  0x7d   : > { %2016 = vmatmul.bf16.gmra.mxu0 %v2722_v55  ;;  %v2862_v55 = vor.u32 %v3580_v46, %v2859_v47 }
  0x8b   : > { %1754 = vmatmul.bf16.gmra.mxu1 %v2746_v0  ;;  %1843 = vmatmul.bf16.gmra.mxu2 %v2750_v1  ;;  %v2893_v0 = vld [vmem:[%s3850_s5 + $0x1b8] sm:$0xf]  ;;  %v3593_v1 = vld [vmem:[%s3850_s5 + $0x1d8] sm:$0xf0] }
  0x8c   : > { %1932 = vmatmul.bf16.gmra.mxu3 %v2754_v2  ;;  %v3589_v2 = vld [vmem:[%s3850_s5 + $0x1bc] sm:$0xf]  ;;  %v2894_v9 = vor.u32 %v3593_v1, %v2893_v0 }
  0x8d   : > { %2021 = vmatmul.bf16.gmra.mxu0 %v2758_v3  ;;  %v2895_v3 = vld [vmem:[%s3850_s5 + $0x1dc] sm:$0xf0] }
  0x8e   : > { %v2898_v11 = vor.u32 %v3589_v2, %v2895_v3  ;;  %v2962_v2 = vor.u32 %v3606_v48, %v2959_v49  ;;  %v3621_v48 = vld [vmem:[%s3850_s5 + $0x2b8] sm:$0xf0] }
  0x9b   : > { %1759 = vmatmul.bf16.gmra.mxu1 %v2782_v16  ;;  %1848 = vmatmul.bf16.gmra.mxu2 %v2786_v17 }
  0x9c   : > { %1937 = vmatmul.bf16.gmra.mxu3 %v2790_v18 }
  0x9d   : > { %2026 = vmatmul.bf16.gmra.mxu0 %v2794_v19 }
  0xa8   : > { %v4059_v30 = vpop.f32.mrf.mxu1 }
  0xaa   : > { %v4061_v33 = vpop.f32.mrf.mxu0 }
  0xab   : > { %1764 = vmatmul.bf16.gmra.mxu1 %v2818_v28  ;;  %1853 = vmatmul.bf16.gmra.mxu2 %v2822_v29  ;;  %v2937_v28 = vld [vmem:[%s3850_s5 + $0x208] sm:$0xf]  ;;  %v3603_v29 = vld [vmem:[%s3850_s5 + $0x228] sm:$0xf0] }
  0xac   : > { %1942 = vmatmul.bf16.gmra.mxu3 %v2826_v31  ;;  %v2938_v42 = vor.u32 %v3603_v29, %v2937_v28  ;;  %v2995_v28 = vld [vmem:[%s3850_s5 + $0x2ac] sm:$0xf0] }
  0xad   : > { %2031 = vmatmul.bf16.gmra.mxu0 %v2830_v32 }
  0xae   : > { %v4069_v36 = vpop.f32.mrf.mxu2 }
  0xaf   : > { %v4071_v37 = vpop.f32.mrf.mxu3 }
  0xb0   : > { %v4076_v39 = vpop.f32.mrf.mxu1 }
  0xb2   : > { %v4078_v40 = vpop.f32.mrf.mxu0 }
  0xb6   : > { %v4091_v50 = vpop.f32.mrf.mxu2 }
  0xb7   : > { %v4093_v51 = vpop.f32.mrf.mxu3 }
  0xb8   : > { %v4095_v54 = vpop.f32.mrf.mxu1 }
  0xba   : > { %v4097_v57 = vpop.f32.mrf.mxu0 }
  0xbb   : > { %1769 = vmatmul.bf16.gmra.mxu1 %v2854_v52  ;;  %1858 = vmatmul.bf16.gmra.mxu2 %v2858_v53  ;;  %v2965_v52 = vld [vmem:[%s3850_s5 + $0x248] sm:$0xf]  ;;  %v3611_v53 = vld [vmem:[%s3850_s5 + $0x268] sm:$0xf0] }
  0xbc   : > { %1947 = vmatmul.bf16.gmra.mxu3 %v2862_v55  ;;  %v3607_v55 = vld [vmem:[%s3850_s5 + $0x24c] sm:$0xf]  ;;  %v2966_v3 = vor.u32 %v3611_v53, %v2965_v52 }
  0xbd   : > { %2036 = vmatmul.bf16.gmra.mxu0 %v2866_v56  ;;  %v2967_v56 = vld [vmem:[%s3850_s5 + $0x26c] sm:$0xf0] }
  0xbe   : > { %v4099_v58 = vpop.f32.mrf.mxu2  ;;  %v2970_v5 = vor.u32 %v3607_v55, %v2967_v56  ;;  %v2998_v55 = vor.u32 %v3615_v27, %v2995_v28  ;;  %v3045_v27 = vld [vmem:[%s3850_s5 + $0x2e0] sm:$0xf]  ;;  %v3630_v28 = vld [vmem:[%s3850_s5 + $0x300] sm:$0xf0] }
  0xbf   : > { %v4101_v59 = vpop.f32.mrf.mxu3 }
  0xc0   : > { %v4103_v60 = vpop.f32.mrf.mxu1 }
  0xc2   : > { %v4105_v61 = vpop.f32.mrf.mxu0 }
  0xc6   : > { %v4115_v6 = vpop.f32.mrf.mxu2 }
  0xc7   : > { %v4117_v7 = vpop.f32.mrf.mxu3 }
  0xc8   : > { %v4119_v10 = vpop.f32.mrf.mxu1 }
  0xca   : > { %v4121_v13 = vpop.f32.mrf.mxu0 }
  0xcb   : > { %1774 = vmatmul.bf16.gmra.mxu1 %v2890_v8  ;;  %1863 = vmatmul.bf16.gmra.mxu2 %v2894_v9  ;;  %v2974_v8 = vor.u32 %v3612_v63, %v2973_v62 }
  0xcc   : > { %1952 = vmatmul.bf16.gmra.mxu3 %v2898_v11 }
  0xcd   : > { %2041 = vmatmul.bf16.gmra.mxu0 %v2902_v12  ;;  %v3728_v12 = vld [vmem:[%s4772_s1 + $0x190] sm:$0xff] }
  0xce   : > { %v4129_v16 = vpop.f32.mrf.mxu2  ;;  %2186 = vmatpush.bf16.msra.mxu2 %v3728_v12 }
  0xcf   : > { %v4131_v17 = vpop.f32.mrf.mxu3 }
  0xd0   : > { %v4133_v18 = vpop.f32.mrf.mxu1 }
  0xd2   : > { %v4135_v19 = vpop.f32.mrf.mxu0 }
  0xd6   : > { %v4151_v31 = vpop.f32.mrf.mxu2 }
  0xd7   : > { %v4153_v32 = vpop.f32.mrf.mxu3 }
  0xd8   : > { %v4155_v38 = vpop.f32.mrf.mxu1 }
  0xda   : > { %v4157_v43 = vpop.f32.mrf.mxu0 }
  0xdb   : > { %1779 = vmatmul.bf16.gmra.mxu1 %v2926_v34  ;;  %1868 = vmatmul.bf16.gmra.mxu2 %v2930_v35  ;;  %v3001_v34 = vld [vmem:[%s3850_s5 + $0x290] sm:$0xf]  ;;  %v3620_v35 = vld [vmem:[%s3850_s5 + $0x2b0] sm:$0xf0] }
  0xdc   : > { %1957 = vmatmul.bf16.gmra.mxu3 %v2934_v41  ;;  %v3616_v41 = vld [vmem:[%s3850_s5 + $0x294] sm:$0xf]  ;;  %v3002_v56 = vor.u32 %v3620_v35, %v3001_v34 }
  0xdd   : > { %2046 = vmatmul.bf16.gmra.mxu0 %v2938_v42  ;;  %v3003_v42 = vld [vmem:[%s3850_s5 + $0x2b4] sm:$0xf0] }
  0xde   : > { %v4159_v44 = vpop.f32.mrf.mxu2  ;;  %v3006_v63 = vor.u32 %v3616_v41, %v3003_v42 }
  0xdf   : > { %v4161_v45 = vpop.f32.mrf.mxu3 }
  0xe0   : > { %v4163_v46 = vpop.f32.mrf.mxu1 }
  0xe2   : > { %v4165_v47 = vpop.f32.mrf.mxu0 }
  0xe6   : > { %v4175_v0 = vpop.f32.mrf.mxu2 }
  0xe7   : > { %v4177_v1 = vpop.f32.mrf.mxu3 }
  0xe8   : > { %v1745_v4 = vpop.f32.mrf.mxu1 }
  0xe9   : > { %v1746_v9 = vadd.f32 %v1745_v4, %v4061_v33 }
  0xea   : > { %v2012_v11 = vpop.f32.mrf.mxu0 }
  0xeb   : > { %1784 = vmatmul.bf16.gmra.mxu1 %v2962_v2  ;;  %1873 = vmatmul.bf16.gmra.mxu2 %v2966_v3 }
  0xec   : > { %1962 = vmatmul.bf16.gmra.mxu3 %v2970_v5 }
  0xed   : > { %2051 = vmatmul.bf16.gmra.mxu0 %v2974_v8 }
  0xee   : > { %v1834_v15 = vpop.f32.mrf.mxu2 }
  0xef   : > { %v1835_v33 = vadd.f32 %v1834_v15, %v1746_v9  ;;  %v1923_v20 = vpop.f32.mrf.mxu3 }
  0xf0   : > { %v1747_v21 = vpop.f32.mrf.mxu1 }
  0xf1   : > { %v1924_v22 = vadd.f32 %v1923_v20, %v1835_v33  ;;  %v1748_v23 = vadd.f32 %v1747_v21, %v4078_v40  ;;  %v3009_v40 = vld [vmem:[%s3850_s5 + $0x298] sm:$0xf]  ;;  %v3624_v20 = vld [vmem:[%s3850_s5 + $0x2d4] sm:$0xf] }
  0xf2   : > { %v2014_v24 = vpop.f32.mrf.mxu0  ;;  %v3010_v2 = vor.u32 %v3621_v48, %v3009_v40  ;;  %v3031_v21 = vld [vmem:[%s3850_s5 + $0x2f4] sm:$0xf0] }
  0xf3   : > { %v4195_v29 = vadd.f32 %v2012_v11, %v1924_v22  ;;  %v3034_v42 = vor.u32 %v3624_v20, %v3031_v21  ;;  %v3073_v20 = vld [vmem:[%s3850_s5 + $0x320] sm:$0xf]  ;;  %v3638_v21 = vld [vmem:[%s3850_s5 + $0x340] sm:$0xf0] }
  0xf6   : > { %v1836_v49 = vpop.f32.mrf.mxu2 }
  0xf7   : > { %v1837_v52 = vadd.f32 %v1836_v49, %v1748_v23  ;;  %v1925_v53 = vpop.f32.mrf.mxu3  ;;  %v3037_v23 = vld [vmem:[%s3850_s5 + $0x2d8] sm:$0xf]  ;;  %v3042_v49 = vor.u32 %v3625_v25, %v3039_v26  ;;  %v3639_v25 = vld [vmem:[%s3850_s5 + $0x348] sm:$0xf0] }
  0xf8   : > { %v1750_v62 = vpop.f32.mrf.mxu1 }
  0xf9   : > { %v1926_v3 = vadd.f32 %v1925_v53, %v1837_v52  ;;  %v1751_v4 = vadd.f32 %v1750_v62, %v4097_v57  ;;  %v3046_v52 = vor.u32 %v3630_v28, %v3045_v27  ;;  %v3727_v62 = vld [vmem:[%s4772_s1 + $0x188] sm:$0xff] }
  0xfa   : > { %v2017_v5 = vpop.f32.mrf.mxu0  ;;  %2187 = vmatpush.bf16.msra.mxu2 %v3727_v62 }
  0xfb   : > { %1789 = vmatmul.bf16.gmra.mxu1 %v2998_v55  ;;  %1878 = vmatmul.bf16.gmra.mxu2 %v3002_v56  ;;  %v4204_v8 = vadd.f32 %v2014_v24, %v1926_v3  ;;  %v3629_v24 = vld [vmem:[%s3850_s5 + $0x2f8] sm:$0xf0] }
  0xfc   : > { %1967 = vmatmul.bf16.gmra.mxu3 %v3006_v63  ;;  %v3038_v40 = vor.u32 %v3629_v24, %v3037_v23  ;;  %v3735_v63 = vld [vmem:[%s4772_s1 + $0x1c8] sm:$0xff]  ;;  %v3634_v23 = vld [vmem:[%s3850_s5 + $0x324] sm:$0xf] }
  0xfd   : > { %2056 = vmatmul.bf16.gmra.mxu0 %v3010_v2  ;;  %2276 = vmatpush.bf16.msra.mxu3 %v3735_v63  ;;  %v3075_v24 = vld [vmem:[%s3850_s5 + $0x344] sm:$0xf0] }
  0xfe   : > { %v1839_v9 = vpop.f32.mrf.mxu2 }
  0xff   : > { %v1840_v11 = vadd.f32 %v1839_v9, %v1751_v4  ;;  %v1928_v12 = vpop.f32.mrf.mxu3 }
 0x100   : > { %v1752_v14 = vpop.f32.mrf.mxu1 }
 0x101   : > { %v1929_v15 = vadd.f32 %v1928_v12, %v1840_v11  ;;  %v1753_v57 = vadd.f32 %v1752_v14, %v4105_v61  ;;  %v3719_v12 = vld [vmem:[%s4772_s1 + $0x148] sm:$0xff] }
 0x102   : > { %v2019_v33 = vpop.f32.mrf.mxu0  ;;  %v3743_v14 = vld [vmem:[%s4772_s1 + $0x208] sm:$0xff]  ;;  %2098 = vmatpush.bf16.msra.mxu1 %v3719_v12 }
 0x103   : > { %v4209_v22 = vadd.f32 %v2017_v5, %v1929_v15  ;;  %v3633_v15 = vld [vmem:[%s3850_s5 + $0x31c] sm:$0xf]  ;;  %2365 = vmatpush.bf16.msra.mxu0 %v3743_v14  ;;  %v3643_v12 = vld [vmem:[%s3850_s5 + $0x36c] sm:$0xf]  ;;  %v3111_v14 = vld [vmem:[%s3850_s5 + $0x38c] sm:$0xf0] }
 0x106   : > { %v1841_v34 = vpop.f32.mrf.mxu2 }
 0x107   : > { %v1842_v35 = vadd.f32 %v1841_v34, %v1753_v57  ;;  %v1930_v41 = vpop.f32.mrf.mxu3  ;;  %v3067_v57 = vld [vmem:[%s3850_s5 + $0x33c] sm:$0xf0] }
 0x108   : > { %v1755_v48 = vpop.f32.mrf.mxu1  ;;  %v3070_v34 = vor.u32 %v3633_v15, %v3067_v57  ;;  %v3117_v15 = vld [vmem:[%s3850_s5 + $0x370] sm:$0xf]  ;;  %v3648_v57 = vld [vmem:[%s3850_s5 + $0x390] sm:$0xf0] }
 0x109   : > { %v1931_v61 = vadd.f32 %v1930_v41, %v1842_v35  ;;  %v1756_v53 = vadd.f32 %v1755_v48, %v4121_v13  ;;  %v3074_v35 = vor.u32 %v3638_v21, %v3073_v20 }
 0x10a   : > { %v2022_v55 = vpop.f32.mrf.mxu0 }
 0x10b   : > { %1794 = vmatmul.bf16.gmra.mxu1 %v3034_v42  ;;  %1883 = vmatmul.bf16.gmra.mxu2 %v3038_v40  ;;  %v4218_v56 = vadd.f32 %v2019_v33, %v1931_v61  ;;  %v3078_v42 = vor.u32 %v3634_v23, %v3075_v24 }
 0x10c   : > { %1972 = vmatmul.bf16.gmra.mxu3 %v3042_v49 }
 0x10d   : > { %2061 = vmatmul.bf16.gmra.mxu0 %v3046_v52 }
 0x10e   : > { %v1844_v2 = vpop.f32.mrf.mxu2 }
 0x10f   : > { %v1845_v13 = vadd.f32 %v1844_v2, %v1756_v53  ;;  %v1933_v3 = vpop.f32.mrf.mxu3 }
 0x110   : > { %v1757_v4 = vpop.f32.mrf.mxu1 }
 0x111   : > { %v1934_v5 = vadd.f32 %v1933_v3, %v1845_v13  ;;  %v1758_v9 = vadd.f32 %v1757_v4, %v4135_v19  ;;  %v3081_v19 = vld [vmem:[%s3850_s5 + $0x328] sm:$0xf]  ;;  %v3642_v3 = vld [vmem:[%s3850_s5 + $0x364] sm:$0xf] }
 0x112   : > { %v2024_v11 = vpop.f32.mrf.mxu0  ;;  %v3082_v40 = vor.u32 %v3639_v25, %v3081_v19  ;;  %v3103_v4 = vld [vmem:[%s3850_s5 + $0x384] sm:$0xf0] }
 0x113   : > { %v4235_v33 = vadd.f32 %v2022_v55, %v1934_v5  ;;  %v3106_v24 = vor.u32 %v3642_v3, %v3103_v4  ;;  %v3656_v3 = vld [vmem:[%s3850_s5 + $0x3d0] sm:$0xf0] }
 0x114   : > { %v3652_v4 = vld [vmem:[%s3850_s5 + $0x3b4] sm:$0xf] }
 0x116   : > { %v1846_v26 = vpop.f32.mrf.mxu2 }
 0x117   : > { %v1847_v27 = vadd.f32 %v1846_v26, %v1758_v9  ;;  %v1935_v28 = vpop.f32.mrf.mxu3  ;;  %v3109_v9 = vld [vmem:[%s3850_s5 + $0x368] sm:$0xf]  ;;  %v3114_v26 = vor.u32 %v3643_v12, %v3111_v14  ;;  %v3153_v12 = vld [vmem:[%s3850_s5 + $0x3b8] sm:$0xf]  ;;  %v3657_v14 = vld [vmem:[%s3850_s5 + $0x3d8] sm:$0xf0] }
 0x118   : > { %v1760_v41 = vpop.f32.mrf.mxu1 }
 0x119   : > { %v1936_v48 = vadd.f32 %v1935_v28, %v1847_v27  ;;  %v1761_v49 = vadd.f32 %v1760_v41, %v4157_v43  ;;  %v3118_v27 = vor.u32 %v3648_v57, %v3117_v15  ;;  %v3734_v41 = vld [vmem:[%s4772_s1 + $0x1c0] sm:$0xff] }
 0x11a   : > { %v2027_v52 = vpop.f32.mrf.mxu0  ;;  %2277 = vmatpush.bf16.msra.mxu3 %v3734_v41 }
 0x11b   : > { %1799 = vmatmul.bf16.gmra.mxu1 %v3070_v34  ;;  %1888 = vmatmul.bf16.gmra.mxu2 %v3074_v35  ;;  %v4244_v61 = vadd.f32 %v2024_v11, %v1936_v48  ;;  %v3647_v11 = vld [vmem:[%s3850_s5 + $0x388] sm:$0xf0]  ;;  %v3726_v35 = vld [vmem:[%s4772_s1 + $0x180] sm:$0xff] }
 0x11c   : > { %1977 = vmatmul.bf16.gmra.mxu3 %v3078_v42  ;;  %v3110_v19 = vor.u32 %v3647_v11, %v3109_v9  ;;  %2188 = vmatpush.bf16.msra.mxu2 %v3726_v35  ;;  %v3147_v11 = vld [vmem:[%s3850_s5 + $0x3d4] sm:$0xf0] }
 0x11d   : > { %2066 = vmatmul.bf16.gmra.mxu0 %v3082_v40 }
 0x11e   : > { %v1849_v53 = vpop.f32.mrf.mxu2 }
 0x11f   : > { %v1850_v55 = vadd.f32 %v1849_v53, %v1761_v49  ;;  %v1938_v62 = vpop.f32.mrf.mxu3 }
 0x120   : > { %v1762_v63 = vpop.f32.mrf.mxu1 }
 0x121   : > { %v1939_v2 = vadd.f32 %v1938_v62, %v1850_v55  ;;  %v1763_v43 = vadd.f32 %v1762_v63, %v4165_v47  ;;  %v3718_v62 = vld [vmem:[%s4772_s1 + $0x140] sm:$0xff]  ;;  %v3651_v63 = vld [vmem:[%s3850_s5 + $0x3ac] sm:$0xf] }
 0x122   : > { %v2029_v13 = vpop.f32.mrf.mxu0  ;;  %2099 = vmatpush.bf16.msra.mxu1 %v3718_v62  ;;  %v3181_v62 = vld [vmem:[%s3850_s5 + $0x3f8] sm:$0xf] }
 0x123   : > { %v4249_v5 = vadd.f32 %v2027_v52, %v1939_v2  ;;  %v3139_v2 = vld [vmem:[%s3850_s5 + $0x3cc] sm:$0xf0] }
 0x126   : > { %v1851_v20 = vpop.f32.mrf.mxu2 }
 0x127   : > { %v1852_v21 = vadd.f32 %v1851_v20, %v1763_v43  ;;  %v1940_v23 = vpop.f32.mrf.mxu3 }
 0x128   : > { %v1765_v25 = vpop.f32.mrf.mxu1 }
 0x129   : > { %v1941_v47 = vadd.f32 %v1940_v23, %v1852_v21  ;;  %v1766_v42 = vadd.f32 %v1765_v25, %v4059_v30  ;;  %v3742_v30 = vld [vmem:[%s4772_s1 + $0x200] sm:$0xff]  ;;  %v3142_v21 = vor.u32 %v3651_v63, %v3139_v2  ;;  %v3154_v25 = vor.u32 %v3657_v14, %v3153_v12 }
 0x12a   : > { %v2032_v28 = vpop.f32.mrf.mxu0  ;;  %2366 = vmatpush.bf16.msra.mxu0 %v3742_v30  ;;  %v3661_v30 = vld [vmem:[%s3850_s5 + $0x3fc] sm:$0xf]  ;;  %v3183_v2 = vld [vmem:[%s3850_s5 + $0x41c] sm:$0xf0] }
 0x12b   : > { %1804 = vmatmul.bf16.gmra.mxu1 %v3106_v24  ;;  %1893 = vmatmul.bf16.gmra.mxu2 %v3110_v19  ;;  %v4257_v34 = vadd.f32 %v2029_v13, %v1941_v47  ;;  %v3145_v13 = vld [vmem:[%s3850_s5 + $0x3b0] sm:$0xf]  ;;  %v3150_v19 = vor.u32 %v3652_v4, %v3147_v11 }
 0x12c   : > { %1982 = vmatmul.bf16.gmra.mxu3 %v3114_v26  ;;  %v3146_v23 = vor.u32 %v3656_v3, %v3145_v13  ;;  %v3189_v13 = vld [vmem:[%s3850_s5 + $0x400] sm:$0xf]  ;;  %v3666_v3 = vld [vmem:[%s3850_s5 + $0x420] sm:$0xf0] }
 0x12d   : > { %2071 = vmatmul.bf16.gmra.mxu0 %v3118_v27 }
 0x12e   : > { %v1854_v40 = vpop.f32.mrf.mxu2 }
 0x12f   : > { %v1855_v48 = vadd.f32 %v1854_v40, %v1766_v42  ;;  %v1943_v49 = vpop.f32.mrf.mxu3 }
 0x130   : > { %v1767_v52 = vpop.f32.mrf.mxu1 }
 0x131   : > { %v1944_v53 = vadd.f32 %v1943_v49, %v1855_v48  ;;  %v1768_v9 = vadd.f32 %v1767_v52, %v4076_v39  ;;  %v3660_v49 = vld [vmem:[%s3850_s5 + $0x3f4] sm:$0xf]  ;;  %v3175_v52 = vld [vmem:[%s3850_s5 + $0x414] sm:$0xf0] }
 0x132   : > { %v2034_v55 = vpop.f32.mrf.mxu0  ;;  %v3178_v11 = vor.u32 %v3660_v49, %v3175_v52  ;;  %v3219_v52 = vld [vmem:[%s3850_s5 + $0x464] sm:$0xf0] }
 0x133   : > { %v4274_v43 = vadd.f32 %v2032_v28, %v1944_v53 }
 0x136   : > { %v1856_v15 = vpop.f32.mrf.mxu2 }
 0x137   : > { %v1857_v57 = vadd.f32 %v1856_v15, %v1768_v9  ;;  %v1945_v20 = vpop.f32.mrf.mxu3  ;;  %v3186_v15 = vor.u32 %v3661_v30, %v3183_v2 }
 0x138   : > { %v1770_v24 = vpop.f32.mrf.mxu1 }
 0x139   : > { %v1946_v26 = vadd.f32 %v1945_v20, %v1857_v57  ;;  %v1771_v47 = vadd.f32 %v1770_v24, %v4095_v54  ;;  %v3190_v57 = vor.u32 %v3666_v3, %v3189_v13 }
 0x13a   : > { %v2037_v27 = vpop.f32.mrf.mxu0 }
 0x13b   : > { %1809 = vmatmul.bf16.gmra.mxu1 %v3142_v21  ;;  %1898 = vmatmul.bf16.gmra.mxu2 %v3146_v23  ;;  %v4283_v39 = vadd.f32 %v2034_v55, %v1946_v26  ;;  %v3665_v55 = vld [vmem:[%s3850_s5 + $0x418] sm:$0xf0] }
 0x13c   : > { %1987 = vmatmul.bf16.gmra.mxu3 %v3150_v19  ;;  %v3182_v12 = vor.u32 %v3665_v55, %v3181_v62  ;;  %v3225_v62 = vld [vmem:[%s3850_s5 + $0x448] sm:$0xf]  ;;  %v3675_v55 = vld [vmem:[%s3850_s5 + $0x468] sm:$0xf0] }
 0x13d   : > { %2076 = vmatmul.bf16.gmra.mxu0 %v3154_v25 }
 0x13e   : > { %v1859_v28 = vpop.f32.mrf.mxu2 }
 0x13f   : > { %v1860_v35 = vadd.f32 %v1859_v28, %v1771_v47  ;;  %v1948_v41 = vpop.f32.mrf.mxu3  ;;  %v3669_v28 = vld [vmem:[%s3850_s5 + $0x43c] sm:$0xf] }
 0x140   : > { %v1772_v42 = vpop.f32.mrf.mxu1 }
 0x141   : > { %v1949_v40 = vadd.f32 %v1948_v41, %v1860_v35  ;;  %v1773_v63 = vadd.f32 %v1772_v42, %v4103_v60  ;;  %v3211_v35 = vld [vmem:[%s3850_s5 + $0x45c] sm:$0xf0] }
 0x142   : > { %v2039_v48 = vpop.f32.mrf.mxu0  ;;  %v3217_v42 = vld [vmem:[%s3850_s5 + $0x440] sm:$0xf]  ;;  %v3214_v2 = vor.u32 %v3669_v28, %v3211_v35 }
 0x143   : > { %v4288_v53 = vadd.f32 %v2037_v27, %v1949_v40  ;;  %v3674_v40 = vld [vmem:[%s3850_s5 + $0x460] sm:$0xf0]  ;;  %v2695_v35 = vld [vmem:[%s3850_s5 + $0x3c] sm:$0xf0] }
 0x144   : > { %v3218_v13 = vor.u32 %v3674_v40, %v3217_v42  ;;  %v2701_v42 = vld [vmem:[%s3850_s5 + $0x20] sm:$0xf]  ;;  %v3542_v40 = vld [vmem:[%s3850_s5 + $0x40] sm:$0xf0] }
 0x146   : > { %v1861_v54 = vpop.f32.mrf.mxu2 }
 0x147   : > { %v1862_v4 = vadd.f32 %v1861_v54, %v1773_v63  ;;  %v1950_v9 = vpop.f32.mrf.mxu3 }
 0x148   : > { %v1775_v14 = vpop.f32.mrf.mxu1 }
 0x149   : > { %v1951_v20 = vadd.f32 %v1950_v9, %v1862_v4  ;;  %v1776_v23 = vadd.f32 %v1775_v14, %v4119_v10  ;;  %v3226_v4 = vor.u32 %v3675_v55, %v3225_v62 }
 0x14a   : > { %v2042_v21 = vpop.f32.mrf.mxu0 }
 0x14b   : > { %1814 = vmatmul.bf16.gmra.mxu1 %v3178_v11  ;;  %1903 = vmatmul.bf16.gmra.mxu2 %v3182_v12  ;;  %v4297_v60 = vadd.f32 %v2039_v48, %v1951_v20  ;;  %v3670_v48 = vld [vmem:[%s3850_s5 + $0x444] sm:$0xf] }
 0x14c   : > { %1992 = vmatmul.bf16.gmra.mxu3 %v3186_v15  ;;  %v3222_v54 = vor.u32 %v3670_v48, %v3219_v52 }
 0x14d   : > { %2081 = vmatmul.bf16.gmra.mxu0 %v3190_v57 }
 0x14e   : > { %v1864_v24 = vpop.f32.mrf.mxu2 }
 0x14f   : > { %v1865_v19 = vadd.f32 %v1864_v24, %v1776_v23  ;;  %v1953_v25 = vpop.f32.mrf.mxu3  ;;  %v3536_v24 = vld [vmem:[%s3850_s5 + $0x14] sm:$0xf] }
 0x150   : > { %v1777_v26 = vpop.f32.mrf.mxu1 }
 0x151   : > { %v1954_v27 = vadd.f32 %v1953_v25, %v1865_v19  ;;  %v1778_v49 = vadd.f32 %v1777_v26, %v4133_v18  ;;  %v2687_v19 = vld [vmem:[%s3850_s5 + $0x34] sm:$0xf0] }
 0x152   : > { %v2044_v47 = vpop.f32.mrf.mxu0  ;;  %v2693_v26 = vld [vmem:[%s3850_s5 + $0x18] sm:$0xf]  ;;  %v2690_v52 = vor.u32 %v3536_v24, %v2687_v19  ;;  %v2731_v19 = vld [vmem:[%s3850_s5 + $0x84] sm:$0xf0] }
 0x153   : > { %v4302_v41 = vadd.f32 %v2042_v21, %v1954_v27  ;;  %v3541_v27 = vld [vmem:[%s3850_s5 + $0x38] sm:$0xf0] }
 0x154   : > { %v2694_v62 = vor.u32 %v3541_v27, %v2693_v26  ;;  %v2737_v26 = vld [vmem:[%s3850_s5 + $0x68] sm:$0xf]  ;;  %v3551_v27 = vld [vmem:[%s3850_s5 + $0x88] sm:$0xf0] }
 0x156   : > { %v1866_v10 = vpop.f32.mrf.mxu2 }
 0x157   : > { %v1867_v30 = vadd.f32 %v1866_v10, %v1778_v49  ;;  %v1955_v63 = vpop.f32.mrf.mxu3 }
 0x158   : > { %v1780_v3 = vpop.f32.mrf.mxu1 }
 0x159   : > { %v1956_v9 = vadd.f32 %v1955_v63, %v1867_v30  ;;  %v1781_v12 = vadd.f32 %v1780_v3, %v4155_v38  ;;  %v2702_v30 = vor.u32 %v3542_v40, %v2701_v42 }
 0x15a   : > { %v2047_v11 = vpop.f32.mrf.mxu0 }
 0x15b   : > { %1819 = vmatmul.bf16.gmra.mxu1 %v3214_v2  ;;  %1908 = vmatmul.bf16.gmra.mxu2 %v3218_v13  ;;  %v4311_v18 = vadd.f32 %v2044_v47, %v1956_v9  ;;  %v3537_v47 = vld [vmem:[%s3850_s5 + $0x1c] sm:$0xf] }
 0x15c   : > { %1997 = vmatmul.bf16.gmra.mxu3 %v3222_v54  ;;  %v2698_v10 = vor.u32 %v3537_v47, %v2695_v35 }
 0x15d   : > { %2086 = vmatmul.bf16.gmra.mxu0 %v3226_v4 }
 0x15e   : > { %v1869_v14 = vpop.f32.mrf.mxu2 }
 0x15f   : > { %v1870_v15 = vadd.f32 %v1869_v14, %v1781_v12  ;;  %v1958_v57 = vpop.f32.mrf.mxu3  ;;  %v3545_v14 = vld [vmem:[%s3850_s5 + $0x5c] sm:$0xf] }
 0x160   : > { %v1782_v20 = vpop.f32.mrf.mxu1 }
 0x161   : > { %v1959_v21 = vadd.f32 %v1958_v57, %v1870_v15  ;;  %v1783_v28 = vadd.f32 %v1782_v20, %v4163_v46  ;;  %v2723_v15 = vld [vmem:[%s3850_s5 + $0x7c] sm:$0xf0] }
 0x162   : > { %v2049_v23 = vpop.f32.mrf.mxu0  ;;  %v2729_v20 = vld [vmem:[%s3850_s5 + $0x60] sm:$0xf]  ;;  %v2726_v35 = vor.u32 %v3545_v14, %v2723_v15  ;;  %v2767_v15 = vld [vmem:[%s3850_s5 + $0xcc] sm:$0xf0] }
 0x163   : > { %v4316_v25 = vadd.f32 %v2047_v11, %v1959_v21  ;;  %v3550_v21 = vld [vmem:[%s3850_s5 + $0x80] sm:$0xf0] }
 0x164   : > { %v2730_v42 = vor.u32 %v3550_v21, %v2729_v20  ;;  %v2773_v20 = vld [vmem:[%s3850_s5 + $0xb0] sm:$0xf]  ;;  %v3560_v21 = vld [vmem:[%s3850_s5 + $0xd0] sm:$0xf0] }
 0x166   : > { %v1871_v38 = vpop.f32.mrf.mxu2 }
 0x167   : > { %v1872_v48 = vadd.f32 %v1871_v38, %v1783_v28  ;;  %v1960_v49 = vpop.f32.mrf.mxu3 }
 0x168   : > { %v1785_v55 = vpop.f32.mrf.mxu1 }
 0x169   : > { %v1961_v63 = vadd.f32 %v1960_v49, %v1872_v48  ;;  %v1786_v13 = vadd.f32 %v1785_v55, %v4069_v36  ;;  %v2738_v48 = vor.u32 %v3551_v27, %v2737_v26 }
 0x16a   : > { %v2052_v2 = vpop.f32.mrf.mxu0 }
 0x16b   : > { %2100 = vmatmul.bf16.vlgmr.msra.gmra.mxu1 %v2690_v52  ;;  %2189 = vmatmul.bf16.vlgmr.msra.gmra.mxu2 %v2694_v62  ;;  %v4325_v46 = vadd.f32 %v2049_v23, %v1961_v63  ;;  %v3546_v23 = vld [vmem:[%s3850_s5 + $0x64] sm:$0xf] }
 0x16c   : > { %2278 = vmatmul.bf16.vlgmr.msra.gmra.mxu3 %v2698_v10  ;;  %v2734_v38 = vor.u32 %v3546_v23, %v2731_v19 }
 0x16d   : > { %2367 = vmatmul.bf16.vlgmr.msra.gmra.mxu0 %v2702_v30 }
 0x16e   : > { %v1874_v3 = vpop.f32.mrf.mxu2 }
 0x16f   : > { %v1875_v54 = vadd.f32 %v1874_v3, %v1786_v13  ;;  %v1963_v4 = vpop.f32.mrf.mxu3  ;;  %v3554_v3 = vld [vmem:[%s3850_s5 + $0xa4] sm:$0xf] }
 0x170   : > { %v1787_v9 = vpop.f32.mrf.mxu1 }
 0x171   : > { %v1964_v11 = vadd.f32 %v1963_v4, %v1875_v54  ;;  %v1788_v24 = vadd.f32 %v1787_v9, %v4091_v50  ;;  %v2759_v54 = vld [vmem:[%s3850_s5 + $0xc4] sm:$0xf0] }
 0x172   : > { %v2054_v12 = vpop.f32.mrf.mxu0  ;;  %v2765_v9 = vld [vmem:[%s3850_s5 + $0xa8] sm:$0xf]  ;;  %v2762_v19 = vor.u32 %v3554_v3, %v2759_v54  ;;  %v2803_v54 = vld [vmem:[%s3850_s5 + $0x114] sm:$0xf0] }
 0x173   : > { %v4330_v57 = vadd.f32 %v2052_v2, %v1964_v11  ;;  %v3559_v11 = vld [vmem:[%s3850_s5 + $0xc8] sm:$0xf0] }
 0x174   : > { %v2766_v26 = vor.u32 %v3559_v11, %v2765_v9  ;;  %v2809_v9 = vld [vmem:[%s3850_s5 + $0xf8] sm:$0xf]  ;;  %v3569_v11 = vld [vmem:[%s3850_s5 + $0x118] sm:$0xf0] }
 0x176   : > { %v1876_v36 = vpop.f32.mrf.mxu2 }
 0x177   : > { %v1877_v47 = vadd.f32 %v1876_v36, %v1788_v24  ;;  %v1965_v28 = vpop.f32.mrf.mxu3 }
 0x178   : > { %v1790_v40 = vpop.f32.mrf.mxu1 }
 0x179   : > { %v1966_v49 = vadd.f32 %v1965_v28, %v1877_v47  ;;  %v1791_v62 = vadd.f32 %v1790_v40, %v4099_v58  ;;  %v2774_v47 = vor.u32 %v3560_v21, %v2773_v20 }
 0x17a   : > { %v2057_v52 = vpop.f32.mrf.mxu0 }
 0x17b   : > { %2105 = vmatmul.bf16.gmra.mxu1 %v2726_v35  ;;  %2194 = vmatmul.bf16.gmra.mxu2 %v2730_v42  ;;  %v4339_v50 = vadd.f32 %v2054_v12, %v1966_v49  ;;  %v3555_v12 = vld [vmem:[%s3850_s5 + $0xac] sm:$0xf] }
 0x17c   : > { %2283 = vmatmul.bf16.gmra.mxu3 %v2734_v38  ;;  %v2770_v36 = vor.u32 %v3555_v12, %v2767_v15 }
 0x17d   : > { %2372 = vmatmul.bf16.gmra.mxu0 %v2738_v48 }
 0x17e   : > { %v1879_v55 = vpop.f32.mrf.mxu2 }
 0x17f   : > { %v1880_v10 = vadd.f32 %v1879_v55, %v1791_v62  ;;  %v1968_v30 = vpop.f32.mrf.mxu3  ;;  %v3563_v55 = vld [vmem:[%s3850_s5 + $0xec] sm:$0xf] }
 0x180   : > { %v1792_v63 = vpop.f32.mrf.mxu1 }
 0x181   : > { %v1969_v2 = vadd.f32 %v1968_v30, %v1880_v10  ;;  %v1793_v14 = vadd.f32 %v1792_v63, %v4115_v6  ;;  %v2795_v10 = vld [vmem:[%s3850_s5 + $0x10c] sm:$0xf0] }
 0x182   : > { %v2059_v13 = vpop.f32.mrf.mxu0  ;;  %v2801_v63 = vld [vmem:[%s3850_s5 + $0xf0] sm:$0xf]  ;;  %v2798_v15 = vor.u32 %v3563_v55, %v2795_v10  ;;  %v2839_v10 = vld [vmem:[%s3850_s5 + $0x15c] sm:$0xf0] }
 0x183   : > { %v4344_v4 = vadd.f32 %v2057_v52, %v1969_v2  ;;  %v3568_v2 = vld [vmem:[%s3850_s5 + $0x110] sm:$0xf0] }
 0x184   : > { %v2802_v20 = vor.u32 %v3568_v2, %v2801_v63  ;;  %v2845_v63 = vld [vmem:[%s3850_s5 + $0x140] sm:$0xf]  ;;  %v3578_v2 = vld [vmem:[%s3850_s5 + $0x160] sm:$0xf0] }
 0x186   : > { %v1881_v58 = vpop.f32.mrf.mxu2 }
 0x187   : > { %v1882_v23 = vadd.f32 %v1881_v58, %v1793_v14  ;;  %v1970_v24 = vpop.f32.mrf.mxu3 }
 0x188   : > { %v1795_v27 = vpop.f32.mrf.mxu1 }
 0x189   : > { %v1971_v28 = vadd.f32 %v1970_v24, %v1882_v23  ;;  %v1796_v42 = vadd.f32 %v1795_v27, %v4129_v16  ;;  %v2810_v23 = vor.u32 %v3569_v11, %v2809_v9 }
 0x18a   : > { %v2062_v35 = vpop.f32.mrf.mxu0 }
 0x18b   : > { %2110 = vmatmul.bf16.gmra.mxu1 %v2762_v19  ;;  %2199 = vmatmul.bf16.gmra.mxu2 %v2766_v26  ;;  %v4353_v6 = vadd.f32 %v2059_v13, %v1971_v28  ;;  %v3564_v13 = vld [vmem:[%s3850_s5 + $0xf4] sm:$0xf] }
 0x18c   : > { %2288 = vmatmul.bf16.gmra.mxu3 %v2770_v36  ;;  %v2806_v58 = vor.u32 %v3564_v13, %v2803_v54 }
 0x18d   : > { %2377 = vmatmul.bf16.gmra.mxu0 %v2774_v47 }
 0x18e   : > { %v1884_v40 = vpop.f32.mrf.mxu2 }
 0x18f   : > { %v1885_v38 = vadd.f32 %v1884_v40, %v1796_v42  ;;  %v1973_v48 = vpop.f32.mrf.mxu3  ;;  %v3572_v40 = vld [vmem:[%s3850_s5 + $0x134] sm:$0xf] }
 0x190   : > { %v1797_v49 = vpop.f32.mrf.mxu1 }
 0x191   : > { %v1974_v52 = vadd.f32 %v1973_v48, %v1885_v38  ;;  %v1798_v3 = vadd.f32 %v1797_v49, %v4151_v31  ;;  %v2831_v38 = vld [vmem:[%s3850_s5 + $0x154] sm:$0xf0] }
 0x192   : > { %v2064_v62 = vpop.f32.mrf.mxu0  ;;  %v2837_v49 = vld [vmem:[%s3850_s5 + $0x138] sm:$0xf]  ;;  %v2834_v54 = vor.u32 %v3572_v40, %v2831_v38  ;;  %v2875_v38 = vld [vmem:[%s3850_s5 + $0x1a4] sm:$0xf0] }
 0x193   : > { %v4358_v30 = vadd.f32 %v2062_v35, %v1974_v52  ;;  %v3577_v52 = vld [vmem:[%s3850_s5 + $0x158] sm:$0xf0] }
 0x194   : > { %v2838_v9 = vor.u32 %v3577_v52, %v2837_v49  ;;  %v2881_v49 = vld [vmem:[%s3850_s5 + $0x188] sm:$0xf]  ;;  %v3587_v52 = vld [vmem:[%s3850_s5 + $0x1a8] sm:$0xf0] }
 0x196   : > { %v1886_v16 = vpop.f32.mrf.mxu2 }
 0x197   : > { %v1887_v12 = vadd.f32 %v1886_v16, %v1798_v3  ;;  %v1975_v14 = vpop.f32.mrf.mxu3 }
 0x198   : > { %v1800_v21 = vpop.f32.mrf.mxu1 }
 0x199   : > { %v1976_v24 = vadd.f32 %v1975_v14, %v1887_v12  ;;  %v1801_v26 = vadd.f32 %v1800_v21, %v4159_v44  ;;  %v2846_v12 = vor.u32 %v3578_v2, %v2845_v63 }
 0x19a   : > { %v2067_v19 = vpop.f32.mrf.mxu0 }
 0x19b   : > { %2115 = vmatmul.bf16.gmra.mxu1 %v2798_v15  ;;  %2204 = vmatmul.bf16.gmra.mxu2 %v2802_v20  ;;  %v4367_v31 = vadd.f32 %v2064_v62, %v1976_v24  ;;  %v3573_v62 = vld [vmem:[%s3850_s5 + $0x13c] sm:$0xf] }
 0x19c   : > { %2293 = vmatmul.bf16.gmra.mxu3 %v2806_v58  ;;  %v2842_v16 = vor.u32 %v3573_v62, %v2839_v10 }
 0x19d   : > { %2382 = vmatmul.bf16.gmra.mxu0 %v2810_v23 }
 0x19e   : > { %v1889_v27 = vpop.f32.mrf.mxu2 }
 0x19f   : > { %v1890_v36 = vadd.f32 %v1889_v27, %v1801_v26  ;;  %v1978_v47 = vpop.f32.mrf.mxu3  ;;  %v3581_v27 = vld [vmem:[%s3850_s5 + $0x17c] sm:$0xf] }
 0x1a0   : > { %v1802_v28 = vpop.f32.mrf.mxu1 }
 0x1a1   : > { %v1979_v35 = vadd.f32 %v1978_v47, %v1890_v36  ;;  %v1803_v55 = vadd.f32 %v1802_v28, %v4175_v0  ;;  %v2867_v36 = vld [vmem:[%s3850_s5 + $0x19c] sm:$0xf0] }
 0x1a2   : > { %v2069_v42 = vpop.f32.mrf.mxu0  ;;  %v2873_v28 = vld [vmem:[%s3850_s5 + $0x180] sm:$0xf]  ;;  %v2870_v10 = vor.u32 %v3581_v27, %v2867_v36  ;;  %v2911_v36 = vld [vmem:[%s3850_s5 + $0x1ec] sm:$0xf0] }
 0x1a3   : > { %v4372_v48 = vadd.f32 %v2067_v19, %v1979_v35  ;;  %v3586_v35 = vld [vmem:[%s3850_s5 + $0x1a0] sm:$0xf0] }
 0x1a4   : > { %v2874_v63 = vor.u32 %v3586_v35, %v2873_v28  ;;  %v2917_v28 = vld [vmem:[%s3850_s5 + $0x1d0] sm:$0xf]  ;;  %v3596_v35 = vld [vmem:[%s3850_s5 + $0x1f0] sm:$0xf0] }
 0x1a6   : > { %v1891_v44 = vpop.f32.mrf.mxu2 }
 0x1a7   : > { %v1892_v13 = vadd.f32 %v1891_v44, %v1803_v55  ;;  %v1980_v3 = vpop.f32.mrf.mxu3 }
 0x1a8   : > { %v1805_v11 = vpop.f32.mrf.mxu1 }
 0x1a9   : > { %v1981_v14 = vadd.f32 %v1980_v3, %v1892_v13  ;;  %v1806_v20 = vadd.f32 %v1805_v11, %v4071_v37  ;;  %v2882_v13 = vor.u32 %v3587_v52, %v2881_v49 }
 0x1aa   : > { %v2072_v15 = vpop.f32.mrf.mxu0 }
 0x1ab   : > { %2120 = vmatmul.bf16.gmra.mxu1 %v2834_v54  ;;  %2209 = vmatmul.bf16.gmra.mxu2 %v2838_v9  ;;  %v4381_v0 = vadd.f32 %v2069_v42, %v1981_v14  ;;  %v3582_v42 = vld [vmem:[%s3850_s5 + $0x184] sm:$0xf] }
 0x1ac   : > { %2298 = vmatmul.bf16.gmra.mxu3 %v2842_v16  ;;  %v2878_v44 = vor.u32 %v3582_v42, %v2875_v38 }
 0x1ad   : > { %2387 = vmatmul.bf16.gmra.mxu0 %v2846_v12 }
 0x1ae   : > { %v1894_v21 = vpop.f32.mrf.mxu2 }
 0x1af   : > { %v1895_v58 = vadd.f32 %v1894_v21, %v1806_v20  ;;  %v1983_v23 = vpop.f32.mrf.mxu3  ;;  %v3590_v21 = vld [vmem:[%s3850_s5 + $0x1c4] sm:$0xf] }
 0x1b0   : > { %v1807_v24 = vpop.f32.mrf.mxu1 }
 0x1b1   : > { %v1984_v19 = vadd.f32 %v1983_v23, %v1895_v58  ;;  %v1808_v40 = vadd.f32 %v1807_v24, %v4093_v51  ;;  %v2903_v58 = vld [vmem:[%s3850_s5 + $0x1e4] sm:$0xf0] }
 0x1b2   : > { %v2074_v26 = vpop.f32.mrf.mxu0  ;;  %v2909_v24 = vld [vmem:[%s3850_s5 + $0x1c8] sm:$0xf]  ;;  %v2906_v38 = vor.u32 %v3590_v21, %v2903_v58  ;;  %v2947_v58 = vld [vmem:[%s3850_s5 + $0x234] sm:$0xf0] }
 0x1b3   : > { %v4386_v47 = vadd.f32 %v2072_v15, %v1984_v19  ;;  %v3595_v19 = vld [vmem:[%s3850_s5 + $0x1e8] sm:$0xf0] }
 0x1b4   : > { %v2910_v49 = vor.u32 %v3595_v19, %v2909_v24  ;;  %v2953_v24 = vld [vmem:[%s3850_s5 + $0x218] sm:$0xf]  ;;  %v3605_v19 = vld [vmem:[%s3850_s5 + $0x238] sm:$0xf0] }
 0x1b6   : > { %v1896_v37 = vpop.f32.mrf.mxu2 }
 0x1b7   : > { %v1897_v62 = vadd.f32 %v1896_v37, %v1808_v40  ;;  %v1985_v55 = vpop.f32.mrf.mxu3 }
 0x1b8   : > { %v1810_v2 = vpop.f32.mrf.mxu1 }
 0x1b9   : > { %v1986_v3 = vadd.f32 %v1985_v55, %v1897_v62  ;;  %v1811_v9 = vadd.f32 %v1810_v2, %v4101_v59  ;;  %v2918_v62 = vor.u32 %v3596_v35, %v2917_v28 }
 0x1ba   : > { %v2077_v54 = vpop.f32.mrf.mxu0 }
 0x1bb   : > { %2125 = vmatmul.bf16.gmra.mxu1 %v2870_v10  ;;  %2214 = vmatmul.bf16.gmra.mxu2 %v2874_v63  ;;  %v4395_v51 = vadd.f32 %v2074_v26, %v1986_v3  ;;  %v3591_v26 = vld [vmem:[%s3850_s5 + $0x1cc] sm:$0xf] }
 0x1bc   : > { %2303 = vmatmul.bf16.gmra.mxu3 %v2878_v44  ;;  %v2914_v37 = vor.u32 %v3591_v26, %v2911_v36 }
 0x1bd   : > { %2392 = vmatmul.bf16.gmra.mxu0 %v2882_v13 }
 0x1be   : > { %v1899_v11 = vpop.f32.mrf.mxu2 }
 0x1bf   : > { %v1900_v16 = vadd.f32 %v1899_v11, %v1811_v9  ;;  %v1988_v12 = vpop.f32.mrf.mxu3  ;;  %v3599_v11 = vld [vmem:[%s3850_s5 + $0x20c] sm:$0xf] }
 0x1c0   : > { %v1812_v14 = vpop.f32.mrf.mxu1 }
 0x1c1   : > { %v1989_v15 = vadd.f32 %v1988_v12, %v1900_v16  ;;  %v1813_v27 = vadd.f32 %v1812_v14, %v4117_v7  ;;  %v2939_v16 = vld [vmem:[%s3850_s5 + $0x22c] sm:$0xf0] }
 0x1c2   : > { %v2079_v20 = vpop.f32.mrf.mxu0  ;;  %v2945_v14 = vld [vmem:[%s3850_s5 + $0x210] sm:$0xf]  ;;  %v2942_v36 = vor.u32 %v3599_v11, %v2939_v16  ;;  %v2983_v16 = vld [vmem:[%s3850_s5 + $0x27c] sm:$0xf0] }
 0x1c3   : > { %v4400_v23 = vadd.f32 %v2077_v54, %v1989_v15  ;;  %v3604_v15 = vld [vmem:[%s3850_s5 + $0x230] sm:$0xf0] }
 0x1c4   : > { %v2946_v28 = vor.u32 %v3604_v15, %v2945_v14  ;;  %v2989_v14 = vld [vmem:[%s3850_s5 + $0x260] sm:$0xf]  ;;  %v3614_v15 = vld [vmem:[%s3850_s5 + $0x280] sm:$0xf0] }
 0x1c6   : > { %v1901_v59 = vpop.f32.mrf.mxu2 }
 0x1c7   : > { %v1902_v42 = vadd.f32 %v1901_v59, %v1813_v27  ;;  %v1990_v40 = vpop.f32.mrf.mxu3 }
 0x1c8   : > { %v1815_v52 = vpop.f32.mrf.mxu1 }
 0x1c9   : > { %v1991_v55 = vadd.f32 %v1990_v40, %v1902_v42  ;;  %v1816_v63 = vadd.f32 %v1815_v52, %v4131_v17  ;;  %v2954_v42 = vor.u32 %v3605_v19, %v2953_v24 }
 0x1ca   : > { %v2082_v10 = vpop.f32.mrf.mxu0 }
 0x1cb   : > { %2130 = vmatmul.bf16.gmra.mxu1 %v2906_v38  ;;  %2219 = vmatmul.bf16.gmra.mxu2 %v2910_v49  ;;  %v4409_v7 = vadd.f32 %v2079_v20, %v1991_v55  ;;  %v3600_v20 = vld [vmem:[%s3850_s5 + $0x214] sm:$0xf] }
 0x1cc   : > { %2308 = vmatmul.bf16.gmra.mxu3 %v2914_v37  ;;  %v2950_v59 = vor.u32 %v3600_v20, %v2947_v58 }
 0x1cd   : > { %2397 = vmatmul.bf16.gmra.mxu0 %v2918_v62 }
 0x1ce   : > { %v1904_v2 = vpop.f32.mrf.mxu2 }
 0x1cf   : > { %v1905_v44 = vadd.f32 %v1904_v2, %v1816_v63  ;;  %v1993_v13 = vpop.f32.mrf.mxu3  ;;  %v3608_v2 = vld [vmem:[%s3850_s5 + $0x254] sm:$0xf] }
 0x1d0   : > { %v1817_v3 = vpop.f32.mrf.mxu1 }
 0x1d1   : > { %v1994_v54 = vadd.f32 %v1993_v13, %v1905_v44  ;;  %v1818_v21 = vadd.f32 %v1817_v3, %v4153_v32  ;;  %v2975_v44 = vld [vmem:[%s3850_s5 + $0x274] sm:$0xf0] }
 0x1d2   : > { %v2084_v9 = vpop.f32.mrf.mxu0  ;;  %v2981_v3 = vld [vmem:[%s3850_s5 + $0x258] sm:$0xf]  ;;  %v2978_v58 = vor.u32 %v3608_v2, %v2975_v44  ;;  %v3019_v2 = vld [vmem:[%s3850_s5 + $0x2c4] sm:$0xf0] }
 0x1d3   : > { %v4414_v12 = vadd.f32 %v2082_v10, %v1994_v54  ;;  %v3613_v54 = vld [vmem:[%s3850_s5 + $0x278] sm:$0xf0]  ;;  %v3025_v44 = vld [vmem:[%s3850_s5 + $0x2a8] sm:$0xf] }
 0x1d4   : > { %v2982_v24 = vor.u32 %v3613_v54, %v2981_v3  ;;  %v3623_v3 = vld [vmem:[%s3850_s5 + $0x2c8] sm:$0xf0] }
 0x1d6   : > { %v1906_v17 = vpop.f32.mrf.mxu2 }
 0x1d7   : > { %v1907_v26 = vadd.f32 %v1906_v17, %v1818_v21  ;;  %v1995_v27 = vpop.f32.mrf.mxu3 }
 0x1d8   : > { %v1820_v35 = vpop.f32.mrf.mxu1 }
 0x1d9   : > { %v1996_v40 = vadd.f32 %v1995_v27, %v1907_v26  ;;  %v1821_v49 = vadd.f32 %v1820_v35, %v4161_v45  ;;  %v2990_v26 = vor.u32 %v3614_v15, %v2989_v14 }
 0x1da   : > { %v2087_v38 = vpop.f32.mrf.mxu0 }
 0x1db   : > { %2135 = vmatmul.bf16.gmra.mxu1 %v2942_v36  ;;  %2224 = vmatmul.bf16.gmra.mxu2 %v2946_v28  ;;  %v4423_v32 = vadd.f32 %v2084_v9, %v1996_v40  ;;  %v3609_v9 = vld [vmem:[%s3850_s5 + $0x25c] sm:$0xf] }
 0x1dc   : > { %2313 = vmatmul.bf16.gmra.mxu3 %v2950_v59  ;;  %v2986_v17 = vor.u32 %v3609_v9, %v2983_v16 }
 0x1dd   : > { %2402 = vmatmul.bf16.gmra.mxu0 %v2954_v42 }
 0x1de   : > { %v1909_v52 = vpop.f32.mrf.mxu2 }
 0x1df   : > { %v1910_v37 = vadd.f32 %v1909_v52, %v1821_v49  ;;  %v1998_v62 = vpop.f32.mrf.mxu3 }
 0x1e0   : > { %v1822_v55 = vpop.f32.mrf.mxu1 }
 0x1e1   : > { %v1999_v10 = vadd.f32 %v1998_v62, %v1910_v37  ;;  %v1823_v11 = vadd.f32 %v1822_v55, %v4177_v1  ;;  %v3617_v37 = vld [vmem:[%s3850_s5 + $0x29c] sm:$0xf]  ;;  %v3017_v62 = vld [vmem:[%s3850_s5 + $0x2a0] sm:$0xf]  ;;  %v3622_v55 = vld [vmem:[%s3850_s5 + $0x2c0] sm:$0xf0] }
 0x1e2   : > { %v2089_v63 = vpop.f32.mrf.mxu0  ;;  %v3018_v14 = vor.u32 %v3622_v55, %v3017_v62  ;;  %v3632_v62 = vld [vmem:[%s3850_s5 + $0x310] sm:$0xf0] }
 0x1e3   : > { %v4428_v13 = vadd.f32 %v2087_v38, %v1999_v10  ;;  %v3618_v10 = vld [vmem:[%s3850_s5 + $0x2a4] sm:$0xf] }
 0x1e6   : > { %v1911_v45 = vpop.f32.mrf.mxu2 }
 0x1e7   : > { %v1912_v20 = vadd.f32 %v1911_v45, %v1823_v11  ;;  %v2000_v21 = vpop.f32.mrf.mxu3  ;;  %v3022_v45 = vor.u32 %v3618_v10, %v3019_v2 }
 0x1e8   : > { %v2101_v19 = vpop.f32.mrf.mxu1 }
 0x1e9   : > { %v2001_v27 = vadd.f32 %v2000_v21, %v1912_v20  ;;  %v2102_v28 = vadd.f32 %v2101_v19, %v4195_v29  ;;  %v3011_v29 = vld [vmem:[%s3850_s5 + $0x2bc] sm:$0xf0]  ;;  %v3026_v20 = vor.u32 %v3623_v3, %v3025_v44 }
 0x1ea   : > { %v2368_v36 = vpop.f32.mrf.mxu0  ;;  %v3014_v16 = vor.u32 %v3617_v37, %v3011_v29  ;;  %v3055_v37 = vld [vmem:[%s3850_s5 + $0x30c] sm:$0xf0] }
 0x1eb   : > { %2140 = vmatmul.bf16.gmra.mxu1 %v2978_v58  ;;  %2229 = vmatmul.bf16.gmra.mxu2 %v2982_v24  ;;  %v4437_v1 = vadd.f32 %v2089_v63, %v2001_v27  ;;  %v3061_v29 = vld [vmem:[%s3850_s5 + $0x2f0] sm:$0xf] }
 0x1ec   : > { %2318 = vmatmul.bf16.gmra.mxu3 %v2986_v17 }
 0x1ed   : > { %2407 = vmatmul.bf16.gmra.mxu0 %v2990_v26 }
 0x1ee   : > { %v2190_v35 = vpop.f32.mrf.mxu2 }
 0x1ef   : > { %v2191_v59 = vadd.f32 %v2190_v35, %v2102_v28  ;;  %v2279_v42 = vpop.f32.mrf.mxu3 }
 0x1f0   : > { %v2103_v40 = vpop.f32.mrf.mxu1 }
 0x1f1   : > { %v2280_v38 = vadd.f32 %v2279_v42, %v2191_v59  ;;  %v2104_v63 = vadd.f32 %v2103_v40, %v4204_v8  ;;  %v3626_v59 = vld [vmem:[%s3850_s5 + $0x2e4] sm:$0xf]  ;;  %v3047_v42 = vld [vmem:[%s3850_s5 + $0x304] sm:$0xf0] }
 0x1f2   : > { %v2370_v49 = vpop.f32.mrf.mxu0  ;;  %v3053_v40 = vld [vmem:[%s3850_s5 + $0x2e8] sm:$0xf]  ;;  %v3050_v2 = vor.u32 %v3626_v59, %v3047_v42  ;;  %v3091_v59 = vld [vmem:[%s3850_s5 + $0x354] sm:$0xf0] }
 0x1f3   : > { %v4446_v52 = vadd.f32 %v2368_v36, %v2280_v38  ;;  %v3631_v38 = vld [vmem:[%s3850_s5 + $0x308] sm:$0xf0]  ;;  %v3097_v42 = vld [vmem:[%s3850_s5 + $0x338] sm:$0xf] }
 0x1f4   : > { %v3054_v44 = vor.u32 %v3631_v38, %v3053_v40  ;;  %v3641_v40 = vld [vmem:[%s3850_s5 + $0x358] sm:$0xf0] }
 0x1f5   : > { %2448 = vst [vmem:[%s4444_s27] sm:$0xff] %v4446_v52 }
 0x1f6   : > { %v2192_v54 = vpop.f32.mrf.mxu2 }
 0x1f7   : > { %v2193_v9 = vadd.f32 %v2192_v54, %v2104_v63  ;;  %v2281_v11 = vpop.f32.mrf.mxu3 }
 0x1f8   : > { %v2106_v15 = vpop.f32.mrf.mxu1 }
 0x1f9   : > { %v2282_v21 = vadd.f32 %v2281_v11, %v2193_v9  ;;  %v2107_v8 = vadd.f32 %v2106_v15, %v4209_v22  ;;  %v3062_v9 = vor.u32 %v3632_v62, %v3061_v29 }
 0x1fa   : > { %v2373_v58 = vpop.f32.mrf.mxu0 }
 0x1fb   : > { %v4459_v24 = vadd.f32 %v2370_v49, %v2282_v21  ;;  %2145 = vmatmul.bf16.gmra.mxu1 %v3014_v16  ;;  %2234 = vmatmul.bf16.gmra.mxu2 %v3018_v14  ;;  %v3627_v49 = vld [vmem:[%s3850_s5 + $0x2ec] sm:$0xf] }
 0x1fc   : > { %2323 = vmatmul.bf16.gmra.mxu3 %v3022_v45  ;;  %v3058_v54 = vor.u32 %v3627_v49, %v3055_v37 }
 0x1fd   : > { %2412 = vmatmul.bf16.gmra.mxu0 %v3026_v20  ;;  %2449 = vst [vmem:[%s4444_s27 + $0x8] sm:$0xff] %v4459_v24 }
 0x1fe   : > { %v2195_v19 = vpop.f32.mrf.mxu2 }
 0x1ff   : > { %v2196_v17 = vadd.f32 %v2195_v19, %v2107_v8  ;;  %v2284_v26 = vpop.f32.mrf.mxu3 }
 0x200   : > { %v2108_v27 = vpop.f32.mrf.mxu1 }
 0x201   : > { %v2285_v36 = vadd.f32 %v2284_v26, %v2196_v17  ;;  %v2109_v22 = vadd.f32 %v2108_v27, %v4218_v56  ;;  %v3635_v17 = vld [vmem:[%s3850_s5 + $0x32c] sm:$0xf]  ;;  %v3083_v26 = vld [vmem:[%s3850_s5 + $0x34c] sm:$0xf0] }
 0x202   : > { %v2375_v28 = vpop.f32.mrf.mxu0  ;;  %v3089_v27 = vld [vmem:[%s3850_s5 + $0x330] sm:$0xf] }
 0x203   : > { %v4464_v35 = vadd.f32 %v2373_v58, %v2285_v36  ;;  %v3640_v36 = vld [vmem:[%s3850_s5 + $0x350] sm:$0xf0] }
 0x204   : > { %v3090_v29 = vor.u32 %v3640_v36, %v3089_v27  ;;  %v3650_v27 = vld [vmem:[%s3850_s5 + $0x3a0] sm:$0xf0] }
 0x205   : > { %2450 = vst [vmem:[%s4444_s27 + $0x10] sm:$0xff] %v4464_v35 }
 0x206   : > { %v2197_v55 = vpop.f32.mrf.mxu2 }
 0x207   : > { %v2198_v10 = vadd.f32 %v2197_v55, %v2109_v22  ;;  %v2286_v63 = vpop.f32.mrf.mxu3  ;;  %v3086_v22 = vor.u32 %v3635_v17, %v3083_v26  ;;  %v3127_v17 = vld [vmem:[%s3850_s5 + $0x39c] sm:$0xf0] }
 0x208   : > { %v2111_v3 = vpop.f32.mrf.mxu1  ;;  %v3133_v26 = vld [vmem:[%s3850_s5 + $0x380] sm:$0xf] }
 0x209   : > { %v2287_v11 = vadd.f32 %v2286_v63, %v2198_v10  ;;  %v2112_v56 = vadd.f32 %v2111_v3, %v4235_v33  ;;  %v3098_v10 = vor.u32 %v3641_v40, %v3097_v42 }
 0x20a   : > { %v2378_v16 = vpop.f32.mrf.mxu0 }
 0x20b   : > { %v4477_v14 = vadd.f32 %v2375_v28, %v2287_v11  ;;  %2150 = vmatmul.bf16.gmra.mxu1 %v3050_v2  ;;  %2239 = vmatmul.bf16.gmra.mxu2 %v3054_v44  ;;  %v3636_v28 = vld [vmem:[%s3850_s5 + $0x334] sm:$0xf] }
 0x20c   : > { %2328 = vmatmul.bf16.gmra.mxu3 %v3058_v54  ;;  %v3094_v55 = vor.u32 %v3636_v28, %v3091_v59 }
 0x20d   : > { %2417 = vmatmul.bf16.gmra.mxu0 %v3062_v9  ;;  %2451 = vst [vmem:[%s4444_s27 + $0x18] sm:$0xff] %v4477_v14 }
 0x20e   : > { %v2200_v15 = vpop.f32.mrf.mxu2 }
 0x20f   : > { %v2201_v45 = vadd.f32 %v2200_v15, %v2112_v56  ;;  %v2289_v20 = vpop.f32.mrf.mxu3 }
 0x210   : > { %v2113_v21 = vpop.f32.mrf.mxu1 }
 0x211   : > { %v2290_v58 = vadd.f32 %v2289_v20, %v2201_v45  ;;  %v2114_v33 = vadd.f32 %v2113_v21, %v4244_v61  ;;  %v3644_v45 = vld [vmem:[%s3850_s5 + $0x374] sm:$0xf]  ;;  %v3119_v20 = vld [vmem:[%s3850_s5 + $0x394] sm:$0xf0] }
 0x212   : > { %v2380_v8 = vpop.f32.mrf.mxu0  ;;  %v3125_v21 = vld [vmem:[%s3850_s5 + $0x378] sm:$0xf] }
 0x213   : > { %v4482_v19 = vadd.f32 %v2378_v16, %v2290_v58  ;;  %v3649_v58 = vld [vmem:[%s3850_s5 + $0x398] sm:$0xf0] }
 0x214   : > { %v3126_v42 = vor.u32 %v3649_v58, %v3125_v21  ;;  %v3659_v21 = vld [vmem:[%s3850_s5 + $0x3e8] sm:$0xf0] }
 0x215   : > { %2452 = vst [vmem:[%s4444_s27 + $0x20] sm:$0xff] %v4482_v19 }
 0x216   : > { %v2202_v38 = vpop.f32.mrf.mxu2 }
 0x217   : > { %v2203_v49 = vadd.f32 %v2202_v38, %v2114_v33  ;;  %v2291_v37 = vpop.f32.mrf.mxu3  ;;  %v3122_v33 = vor.u32 %v3644_v45, %v3119_v20  ;;  %v3163_v45 = vld [vmem:[%s3850_s5 + $0x3e4] sm:$0xf0] }
 0x218   : > { %v2116_v62 = vpop.f32.mrf.mxu1  ;;  %v3169_v20 = vld [vmem:[%s3850_s5 + $0x3c8] sm:$0xf] }
 0x219   : > { %v2292_v63 = vadd.f32 %v2291_v37, %v2203_v49  ;;  %v2117_v61 = vadd.f32 %v2116_v62, %v4249_v5  ;;  %v3134_v49 = vor.u32 %v3650_v27, %v3133_v26 }
 0x21a   : > { %v2383_v2 = vpop.f32.mrf.mxu0 }
 0x21b   : > { %v4495_v44 = vadd.f32 %v2380_v8, %v2292_v63  ;;  %2155 = vmatmul.bf16.gmra.mxu1 %v3086_v22  ;;  %2244 = vmatmul.bf16.gmra.mxu2 %v3090_v29  ;;  %v3645_v8 = vld [vmem:[%s3850_s5 + $0x37c] sm:$0xf] }
 0x21c   : > { %2333 = vmatmul.bf16.gmra.mxu3 %v3094_v55  ;;  %v3130_v38 = vor.u32 %v3645_v8, %v3127_v17 }
 0x21d   : > { %2422 = vmatmul.bf16.gmra.mxu0 %v3098_v10  ;;  %2453 = vst [vmem:[%s4444_s27 + $0x28] sm:$0xff] %v4495_v44 }
 0x21e   : > { %v2205_v3 = vpop.f32.mrf.mxu2 }
 0x21f   : > { %v2206_v54 = vadd.f32 %v2205_v3, %v2117_v61  ;;  %v2294_v9 = vpop.f32.mrf.mxu3 }
 0x220   : > { %v2118_v11 = vpop.f32.mrf.mxu1 }
 0x221   : > { %v2295_v16 = vadd.f32 %v2294_v9, %v2206_v54  ;;  %v2119_v5 = vadd.f32 %v2118_v11, %v4257_v34  ;;  %v3653_v54 = vld [vmem:[%s3850_s5 + $0x3bc] sm:$0xf]  ;;  %v3155_v9 = vld [vmem:[%s3850_s5 + $0x3dc] sm:$0xf0] }
 0x222   : > { %v2385_v56 = vpop.f32.mrf.mxu0  ;;  %v3161_v11 = vld [vmem:[%s3850_s5 + $0x3c0] sm:$0xf] }
 0x223   : > { %v4500_v15 = vadd.f32 %v2383_v2, %v2295_v16  ;;  %v3658_v16 = vld [vmem:[%s3850_s5 + $0x3e0] sm:$0xf0] }
 0x224   : > { %v3162_v26 = vor.u32 %v3658_v16, %v3161_v11  ;;  %v3668_v11 = vld [vmem:[%s3850_s5 + $0x430] sm:$0xf0] }
 0x225   : > { %2454 = vst [vmem:[%s4444_s27 + $0x30] sm:$0xff] %v4500_v15 }
 0x226   : > { %v2207_v36 = vpop.f32.mrf.mxu2 }
 0x227   : > { %v2208_v28 = vadd.f32 %v2207_v36, %v2119_v5  ;;  %v2296_v59 = vpop.f32.mrf.mxu3  ;;  %v3158_v5 = vor.u32 %v3653_v54, %v3155_v9  ;;  %v3199_v54 = vld [vmem:[%s3850_s5 + $0x42c] sm:$0xf0] }
 0x228   : > { %v2121_v40 = vpop.f32.mrf.mxu1  ;;  %v3205_v9 = vld [vmem:[%s3850_s5 + $0x410] sm:$0xf] }
 0x229   : > { %v2297_v37 = vadd.f32 %v2296_v59, %v2208_v28  ;;  %v2122_v34 = vadd.f32 %v2121_v40, %v4274_v43  ;;  %v3170_v28 = vor.u32 %v3659_v21, %v3169_v20 }
 0x22a   : > { %v2388_v22 = vpop.f32.mrf.mxu0 }
 0x22b   : > { %v4513_v29 = vadd.f32 %v2385_v56, %v2297_v37  ;;  %2160 = vmatmul.bf16.gmra.mxu1 %v3122_v33  ;;  %2249 = vmatmul.bf16.gmra.mxu2 %v3126_v42  ;;  %v3654_v56 = vld [vmem:[%s3850_s5 + $0x3c4] sm:$0xf] }
 0x22c   : > { %2338 = vmatmul.bf16.gmra.mxu3 %v3130_v38  ;;  %v3166_v36 = vor.u32 %v3654_v56, %v3163_v45 }
 0x22d   : > { %2427 = vmatmul.bf16.gmra.mxu0 %v3134_v49  ;;  %2455 = vst [vmem:[%s4444_s27 + $0x38] sm:$0xff] %v4513_v29 }
 0x22e   : > { %v2210_v62 = vpop.f32.mrf.mxu2 }
 0x22f   : > { %v2211_v55 = vadd.f32 %v2210_v62, %v2122_v34  ;;  %v2299_v10 = vpop.f32.mrf.mxu3 }
 0x230   : > { %v2123_v63 = vpop.f32.mrf.mxu1 }
 0x231   : > { %v2300_v2 = vadd.f32 %v2299_v10, %v2211_v55  ;;  %v2124_v43 = vadd.f32 %v2123_v63, %v4283_v39  ;;  %v3662_v55 = vld [vmem:[%s3850_s5 + $0x404] sm:$0xf]  ;;  %v3191_v10 = vld [vmem:[%s3850_s5 + $0x424] sm:$0xf0] }
 0x232   : > { %v2390_v61 = vpop.f32.mrf.mxu0  ;;  %v3197_v63 = vld [vmem:[%s3850_s5 + $0x408] sm:$0xf] }
 0x233   : > { %v4518_v3 = vadd.f32 %v2388_v22, %v2300_v2  ;;  %v3667_v2 = vld [vmem:[%s3850_s5 + $0x428] sm:$0xf0] }
 0x234   : > { %v3198_v20 = vor.u32 %v3667_v2, %v3197_v63  ;;  %v3677_v63 = vld [vmem:[%s3850_s5 + $0x478] sm:$0xf0] }
 0x235   : > { %2456 = vst [vmem:[%s4444_s27 + $0x40] sm:$0xff] %v4518_v3 }
 0x236   : > { %v2212_v58 = vpop.f32.mrf.mxu2 }
 0x237   : > { %v2213_v8 = vadd.f32 %v2212_v58, %v2124_v43  ;;  %v2301_v17 = vpop.f32.mrf.mxu3  ;;  %v3194_v43 = vor.u32 %v3662_v55, %v3191_v10  ;;  %v3235_v55 = vld [vmem:[%s3850_s5 + $0x474] sm:$0xf0] }
 0x238   : > { %v2126_v27 = vpop.f32.mrf.mxu1  ;;  %v3241_v10 = vld [vmem:[%s3850_s5 + $0x458] sm:$0xf] }
 0x239   : > { %v2302_v59 = vadd.f32 %v2301_v17, %v2213_v8  ;;  %v2127_v39 = vadd.f32 %v2126_v27, %v4288_v53  ;;  %v3206_v8 = vor.u32 %v3668_v11, %v3205_v9 }
 0x23a   : > { %v2393_v33 = vpop.f32.mrf.mxu0 }
 0x23b   : > { %v4531_v42 = vadd.f32 %v2390_v61, %v2302_v59  ;;  %2165 = vmatmul.bf16.gmra.mxu1 %v3158_v5  ;;  %2254 = vmatmul.bf16.gmra.mxu2 %v3162_v26  ;;  %v3663_v61 = vld [vmem:[%s3850_s5 + $0x40c] sm:$0xf] }
 0x23c   : > { %2343 = vmatmul.bf16.gmra.mxu3 %v3166_v36  ;;  %v3202_v58 = vor.u32 %v3663_v61, %v3199_v54 }
 0x23d   : > { %2432 = vmatmul.bf16.gmra.mxu0 %v3170_v28  ;;  %2457 = vst [vmem:[%s4444_s27 + $0x48] sm:$0xff] %v4531_v42 }
 0x23e   : > { %v2215_v40 = vpop.f32.mrf.mxu2 }
 0x23f   : > { %v2216_v38 = vadd.f32 %v2215_v40, %v2127_v39  ;;  %v2304_v49 = vpop.f32.mrf.mxu3 }
 0x240   : > { %v2128_v37 = vpop.f32.mrf.mxu1 }
 0x241   : > { %v2305_v22 = vadd.f32 %v2304_v49, %v2216_v38  ;;  %v2129_v53 = vadd.f32 %v2128_v37, %v4297_v60  ;;  %v3671_v38 = vld [vmem:[%s3850_s5 + $0x44c] sm:$0xf]  ;;  %v3227_v49 = vld [vmem:[%s3850_s5 + $0x46c] sm:$0xf0] }
 0x242   : > { %v2395_v34 = vpop.f32.mrf.mxu0  ;;  %v3233_v37 = vld [vmem:[%s3850_s5 + $0x450] sm:$0xf] }
 0x243   : > { %v4536_v62 = vadd.f32 %v2393_v33, %v2305_v22  ;;  %v3676_v22 = vld [vmem:[%s3850_s5 + $0x470] sm:$0xf0] }
 0x244   : > { %v3234_v9 = vor.u32 %v3676_v22, %v3233_v37 }
 0x245   : > { %2458 = vst [vmem:[%s4444_s27 + $0x50] sm:$0xff] %v4536_v62 }
 0x246   : > { %v2217_v16 = vpop.f32.mrf.mxu2 }
 0x247   : > { %v2218_v56 = vadd.f32 %v2217_v16, %v2129_v53  ;;  %v2306_v45 = vpop.f32.mrf.mxu3  ;;  %v3230_v53 = vor.u32 %v3671_v38, %v3227_v49 }
 0x248   : > { %v2131_v21 = vpop.f32.mrf.mxu1 }
 0x249   : > { %v2307_v17 = vadd.f32 %v2306_v45, %v2218_v56  ;;  %v2132_v60 = vadd.f32 %v2131_v21, %v4302_v41  ;;  %v3242_v56 = vor.u32 %v3677_v63, %v3241_v10 }
 0x24a   : > { %v2398_v5 = vpop.f32.mrf.mxu0 }
 0x24b   : > { %v4549_v26 = vadd.f32 %v2395_v34, %v2307_v17  ;;  %2170 = vmatmul.bf16.gmra.mxu1 %v3194_v43  ;;  %2259 = vmatmul.bf16.gmra.mxu2 %v3198_v20  ;;  %v3672_v34 = vld [vmem:[%s3850_s5 + $0x454] sm:$0xf] }
 0x24c   : > { %2348 = vmatmul.bf16.gmra.mxu3 %v3202_v58  ;;  %v3238_v16 = vor.u32 %v3672_v34, %v3235_v55 }
 0x24d   : > { %2437 = vmatmul.bf16.gmra.mxu0 %v3206_v8  ;;  %2459 = vst [vmem:[%s4444_s27 + $0x58] sm:$0xff] %v4549_v26 }
 0x24e   : > { %v2220_v27 = vpop.f32.mrf.mxu2 }
 0x24f   : > { %v2221_v36 = vadd.f32 %v2220_v27, %v2132_v60  ;;  %v2309_v28 = vpop.f32.mrf.mxu3 }
 0x250   : > { %v2133_v59 = vpop.f32.mrf.mxu1 }
 0x251   : > { %v2310_v33 = vadd.f32 %v2309_v28, %v2221_v36  ;;  %v2134_v41 = vadd.f32 %v2133_v59, %v4311_v18 }
 0x252   : > { %v2400_v39 = vpop.f32.mrf.mxu0 }
 0x253   : > { %v4554_v40 = vadd.f32 %v2398_v5, %v2310_v33 }
 0x255   : > { %2460 = vst [vmem:[%s4444_s27 + $0x60] sm:$0xff] %v4554_v40 }
 0x256   : > { %v2222_v2 = vpop.f32.mrf.mxu2 }
 0x257   : > { %v2223_v61 = vadd.f32 %v2222_v2, %v2134_v41  ;;  %v2311_v54 = vpop.f32.mrf.mxu3 }
 0x258   : > { %v2136_v11 = vpop.f32.mrf.mxu1 }
 0x259   : > { %v2312_v45 = vadd.f32 %v2311_v54, %v2223_v61  ;;  %v2137_v18 = vadd.f32 %v2136_v11, %v4316_v25 }
 0x25a   : > { %v2403_v43 = vpop.f32.mrf.mxu0 }
 0x25b   : > { %v4567_v20 = vadd.f32 %v2400_v39, %v2312_v45  ;;  %2175 = vmatmul.bf16.gmra.mxu1 %v3230_v53  ;;  %2264 = vmatmul.bf16.gmra.mxu2 %v3234_v9 }
 0x25c   : > { %2353 = vmatmul.bf16.gmra.mxu3 %v3238_v16 }
 0x25d   : > { %2442 = vmatmul.bf16.gmra.mxu0 %v3242_v56  ;;  %2461 = vst [vmem:[%s4444_s27 + $0x68] sm:$0xff] %v4567_v20 }
 0x25e   : > { %v2225_v21 = vpop.f32.mrf.mxu2 }
 0x25f   : > { %v2226_v58 = vadd.f32 %v2225_v21, %v2137_v18  ;;  %v2314_v8 = vpop.f32.mrf.mxu3 }
 0x260   : > { %v2138_v17 = vpop.f32.mrf.mxu1 }
 0x261   : > { %v2315_v5 = vadd.f32 %v2314_v8, %v2226_v58  ;;  %v2139_v36 = vadd.f32 %v2138_v17, %v4325_v46 }
 0x262   : > { %v2405_v60 = vpop.f32.mrf.mxu0 }
 0x263   : > { %v4572_v27 = vadd.f32 %v2403_v43, %v2315_v5 }
 0x265   : > { %2462 = vst [vmem:[%s4444_s27 + $0x70] sm:$0xff] %v4572_v27 }
 0x266   : > { %v2227_v28 = vpop.f32.mrf.mxu2 }
 0x267   : > { %v2228_v59 = vadd.f32 %v2227_v28, %v2139_v36  ;;  %v2316_v33 = vpop.f32.mrf.mxu3 }
 0x268   : > { %v2141_v39 = vpop.f32.mrf.mxu1 }
 0x269   : > { %v2317_v38 = vadd.f32 %v2316_v33, %v2228_v59  ;;  %v2142_v37 = vadd.f32 %v2141_v39, %v4330_v57 }
 0x26a   : > { %v2408_v25 = vpop.f32.mrf.mxu0 }
 0x26b   : > { %v4577_v49 = vadd.f32 %v2405_v60, %v2317_v38 }
 0x26d   : > { %2463 = vst [vmem:[%s4444_s27 + $0x78] sm:$0xff] %v4577_v49 }
 0x26e   : > { %v2230_v22 = vpop.f32.mrf.mxu2 }
 0x26f   : > { %v2231_v34 = vadd.f32 %v2230_v22, %v2142_v37  ;;  %v2319_v55 = vpop.f32.mrf.mxu3 }
 0x270   : > { %v2143_v41 = vpop.f32.mrf.mxu1 }
 0x271   : > { %v2320_v10 = vadd.f32 %v2319_v55, %v2231_v34  ;;  %v2144_v2 = vadd.f32 %v2143_v41, %v4339_v50 }
 0x272   : > { %v2410_v46 = vpop.f32.mrf.mxu0 }
 0x273   : > { %v4582_v63 = vadd.f32 %v2408_v25, %v2320_v10 }
 0x275   : > { %2464 = vst [vmem:[%s4444_s27 + $0x80] sm:$0xff] %v4582_v63 }
 0x276   : > { %v2232_v61 = vpop.f32.mrf.mxu2 }
 0x277   : > { %v2233_v54 = vadd.f32 %v2232_v61, %v2144_v2  ;;  %v2321_v53 = vpop.f32.mrf.mxu3 }
 0x278   : > { %v2146_v9 = vpop.f32.mrf.mxu1 }
 0x279   : > { %v2322_v11 = vadd.f32 %v2321_v53, %v2233_v54  ;;  %v2147_v56 = vadd.f32 %v2146_v9, %v4344_v4 }
 0x27a   : > { %v2413_v57 = vpop.f32.mrf.mxu0 }
 0x27b   : > { %v4587_v16 = vadd.f32 %v2410_v46, %v2322_v11 }
 0x27d   : > { %2465 = vst [vmem:[%s4444_s27 + $0x88] sm:$0xff] %v4587_v16 }
 0x27e   : > { %v2235_v45 = vpop.f32.mrf.mxu2 }
 0x27f   : > { %v2236_v43 = vadd.f32 %v2235_v45, %v2147_v56  ;;  %v2324_v18 = vpop.f32.mrf.mxu3 }
 0x280   : > { %v2148_v21 = vpop.f32.mrf.mxu1 }
 0x281   : > { %v2325_v58 = vadd.f32 %v2324_v18, %v2236_v43  ;;  %v2149_v17 = vadd.f32 %v2148_v21, %v4353_v6 }
 0x282   : > { %v2415_v50 = vpop.f32.mrf.mxu0 }
 0x283   : > { %v4592_v8 = vadd.f32 %v2413_v57, %v2325_v58 }
 0x285   : > { %2466 = vst [vmem:[%s4444_s27 + $0x90] sm:$0xff] %v4592_v8 }
 0x286   : > { %v2237_v5 = vpop.f32.mrf.mxu2 }
 0x287   : > { %v2238_v60 = vadd.f32 %v2237_v5, %v2149_v17  ;;  %v2326_v36 = vpop.f32.mrf.mxu3 }
 0x288   : > { %v2151_v28 = vpop.f32.mrf.mxu1 }
 0x289   : > { %v2327_v59 = vadd.f32 %v2326_v36, %v2238_v60  ;;  %v2152_v39 = vadd.f32 %v2151_v28, %v4358_v30 }
 0x28a   : > { %v2418_v4 = vpop.f32.mrf.mxu0 }
 0x28b   : > { %v4597_v33 = vadd.f32 %v2415_v50, %v2327_v59 }
 0x28d   : > { %2467 = vst [vmem:[%s4444_s27 + $0x98] sm:$0xff] %v4597_v33 }
 0x28e   : > { %v2240_v38 = vpop.f32.mrf.mxu2 }
 0x28f   : > { %v2241_v25 = vadd.f32 %v2240_v38, %v2152_v39  ;;  %v2329_v37 = vpop.f32.mrf.mxu3 }
 0x290   : > { %v2153_v22 = vpop.f32.mrf.mxu1 }
 0x291   : > { %v2330_v34 = vadd.f32 %v2329_v37, %v2241_v25  ;;  %v2154_v41 = vadd.f32 %v2153_v22, %v4367_v31 }
 0x292   : > { %v2420_v6 = vpop.f32.mrf.mxu0 }
 0x293   : > { %v4602_v55 = vadd.f32 %v2418_v4, %v2330_v34 }
 0x295   : > { %2468 = vst [vmem:[%s4444_s27 + $0xa0] sm:$0xff] %v4602_v55 }
 0x296   : > { %v2242_v10 = vpop.f32.mrf.mxu2 }
 0x297   : > { %v2243_v46 = vadd.f32 %v2242_v10, %v2154_v41  ;;  %v2331_v2 = vpop.f32.mrf.mxu3 }
 0x298   : > { %v2156_v61 = vpop.f32.mrf.mxu1 }
 0x299   : > { %v2332_v54 = vadd.f32 %v2331_v2, %v2243_v46  ;;  %v2157_v9 = vadd.f32 %v2156_v61, %v4372_v48 }
 0x29a   : > { %v2423_v30 = vpop.f32.mrf.mxu0 }
 0x29b   : > { %v4607_v53 = vadd.f32 %v2420_v6, %v2332_v54 }
 0x29d   : > { %2469 = vst [vmem:[%s4444_s27 + $0xa8] sm:$0xff] %v4607_v53 }
 0x29e   : > { %v2245_v11 = vpop.f32.mrf.mxu2 }
 0x29f   : > { %v2246_v57 = vadd.f32 %v2245_v11, %v2157_v9  ;;  %v2334_v56 = vpop.f32.mrf.mxu3 }
 0x2a0   : > { %v2158_v45 = vpop.f32.mrf.mxu1 }
 0x2a1   : > { %v2335_v43 = vadd.f32 %v2334_v56, %v2246_v57  ;;  %v2159_v21 = vadd.f32 %v2158_v45, %v4381_v0 }
 0x2a2   : > { %v2425_v31 = vpop.f32.mrf.mxu0 }
 0x2a3   : > { %v4612_v18 = vadd.f32 %v2423_v30, %v2335_v43 }
 0x2a5   : > { %2470 = vst [vmem:[%s4444_s27 + $0xb0] sm:$0xff] %v4612_v18 }
 0x2a6   : > { %v2247_v58 = vpop.f32.mrf.mxu2 }
 0x2a7   : > { %v2248_v50 = vadd.f32 %v2247_v58, %v2159_v21  ;;  %v2336_v17 = vpop.f32.mrf.mxu3 }
 0x2a8   : > { %v2161_v5 = vpop.f32.mrf.mxu1 }
 0x2a9   : > { %v2337_v60 = vadd.f32 %v2336_v17, %v2248_v50  ;;  %v2162_v28 = vadd.f32 %v2161_v5, %v4386_v47 }
 0x2aa   : > { %v2428_v48 = vpop.f32.mrf.mxu0 }
 0x2ab   : > { %v4617_v36 = vadd.f32 %v2425_v31, %v2337_v60 }
 0x2ad   : > { %2471 = vst [vmem:[%s4444_s27 + $0xb8] sm:$0xff] %v4617_v36 }
 0x2ae   : > { %v2250_v59 = vpop.f32.mrf.mxu2 }
 0x2af   : > { %v2251_v4 = vadd.f32 %v2250_v59, %v2162_v28  ;;  %v2339_v39 = vpop.f32.mrf.mxu3 }
 0x2b0   : > { %v2163_v38 = vpop.f32.mrf.mxu1 }
 0x2b1   : > { %v2340_v25 = vadd.f32 %v2339_v39, %v2251_v4  ;;  %v2164_v22 = vadd.f32 %v2163_v38, %v4395_v51 }
 0x2b2   : > { %v2430_v0 = vpop.f32.mrf.mxu0 }
 0x2b3   : > { %v4622_v37 = vadd.f32 %v2428_v48, %v2340_v25 }
 0x2b5   : > { %2472 = vst [vmem:[%s4444_s27 + $0xc0] sm:$0xff] %v4622_v37 }
 0x2b6   : > { %v2252_v34 = vpop.f32.mrf.mxu2 }
 0x2b7   : > { %v2253_v6 = vadd.f32 %v2252_v34, %v2164_v22  ;;  %v2341_v41 = vpop.f32.mrf.mxu3 }
 0x2b8   : > { %v2166_v10 = vpop.f32.mrf.mxu1 }
 0x2b9   : > { %v2342_v46 = vadd.f32 %v2341_v41, %v2253_v6  ;;  %v2167_v61 = vadd.f32 %v2166_v10, %v4400_v23 }
 0x2ba   : > { %v2433_v47 = vpop.f32.mrf.mxu0 }
 0x2bb   : > { %v4627_v2 = vadd.f32 %v2430_v0, %v2342_v46 }
 0x2bd   : > { %2473 = vst [vmem:[%s4444_s27 + $0xc8] sm:$0xff] %v4627_v2 }
 0x2be   : > { %v2255_v54 = vpop.f32.mrf.mxu2 }
 0x2bf   : > { %v2256_v30 = vadd.f32 %v2255_v54, %v2167_v61  ;;  %v2344_v9 = vpop.f32.mrf.mxu3 }
 0x2c0   : > { %v2168_v11 = vpop.f32.mrf.mxu1 }
 0x2c1   : > { %v2345_v57 = vadd.f32 %v2344_v9, %v2256_v30  ;;  %v2169_v45 = vadd.f32 %v2168_v11, %v4409_v7 }
 0x2c2   : > { %v2435_v51 = vpop.f32.mrf.mxu0 }
 0x2c3   : > { %v4632_v56 = vadd.f32 %v2433_v47, %v2345_v57 }
 0x2c5   : > { %2474 = vst [vmem:[%s4444_s27 + $0xd0] sm:$0xff] %v4632_v56 }
 0x2c6   : > { %v2257_v43 = vpop.f32.mrf.mxu2 }
 0x2c7   : > { %v2258_v31 = vadd.f32 %v2257_v43, %v2169_v45  ;;  %v2346_v21 = vpop.f32.mrf.mxu3 }
 0x2c8   : > { %v2171_v58 = vpop.f32.mrf.mxu1 }
 0x2c9   : > { %v2347_v50 = vadd.f32 %v2346_v21, %v2258_v31  ;;  %v2172_v5 = vadd.f32 %v2171_v58, %v4414_v12 }
 0x2ca   : > { %v2438_v17 = vpop.f32.mrf.mxu0 }
 0x2cb   : > { %v4637_v23 = vadd.f32 %v2435_v51, %v2347_v50 }
 0x2cd   : > { %2475 = vst [vmem:[%s4444_s27 + $0xd8] sm:$0xff] %v4637_v23 }
 0x2ce   : > { %v2260_v60 = vpop.f32.mrf.mxu2 }
 0x2cf   : > { %v2261_v48 = vadd.f32 %v2260_v60, %v2172_v5  ;;  %v2349_v28 = vpop.f32.mrf.mxu3 }
 0x2d0   : > { %v2173_v59 = vpop.f32.mrf.mxu1 }
 0x2d1   : > { %v2350_v4 = vadd.f32 %v2349_v28, %v2261_v48  ;;  %v2174_v39 = vadd.f32 %v2173_v59, %v4423_v32 }
 0x2d2   : > { %v2440_v38 = vpop.f32.mrf.mxu0 }
 0x2d3   : > { %v4642_v7 = vadd.f32 %v2438_v17, %v2350_v4 }
 0x2d5   : > { %2476 = vst [vmem:[%s4444_s27 + $0xe0] sm:$0xff] %v4642_v7 }
 0x2d6   : > { %v2262_v25 = vpop.f32.mrf.mxu2 }
 0x2d7   : > { %v2263_v0 = vadd.f32 %v2262_v25, %v2174_v39  ;;  %v2351_v22 = vpop.f32.mrf.mxu3 }
 0x2d8   : > { %v2176_v34 = vpop.f32.mrf.mxu1 }
 0x2d9   : > { %v2352_v6 = vadd.f32 %v2351_v22, %v2263_v0  ;;  %v2177_v41 = vadd.f32 %v2176_v34, %v4428_v13 }
 0x2da   : > { %v2443_v61 = vpop.f32.mrf.mxu0 }
 0x2db   : > { %v4647_v12 = vadd.f32 %v2440_v38, %v2352_v6 }
 0x2dd   : > { %2477 = vst [vmem:[%s4444_s27 + $0xe8] sm:$0xff] %v4647_v12 }
 0x2de   : > { %v2265_v10 = vpop.f32.mrf.mxu2 }
 0x2df   : > { %v2266_v46 = vadd.f32 %v2265_v10, %v2177_v41  ;;  %v2354_v47 = vpop.f32.mrf.mxu3 }
 0x2e0   : > { %v2178_v32 = vpop.f32.mrf.mxu1 }
 0x2e1   : > { %v2355_v54 = vadd.f32 %v2354_v47, %v2266_v46  ;;  %v2179_v9 = vadd.f32 %v2178_v32, %v4437_v1 }
 0x2e2   : > { %v2445_v43 = vpop.f32.mrf.mxu0 }
 0x2e3   : > { %v4652_v30 = vadd.f32 %v2443_v61, %v2355_v54 }
 0x2e5   : > { %2478 = vst [vmem:[%s4444_s27 + $0xf0] sm:$0xff] %v4652_v30 }
 0x2e6   : > { %v2267_v11 = vpop.f32.mrf.mxu2 }
 0x2e7   : > { %v2268_v57 = vadd.f32 %v2267_v11, %v2179_v9  ;;  %v2356_v51 = vpop.f32.mrf.mxu3 }
 0x2e9   : > { %v2357_v45 = vadd.f32 %v2356_v51, %v2268_v57  ;;  %2483 = sbr.rel (%p3531_p4) target bundleno = 752 (0x2f0), region = 32 }
 0x2eb   : > { %v4657_v31 = vadd.f32 %v2445_v43, %v2357_v45 }
 0x2ed   : > { %2479 = vst [vmem:[%s4444_s27 + $0xf8] sm:$0xff] %v4657_v31 }
 0x2ee   : > { %v3792_v13 = vmov 0.0  }
 0x2ef   : > { %2484 = vst [vmem:[%s4774_s3] sm:$0x3] %v3792_v13 }
 0x2f0 PF: > { %v2486_v1 = vadd.f32 %v4459_v24, %v4446_v52  ;;  %v2523_v21 = vmul.f32 %v4446_v52, %v4446_v52  ;;  %v2524_v58 = vmul.f32 %v4459_v24, %v4459_v24  ;;  %v2525_v17 = vmul.f32 %v4464_v35, %v4464_v35 }
 0x2f1   : > { %v2526_v60 = vmul.f32 %v4477_v14, %v4477_v14  ;;  %v2527_v59 = vmul.f32 %v4482_v19, %v4482_v19  ;;  %v2528_v24 = vmul.f32 %v4495_v44, %v4495_v44  ;;  %v2529_v38 = vmul.f32 %v4500_v15, %v4500_v15 }
 0x2f2   : > { %v2487_v50 = vadd.f32 %v2486_v1, %v4464_v35  ;;  %v2555_v48 = vadd.f32 %v2524_v58, %v2523_v21  ;;  %v2530_v0 = vmul.f32 %v4513_v29, %v4513_v29  ;;  %v2531_v34 = vmul.f32 %v4518_v3, %v4518_v3 }
 0x2f3   : > { %v2532_v41 = vmul.f32 %v4531_v42, %v4531_v42  ;;  %v2533_v46 = vmul.f32 %v4536_v62, %v4536_v62  ;;  %v2534_v61 = vmul.f32 %v4549_v26, %v4549_v26  ;;  %v2535_v32 = vmul.f32 %v4554_v40, %v4554_v40 }
 0x2f4   : > { %v2488_v5 = vadd.f32 %v2487_v50, %v4477_v14  ;;  %v2556_v52 = vadd.f32 %v2555_v48, %v2525_v17  ;;  %v2536_v11 = vmul.f32 %v4567_v20, %v4567_v20  ;;  %v2537_v51 = vmul.f32 %v4572_v27, %v4572_v27 }
 0x2f5   : > { %v2538_v43 = vmul.f32 %v4577_v49, %v4577_v49  ;;  %v2539_v1 = vmul.f32 %v4582_v63, %v4582_v63  ;;  %v2540_v58 = vmul.f32 %v4587_v16, %v4587_v16  ;;  %v2541_v17 = vmul.f32 %v4592_v8, %v4592_v8 }
 0x2f6   : > { %v2489_v28 = vadd.f32 %v2488_v5, %v4482_v19  ;;  %v2557_v39 = vadd.f32 %v2556_v52, %v2526_v60  ;;  %v2542_v60 = vmul.f32 %v4597_v33, %v4597_v33  ;;  %v2544_v52 = vmul.f32 %v4607_v53, %v4607_v53 }
 0x2f7   : > { %vm2592_vm0 = vcmask 1040384  }
 0x2f8   : > { %v2490_v4 = vadd.f32 %v2489_v28, %v4495_v44  ;;  %v2558_v25 = vadd.f32 %v2557_v39, %v2527_v59  ;;  %v2543_v28 = vmul.f32 %v4602_v55, %v4602_v55 }
 0x2fa   : > { %v2491_v35 = vadd.f32 %v2490_v4, %v4500_v15  ;;  %v2559_v22 = vadd.f32 %v2558_v25, %v2528_v24  ;;  %v2545_v24 = vmul.f32 %v4612_v18, %v4612_v18  ;;  %v2547_v25 = vmul.f32 %v4622_v37, %v4622_v37 }
 0x2fc   : > { %v2492_v14 = vadd.f32 %v2491_v35, %v4513_v29  ;;  %v2560_v6 = vadd.f32 %v2559_v22, %v2529_v38  ;;  %v2546_v35 = vmul.f32 %v4617_v36, %v4617_v36 }
 0x2fe   : > { %v2493_v19 = vadd.f32 %v2492_v14, %v4518_v3  ;;  %v2561_v10 = vadd.f32 %v2560_v6, %v2530_v0  ;;  %v2548_v0 = vmul.f32 %v4627_v2, %v4627_v2  ;;  %v2550_v6 = vmul.f32 %v4637_v23, %v4637_v23 }
 0x300   : > { %v2494_v44 = vadd.f32 %v2493_v19, %v4531_v42  ;;  %v2562_v47 = vadd.f32 %v2561_v10, %v2531_v34  ;;  %v2549_v19 = vmul.f32 %v4632_v56, %v4632_v56 }
 0x302   : > { %v2495_v15 = vadd.f32 %v2494_v44, %v4536_v62  ;;  %v2563_v54 = vadd.f32 %v2562_v47, %v2532_v41  ;;  %v2551_v41 = vmul.f32 %v4642_v7, %v4642_v7  ;;  %v2553_v47 = vmul.f32 %v4652_v30, %v4652_v30 }
 0x304   : > { %v2496_v29 = vadd.f32 %v2495_v15, %v4549_v26  ;;  %v2564_v9 = vadd.f32 %v2563_v54, %v2533_v46  ;;  %v2552_v15 = vmul.f32 %v4647_v12, %v4647_v12 }
 0x306   : > { %v2497_v3 = vadd.f32 %v2496_v29, %v4554_v40  ;;  %v2565_v57 = vadd.f32 %v2564_v9, %v2534_v61  ;;  %v2554_v61 = vmul.f32 %v4657_v31, %v4657_v31 }
 0x308   : > { %v2498_v42 = vadd.f32 %v2497_v3, %v4567_v20  ;;  %v2566_v45 = vadd.f32 %v2565_v57, %v2535_v32 }
 0x30a   : > { %v2499_v62 = vadd.f32 %v2498_v42, %v4572_v27  ;;  %v2567_v13 = vadd.f32 %v2566_v45, %v2536_v11 }
 0x30c   : > { %v2500_v26 = vadd.f32 %v2499_v62, %v4577_v49  ;;  %v2568_v21 = vadd.f32 %v2567_v13, %v2537_v51 }
 0x30e   : > { %v2501_v40 = vadd.f32 %v2500_v26, %v4582_v63  ;;  %v2569_v50 = vadd.f32 %v2568_v21, %v2538_v43  ;;  %v2485_v43 = vld [vmem:[%s4774_s3] sm:$0x3] }
 0x310   : > { %v2502_v20 = vadd.f32 %v2501_v40, %v4587_v16  ;;  %v2570_v5 = vadd.f32 %v2569_v50, %v2539_v1 }
 0x312   : > { %v2503_v27 = vadd.f32 %v2502_v20, %v4592_v8  ;;  %v2571_v48 = vadd.f32 %v2570_v5, %v2540_v58 }
 0x314   : > { %v2504_v49 = vadd.f32 %v2503_v27, %v4597_v33  ;;  %v2572_v59 = vadd.f32 %v2571_v48, %v2541_v17 }
 0x316   : > { %v2505_v63 = vadd.f32 %v2504_v49, %v4602_v55  ;;  %v2573_v4 = vadd.f32 %v2572_v59, %v2542_v60 }
 0x318   : > { %v2506_v16 = vadd.f32 %v2505_v63, %v4607_v53  ;;  %v2574_v39 = vadd.f32 %v2573_v4, %v2543_v28 }
 0x31a   : > { %v2507_v8 = vadd.f32 %v2506_v16, %v4612_v18  ;;  %v2575_v38 = vadd.f32 %v2574_v39, %v2544_v52 }
 0x31c   : > { %v2508_v33 = vadd.f32 %v2507_v8, %v4617_v36  ;;  %v2576_v14 = vadd.f32 %v2575_v38, %v2545_v24 }
 0x31e   : > { %v2509_v55 = vadd.f32 %v2508_v33, %v4622_v37  ;;  %v2577_v22 = vadd.f32 %v2576_v14, %v2546_v35 }
 0x320   : > { %v2510_v53 = vadd.f32 %v2509_v55, %v4627_v2  ;;  %v2578_v34 = vadd.f32 %v2577_v22, %v2547_v25 }
 0x322   : > { %v2511_v18 = vadd.f32 %v2510_v53, %v4632_v56  ;;  %v2579_v44 = vadd.f32 %v2578_v34, %v2548_v0 }
 0x324   : > { %v2512_v36 = vadd.f32 %v2511_v18, %v4637_v23  ;;  %v2580_v10 = vadd.f32 %v2579_v44, %v2549_v19 }
 0x326   : > { %v2513_v37 = vadd.f32 %v2512_v36, %v4642_v7  ;;  %v2581_v46 = vadd.f32 %v2580_v10, %v2550_v6 }
 0x328   : > { %v2514_v2 = vadd.f32 %v2513_v37, %v4647_v12  ;;  %v2582_v29 = vadd.f32 %v2581_v46, %v2551_v41 }
 0x32a   : > { %v2515_v56 = vadd.f32 %v2514_v2, %v4652_v30  ;;  %v2583_v54 = vadd.f32 %v2582_v29, %v2552_v15 }
 0x32c   : > { %v2516_v23 = vadd.f32 %v2515_v56, %v4657_v31  ;;  %v2584_v3 = vadd.f32 %v2583_v54, %v2553_v47 }
 0x32e   : > { %v2517_v7 = vrot.slane %v2516_v23, 4  ;;  %v2585_v9 = vadd.f32 %v2584_v3, %v2554_v61 }
 0x330   : > { %v2518_v32 = vadd.f32 %v2517_v7, %v2516_v23  ;;  %v2586_v11 = vrot.slane %v2585_v9, 4 }
 0x332   : > { %v2519_v42 = vrot.slane %v2518_v32, 2  ;;  %v2587_v57 = vadd.f32 %v2586_v11, %v2585_v9 }
 0x334   : > { %v2520_v12 = vadd.f32 %v2519_v42, %v2518_v32  ;;  %v2588_v51 = vrot.slane %v2587_v57, 2 }
 0x336   : > { %v2521_v62 = vrot.slane %v2520_v12, 1  ;;  %v2589_v45 = vadd.f32 %v2588_v51, %v2587_v57 }
 0x338   : > { %v2522_v26 = vadd.f32 %v2521_v62, %v2520_v12  ;;  %v2590_v30 = vrot.slane %v2589_v45, 1 }
 0x33a   : > { %v2591_v31 = vadd.f32 %v2590_v30, %v2589_v45 }
 0x33c   : > { %v2593_v13 = vsel %vm2592_vm0, %v2522_v26, %v2591_v31 }
 0x33d   : > { %v2594_v40 = vadd.f32 %v2593_v13, %v2485_v43 }
 0x33f   : > { %2595 = vst [vmem:[%s4774_s3] sm:$0x3] %v2594_v40 }
 0x340 PF: > { %s14_s12 = sadd.s32 1, %s3790_s12  }
 0x341   : > { %p11_p5 = scmp.ge.s32.totalorder %s14_s12, 4  }
 0x343   :  { %13 = sbr.rel (!%p11_p5) target bundleno = 1 (0x1), region = 70 }

</bundles_post_ra>
